<compile_context>
chip_gen: v6e
topology: v6e:2x2x1
jax: 0.10.0
libtpu: 0.0.40
codegen_flags: <defaults>
</compile_context>

<pallas_src>
import functools

import jax
import jax.numpy as jnp
from jax.experimental import pallas as pl
from jax.experimental.pallas import tpu as pltpu


_LAYER_DIMS = [63, 128, 256, 512, 1024, 512, 256, 128]  # + num_classes


def _fused_mlp_kernel(x_ref, *refs, n_layers, bias_offsets, out_dims):
    """Whole MLP in one kernel body.

    refs = (w_1..w_n (bf16, VMEM-resident across the batch grid), bias_slab
    (f32, (1, sum(out_dims))), o_ref). Matmuls hit the MXU with f32 accumulation.
    """
    w_refs = refs[:n_layers]
    b_ref = refs[n_layers]
    o_ref = refs[n_layers + 1]

    h = x_ref[...]                                      # (TB, K0) float32
    for i in range(n_layers):
        y = jnp.dot(h.astype(jnp.bfloat16), w_refs[i][...],
                    preferred_element_type=jnp.float32)
        off, n = bias_offsets[i], out_dims[i]
        y = y + b_ref[:, off:off + n]                   # (1, n) broadcasts over TB
        h = jnp.maximum(y, 0.0) if i < n_layers - 1 else y
    o_ref[...] = h.astype(o_ref.dtype)


def _fused_forward(x_pad, ws, b_cat, *, tile_b):
    """x_pad: (Bp, K0) f32 with Bp % tile_b == 0; ws: bf16 (in, out) weights;
    b_cat: (1, sum(out_dims)) f32 concatenated bias slab."""
    Bp, k0 = x_pad.shape
    n = len(ws)
    n_out = ws[-1].shape[1]
    out_dims = tuple(int(w.shape[1]) for w in ws)
    bias_offsets = tuple(int(sum(out_dims[:i])) for i in range(n))

    kernel = functools.partial(_fused_mlp_kernel, n_layers=n,
                               bias_offsets=bias_offsets, out_dims=out_dims)

    # Grid over batch tiles; weights/biases use a constant block index so they
    # are DMA'd once and stay resident in VMEM across all grid steps.
    grid = (Bp // tile_b,)
    in_specs = [pl.BlockSpec((tile_b, k0), lambda b: (b, 0))]
    in_specs += [pl.BlockSpec(w.shape, lambda b: (0, 0)) for w in ws]
    in_specs += [pl.BlockSpec(b_cat.shape, lambda b: (0, 0))]

    flops = 2 * Bp * sum(int(w.shape[0]) * int(w.shape[1]) for w in ws)
    bytes_accessed = (sum(int(w.size) * w.dtype.itemsize for w in ws)
                      + int(b_cat.size) * b_cat.dtype.itemsize
                      + int(x_pad.size) * x_pad.dtype.itemsize
                      + Bp * n_out * 4)

    return pl.pallas_call(
        kernel,
        out_shape=jax.ShapeDtypeStruct((Bp, n_out), jnp.float32),
        grid=grid,
        in_specs=in_specs,
        out_specs=pl.BlockSpec((tile_b, n_out), lambda b: (b, 0)),
        compiler_params=pltpu.CompilerParams(
            dimension_semantics=("arbitrary",),   # keep weights resident; no TC split
            vmem_limit_bytes=64 << 20),
        cost_estimate=pl.CostEstimate(flops=flops, transcendentals=0,
                                      bytes_accessed=bytes_accessed),
    )(x_pad, *ws, b_cat)


def init_params(key, num_classes):
    """Deterministic init matching nn.Linear shapes (PyTorch stores (out, in);
    we keep the transposed (in, out) so the kernel computes y = x @ W + b)."""
    dims = _LAYER_DIMS + [num_classes]
    params = []
    for i in range(len(dims) - 1):
        key, wk, bk = jax.random.split(key, 3)
        fan_in, fan_out = dims[i], dims[i + 1]
        bound = 1.0 / float(jnp.sqrt(fan_in))
        w = jax.random.uniform(wk, (fan_in, fan_out), jnp.float32, -bound, bound)
        b = jax.random.uniform(bk, (1, fan_out), jnp.float32, -bound, bound)
        params.append((w, b))
    return params


def prepare_params(params, *, in_pad=128):
    """One-time prep (outside jit): zero-pad layer-0 input dim 63->128 and the
    final output dim up to the next multiple of 128, cast weights to bf16
    (halves the HBM weight stream), concatenate biases into one f32 slab."""
    n = len(params)
    ws, bs = [], []
    for i, (w, b) in enumerate(params):
        if i == 0 and w.shape[0] < in_pad:
            w = jnp.pad(w, ((0, in_pad - w.shape[0]), (0, 0)))
        if i == n - 1:
            out_pad = 128 * (-(-w.shape[1] // 128))
            if w.shape[1] < out_pad:
                w = jnp.pad(w, ((0, 0), (0, out_pad - w.shape[1])))
                b = jnp.pad(b, ((0, 0), (0, out_pad - b.shape[1])))
        # TODO(synk): optional weight quantization here (int8 on v5e/v6e,
        # fp8 e4m3 on v7x) with per-channel scales folded into the epilogue.
        ws.append(w.astype(jnp.bfloat16))
        bs.append(b.astype(jnp.float32))
    b_cat = jnp.concatenate(bs, axis=1)   # (1, 2944): one DMA instead of eight
    return tuple(ws), b_cat


@functools.partial(jax.jit, static_argnames=("num_classes", "tile_b"))
def linear_model_forward(x, ws, b_cat, num_classes, tile_b=8):
    B = x.shape[0]
    k0 = ws[0].shape[0]
    if x.shape[1] != k0:
        x = jnp.pad(x, ((0, 0), (0, k0 - x.shape[1])))
    Bp = tile_b * (-(-B // tile_b))
    if Bp != B:
        x = jnp.pad(x, ((0, Bp - B), (0, 0)))
    out_padded = _fused_forward(x, ws, b_cat, tile_b=tile_b)
    return out_padded[:B, :num_classes]


if __name__ == "__main__":
    num_classes = 10
    batch = 8

    key = jax.random.PRNGKey(0)
    key, xkey = jax.random.split(key)
    x = jax.random.normal(xkey, (batch, 63), jnp.float32)

    params = init_params(key, num_classes)
    ws, b_cat = prepare_params(params)

    out = linear_model_forward(x, ws, b_cat, num_classes)
    out = jax.block_until_ready(out)
    assert out.shape == (batch, num_classes), out.shape

    # Reference: same bf16 rounding of weights/activations, f32 accumulation.
    k0 = ws[0].shape[0]
    h = jnp.pad(x, ((0, 0), (0, k0 - x.shape[1])))
    off = 0
    for i, w in enumerate(ws):
        n_out_i = w.shape[1]
        a = h.astype(jnp.bfloat16).astype(jnp.float32)
        y = jnp.dot(a, w.astype(jnp.float32),
                    precision=jax.lax.Precision.HIGHEST)
        y = y + b_cat[:, off:off + n_out_i]
        h = jnp.maximum(y, 0.0) if i < len(ws) - 1 else y
        off += n_out_i
    ref = h[:, :num_classes]
    max_err = float(jnp.max(jnp.abs(out - ref)))
    assert jnp.allclose(out, ref, atol=5e-3, rtol=5e-3), max_err

    print("KERNEL_OK")
</pallas_src>

<mosaic_0001>
module attributes {stable_mosaic.version = 11 : i64} {
  func.func @_fused_mlp_kernel(%arg0: i32, %arg1: memref<8x128xf32, #tpu.memory_space<vmem>>, %arg2: memref<128x128xbf16, #tpu.memory_space<vmem>>, %arg3: memref<128x256xbf16, #tpu.memory_space<vmem>>, %arg4: memref<256x512xbf16, #tpu.memory_space<vmem>>, %arg5: memref<512x1024xbf16, #tpu.memory_space<vmem>>, %arg6: memref<1024x512xbf16, #tpu.memory_space<vmem>>, %arg7: memref<512x256xbf16, #tpu.memory_space<vmem>>, %arg8: memref<256x128xbf16, #tpu.memory_space<vmem>>, %arg9: memref<128x128xbf16, #tpu.memory_space<vmem>>, %arg10: memref<1x2944xf32, #tpu.memory_space<vmem>>, %arg11: memref<8x128xf32, #tpu.memory_space<vmem>>) attributes {dimension_semantics = [#tpu.dimension_semantics<arbitrary>], iteration_bounds = array<i64: 1>, scalar_prefetch = 0 : i64, scratch_operands = 0 : i64, tpu.core_type = #tpu.core_type<tc>, window_params = [{transform_indices = @transform_0, window_bounds = array<i64: 8, 128>}, {pipeline_mode = #tpu.pipeline_mode<synchronous>, transform_indices = @transform_1, window_bounds = array<i64: 128, 128>}, {pipeline_mode = #tpu.pipeline_mode<synchronous>, transform_indices = @transform_2, window_bounds = array<i64: 128, 256>}, {pipeline_mode = #tpu.pipeline_mode<synchronous>, transform_indices = @transform_3, window_bounds = array<i64: 256, 512>}, {pipeline_mode = #tpu.pipeline_mode<synchronous>, transform_indices = @transform_4, window_bounds = array<i64: 512, 1024>}, {pipeline_mode = #tpu.pipeline_mode<synchronous>, transform_indices = @transform_5, window_bounds = array<i64: 1024, 512>}, {pipeline_mode = #tpu.pipeline_mode<synchronous>, transform_indices = @transform_6, window_bounds = array<i64: 512, 256>}, {pipeline_mode = #tpu.pipeline_mode<synchronous>, transform_indices = @transform_7, window_bounds = array<i64: 256, 128>}, {pipeline_mode = #tpu.pipeline_mode<synchronous>, transform_indices = @transform_8, window_bounds = array<i64: 128, 128>}, {pipeline_mode = #tpu.pipeline_mode<synchronous>, transform_indices = @transform_9, window_bounds = array<i64: 1, 2944>}, {transform_indices = @transform_10, window_bounds = array<i64: 8, 128>}]} {
    %c0 = arith.constant 0 : index
    %c0_0 = arith.constant 0 : index
    %0 = vector.load %arg1[%c0, %c0_0] : memref<8x128xf32, #tpu.memory_space<vmem>>, vector<8x128xf32>
    %1 = arith.truncf %0 : vector<8x128xf32> to vector<8x128xbf16>
    %c0_1 = arith.constant 0 : index
    %c0_2 = arith.constant 0 : index
    %2 = vector.load %arg2[%c0_1, %c0_2] : memref<128x128xbf16, #tpu.memory_space<vmem>>, vector<128x128xbf16>
    %cst = arith.constant dense<0.000000e+00> : vector<8x128xf32>
    %3 = tpu.matmul %1, %2, %cst {dimension_numbers = #tpu.dot_dimension_numbers<[1], [0], [0], [1], [0, 0, 1, 1], [], []>} : vector<8x128xbf16>, vector<128x128xbf16>, vector<8x128xf32> -> vector<8x128xf32>
    %c0_3 = arith.constant 0 : index
    %c0_4 = arith.constant 0 : index
    %4 = vector.load %arg10[%c0_3, %c0_4] : memref<1x2944xf32, #tpu.memory_space<vmem>>, vector<1x128xf32>
    %5 = vector.broadcast %4 : vector<1x128xf32> to vector<8x128xf32>
    %6 = arith.addf %3, %5 : vector<8x128xf32>
    %cst_5 = arith.constant 0.000000e+00 : f32
    %7 = vector.broadcast %cst_5 : f32 to vector<8x128xf32>
    %8 = arith.maximumf %6, %7 : vector<8x128xf32>
    %9 = arith.truncf %8 : vector<8x128xf32> to vector<8x128xbf16>
    %c0_6 = arith.constant 0 : index
    %c0_7 = arith.constant 0 : index
    %10 = vector.load %arg3[%c0_6, %c0_7] : memref<128x256xbf16, #tpu.memory_space<vmem>>, vector<128x256xbf16>
    %cst_8 = arith.constant dense<0.000000e+00> : vector<8x256xf32>
    %11 = tpu.matmul %9, %10, %cst_8 {dimension_numbers = #tpu.dot_dimension_numbers<[1], [0], [0], [1], [0, 0, 1, 1], [], []>} : vector<8x128xbf16>, vector<128x256xbf16>, vector<8x256xf32> -> vector<8x256xf32>
    %c0_9 = arith.constant 0 : index
    %c128 = arith.constant 128 : index
    %12 = vector.load %arg10[%c0_9, %c128] : memref<1x2944xf32, #tpu.memory_space<vmem>>, vector<1x256xf32>
    %13 = vector.broadcast %12 : vector<1x256xf32> to vector<8x256xf32>
    %14 = arith.addf %11, %13 : vector<8x256xf32>
    %cst_10 = arith.constant 0.000000e+00 : f32
    %15 = vector.broadcast %cst_10 : f32 to vector<8x256xf32>
    %16 = arith.maximumf %14, %15 : vector<8x256xf32>
    %17 = arith.truncf %16 : vector<8x256xf32> to vector<8x256xbf16>
    %c0_11 = arith.constant 0 : index
    %c0_12 = arith.constant 0 : index
    %18 = vector.load %arg4[%c0_11, %c0_12] : memref<256x512xbf16, #tpu.memory_space<vmem>>, vector<256x512xbf16>
    %cst_13 = arith.constant dense<0.000000e+00> : vector<8x512xf32>
    %19 = tpu.matmul %17, %18, %cst_13 {dimension_numbers = #tpu.dot_dimension_numbers<[1], [0], [0], [1], [0, 0, 1, 1], [], []>} : vector<8x256xbf16>, vector<256x512xbf16>, vector<8x512xf32> -> vector<8x512xf32>
    %c0_14 = arith.constant 0 : index
    %c384 = arith.constant 384 : index
    %20 = vector.load %arg10[%c0_14, %c384] : memref<1x2944xf32, #tpu.memory_space<vmem>>, vector<1x512xf32>
    %21 = vector.broadcast %20 : vector<1x512xf32> to vector<8x512xf32>
    %22 = arith.addf %19, %21 : vector<8x512xf32>
    %cst_15 = arith.constant 0.000000e+00 : f32
    %23 = vector.broadcast %cst_15 : f32 to vector<8x512xf32>
    %24 = arith.maximumf %22, %23 : vector<8x512xf32>
    %25 = arith.truncf %24 : vector<8x512xf32> to vector<8x512xbf16>
    %c0_16 = arith.constant 0 : index
    %c0_17 = arith.constant 0 : index
    %26 = vector.load %arg5[%c0_16, %c0_17] : memref<512x1024xbf16, #tpu.memory_space<vmem>>, vector<512x1024xbf16>
    %cst_18 = arith.constant dense<0.000000e+00> : vector<8x1024xf32>
    %27 = tpu.matmul %25, %26, %cst_18 {dimension_numbers = #tpu.dot_dimension_numbers<[1], [0], [0], [1], [0, 0, 1, 1], [], []>} : vector<8x512xbf16>, vector<512x1024xbf16>, vector<8x1024xf32> -> vector<8x1024xf32>
    %c0_19 = arith.constant 0 : index
    %c896 = arith.constant 896 : index
    %28 = vector.load %arg10[%c0_19, %c896] : memref<1x2944xf32, #tpu.memory_space<vmem>>, vector<1x1024xf32>
    %29 = vector.broadcast %28 : vector<1x1024xf32> to vector<8x1024xf32>
    %30 = arith.addf %27, %29 : vector<8x1024xf32>
    %cst_20 = arith.constant 0.000000e+00 : f32
    %31 = vector.broadcast %cst_20 : f32 to vector<8x1024xf32>
    %32 = arith.maximumf %30, %31 : vector<8x1024xf32>
    %33 = arith.truncf %32 : vector<8x1024xf32> to vector<8x1024xbf16>
    %c0_21 = arith.constant 0 : index
    %c0_22 = arith.constant 0 : index
    %34 = vector.load %arg6[%c0_21, %c0_22] : memref<1024x512xbf16, #tpu.memory_space<vmem>>, vector<1024x512xbf16>
    %cst_23 = arith.constant dense<0.000000e+00> : vector<8x512xf32>
    %35 = tpu.matmul %33, %34, %cst_23 {dimension_numbers = #tpu.dot_dimension_numbers<[1], [0], [0], [1], [0, 0, 1, 1], [], []>} : vector<8x1024xbf16>, vector<1024x512xbf16>, vector<8x512xf32> -> vector<8x512xf32>
    %c0_24 = arith.constant 0 : index
    %c1920 = arith.constant 1920 : index
    %36 = vector.load %arg10[%c0_24, %c1920] : memref<1x2944xf32, #tpu.memory_space<vmem>>, vector<1x512xf32>
    %37 = vector.broadcast %36 : vector<1x512xf32> to vector<8x512xf32>
    %38 = arith.addf %35, %37 : vector<8x512xf32>
    %cst_25 = arith.constant 0.000000e+00 : f32
    %39 = vector.broadcast %cst_25 : f32 to vector<8x512xf32>
    %40 = arith.maximumf %38, %39 : vector<8x512xf32>
    %41 = arith.truncf %40 : vector<8x512xf32> to vector<8x512xbf16>
    %c0_26 = arith.constant 0 : index
    %c0_27 = arith.constant 0 : index
    %42 = vector.load %arg7[%c0_26, %c0_27] : memref<512x256xbf16, #tpu.memory_space<vmem>>, vector<512x256xbf16>
    %cst_28 = arith.constant dense<0.000000e+00> : vector<8x256xf32>
    %43 = tpu.matmul %41, %42, %cst_28 {dimension_numbers = #tpu.dot_dimension_numbers<[1], [0], [0], [1], [0, 0, 1, 1], [], []>} : vector<8x512xbf16>, vector<512x256xbf16>, vector<8x256xf32> -> vector<8x256xf32>
    %c0_29 = arith.constant 0 : index
    %c2432 = arith.constant 2432 : index
    %44 = vector.load %arg10[%c0_29, %c2432] : memref<1x2944xf32, #tpu.memory_space<vmem>>, vector<1x256xf32>
    %45 = vector.broadcast %44 : vector<1x256xf32> to vector<8x256xf32>
    %46 = arith.addf %43, %45 : vector<8x256xf32>
    %cst_30 = arith.constant 0.000000e+00 : f32
    %47 = vector.broadcast %cst_30 : f32 to vector<8x256xf32>
    %48 = arith.maximumf %46, %47 : vector<8x256xf32>
    %49 = arith.truncf %48 : vector<8x256xf32> to vector<8x256xbf16>
    %c0_31 = arith.constant 0 : index
    %c0_32 = arith.constant 0 : index
    %50 = vector.load %arg8[%c0_31, %c0_32] : memref<256x128xbf16, #tpu.memory_space<vmem>>, vector<256x128xbf16>
    %cst_33 = arith.constant dense<0.000000e+00> : vector<8x128xf32>
    %51 = tpu.matmul %49, %50, %cst_33 {dimension_numbers = #tpu.dot_dimension_numbers<[1], [0], [0], [1], [0, 0, 1, 1], [], []>} : vector<8x256xbf16>, vector<256x128xbf16>, vector<8x128xf32> -> vector<8x128xf32>
    %c0_34 = arith.constant 0 : index
    %c2688 = arith.constant 2688 : index
    %52 = vector.load %arg10[%c0_34, %c2688] : memref<1x2944xf32, #tpu.memory_space<vmem>>, vector<1x128xf32>
    %53 = vector.broadcast %52 : vector<1x128xf32> to vector<8x128xf32>
    %54 = arith.addf %51, %53 : vector<8x128xf32>
    %cst_35 = arith.constant 0.000000e+00 : f32
    %55 = vector.broadcast %cst_35 : f32 to vector<8x128xf32>
    %56 = arith.maximumf %54, %55 : vector<8x128xf32>
    %57 = arith.truncf %56 : vector<8x128xf32> to vector<8x128xbf16>
    %c0_36 = arith.constant 0 : index
    %c0_37 = arith.constant 0 : index
    %58 = vector.load %arg9[%c0_36, %c0_37] : memref<128x128xbf16, #tpu.memory_space<vmem>>, vector<128x128xbf16>
    %cst_38 = arith.constant dense<0.000000e+00> : vector<8x128xf32>
    %59 = tpu.matmul %57, %58, %cst_38 {dimension_numbers = #tpu.dot_dimension_numbers<[1], [0], [0], [1], [0, 0, 1, 1], [], []>} : vector<8x128xbf16>, vector<128x128xbf16>, vector<8x128xf32> -> vector<8x128xf32>
    %c0_39 = arith.constant 0 : index
    %c2816 = arith.constant 2816 : index
    %60 = vector.load %arg10[%c0_39, %c2816] : memref<1x2944xf32, #tpu.memory_space<vmem>>, vector<1x128xf32>
    %61 = vector.broadcast %60 : vector<1x128xf32> to vector<8x128xf32>
    %62 = arith.addf %59, %61 : vector<8x128xf32>
    %c0_40 = arith.constant 0 : index
    %c0_41 = arith.constant 0 : index
    %63 = vector.load %arg11[%c0_40, %c0_41] : memref<8x128xf32, #tpu.memory_space<vmem>>, vector<8x128xf32>
    tpu.vector_store %arg11[%c0_40, %c0_41], %62 {strides = array<i32>} : memref<8x128xf32, #tpu.memory_space<vmem>>, vector<8x128xf32>,
    return
  }
  func.func @transform_0(%arg0: i32) -> (i32, i32) {
    %c0_i32 = arith.constant 0 : i32
    %c0_i32_0 = arith.constant 0 : i32
    return %arg0, %c0_i32 : i32, i32
  }
  func.func @transform_1(%arg0: i32) -> (i32, i32) {
    %c0_i32 = arith.constant 0 : i32
    %c0_i32_0 = arith.constant 0 : i32
    %c0_i32_1 = arith.constant 0 : i32
    return %c0_i32, %c0_i32_0 : i32, i32
  }
  func.func @transform_2(%arg0: i32) -> (i32, i32) {
    %c0_i32 = arith.constant 0 : i32
    %c0_i32_0 = arith.constant 0 : i32
    %c0_i32_1 = arith.constant 0 : i32
    return %c0_i32, %c0_i32_0 : i32, i32
  }
  func.func @transform_3(%arg0: i32) -> (i32, i32) {
    %c0_i32 = arith.constant 0 : i32
    %c0_i32_0 = arith.constant 0 : i32
    %c0_i32_1 = arith.constant 0 : i32
    return %c0_i32, %c0_i32_0 : i32, i32
  }
  func.func @transform_4(%arg0: i32) -> (i32, i32) {
    %c0_i32 = arith.constant 0 : i32
    %c0_i32_0 = arith.constant 0 : i32
    %c0_i32_1 = arith.constant 0 : i32
    return %c0_i32, %c0_i32_0 : i32, i32
  }
  func.func @transform_5(%arg0: i32) -> (i32, i32) {
    %c0_i32 = arith.constant 0 : i32
    %c0_i32_0 = arith.constant 0 : i32
    %c0_i32_1 = arith.constant 0 : i32
    return %c0_i32, %c0_i32_0 : i32, i32
  }
  func.func @transform_6(%arg0: i32) -> (i32, i32) {
    %c0_i32 = arith.constant 0 : i32
    %c0_i32_0 = arith.constant 0 : i32
    %c0_i32_1 = arith.constant 0 : i32
    return %c0_i32, %c0_i32_0 : i32, i32
  }
  func.func @transform_7(%arg0: i32) -> (i32, i32) {
    %c0_i32 = arith.constant 0 : i32
    %c0_i32_0 = arith.constant 0 : i32
    %c0_i32_1 = arith.constant 0 : i32
    return %c0_i32, %c0_i32_0 : i32, i32
  }
  func.func @transform_8(%arg0: i32) -> (i32, i32) {
    %c0_i32 = arith.constant 0 : i32
    %c0_i32_0 = arith.constant 0 : i32
    %c0_i32_1 = arith.constant 0 : i32
    return %c0_i32, %c0_i32_0 : i32, i32
  }
  func.func @transform_9(%arg0: i32) -> (i32, i32) {
    %c0_i32 = arith.constant 0 : i32
    %c0_i32_0 = arith.constant 0 : i32
    %c0_i32_1 = arith.constant 0 : i32
    return %c0_i32, %c0_i32_0 : i32, i32
  }
  func.func @transform_10(%arg0: i32) -> (i32, i32) {
    %c0_i32 = arith.constant 0 : i32
    %c0_i32_0 = arith.constant 0 : i32
    return %arg0, %c0_i32 : i32, i32
  }
}

</mosaic_0001>

<bundles_post_ra>
// kernel: linear_model_forward.1
= control target key start
LH: loop header
LB: loop body
LE: loop exit
PB: predicated region body
PF: predicated region fallthrough
CT: control target
= control target key end

     0   :  { %15 = vsyncpa [#allocation3], 0  ;;  %s7416_s0 = inlined_call_operand.vmem [shape: f32[8,128], index: 0, kind: input, shape index: {}]   ;;  %s7417_s1 = inlined_call_operand.hbm [shape: bf16[128,128], index: 1, kind: input, shape index: {}]   ;;  %s7418_s2 = inlined_call_operand.hbm [shape: bf16[128,256], index: 2, kind: input, shape index: {}]   ;;  %s7419_s3 = inlined_call_operand.hbm [shape: bf16[256,512], index: 3, kind: input, shape index: {}]   ;;  %s7420_s4 = inlined_call_operand.hbm [shape: bf16[512,1024], index: 4, kind: input, shape index: {}]   ;;  %s7421_s5 = inlined_call_operand.hbm [shape: bf16[1024,512], index: 5, kind: input, shape index: {}]   ;;  %s7422_s6 = inlined_call_operand.hbm [shape: bf16[512,256], index: 6, kind: input, shape index: {}]   ;;  %s7423_s7 = inlined_call_operand.hbm [shape: bf16[256,128], index: 7, kind: input, shape index: {}]   ;;  %s7424_s8 = inlined_call_operand.hbm [shape: bf16[128,128], index: 8, kind: input, shape index: {}]   ;;  %s7425_s9 = inlined_call_operand.vmem [shape: f32[1,2944], index: 9, kind: input, shape index: {}]   ;;  %s7426_s10 = inlined_call_operand.hbm [shape: f32[8,128], index: 10, kind: output, shape index: {}]  }
   0x1   :  { %16 = vsyncpa [#allocation6], 0 }
   0x2   :  { %17 = vsyncpa [#allocation9], 0 }
   0x3   :  { %18 = vsyncpa [#allocation12], 0 }
   0x4   :  { %19 = vsyncpa [#allocation15], 0 }
   0x5   :  { %20 = vsyncpa [#allocation4], 0  ;;  %s7131_s13 = smov [#allocation5]  }
   0x6   :  { %s40_s14 = sshll.u32 %s7131_s13, 4  ;;  %s41_s14 = int_to_ptr.vmem [resolvable:$true] %s40_s14 }
   0x7   :  { %s6947_s15 = scalar_lea.vmem %s41_s14, 2048  ;;  %p6952_p1 = scmp.lt.s32.totalorder %s41_s14, %s41_s14 }
   0x8   :  { %p6948_p0 = scmp.ne.s32.totalorder %s41_s14, %s6947_s15  ;;  %p6953_p2 = scmp.lt.s32.totalorder %s6947_s15, %s6947_s15 }
   0xa   :  { %p6954_p3 = por %p6953_p2, %p6952_p1 }
   0xc   :  { %p6955_p4 = pnand %p6954_p3, %p6948_p0 }
   0xe   :  { %6958 = shalt.err (!%p6955_p4)
}
   0xf   :  { %s7132_s16 = smov 128   ;;  %s7133_s17 = smov 8  }
  0x10   :  { %46 = dma.hbm_to_vmem [thread:$0]  %s7418_s2, 2048, %s41_s14, [#allocation6], %s7132_s16, %s7132_s16, %s7133_s17  }
  0x11   :  { %s7134_s20 = smov [#allocation8]  }
  0x12   :  { %s64_s21 = sshll.u32 %s7134_s20, 4  ;;  %s65_s21 = int_to_ptr.vmem [resolvable:$true] %s64_s21 }
  0x13   :  { %s6967_s22 = scalar_lea.vmem %s65_s21, 32768  ;;  %p6972_p6 = scmp.lt.s32.totalorder %s65_s21, %s65_s21 }
  0x14   :  { %p6968_p5 = scmp.ne.s32.totalorder %s65_s21, %s6967_s22  ;;  %p6973_p7 = scmp.lt.s32.totalorder %s6967_s22, %s6967_s22 }
  0x16   :  { %p6974_p8 = por %p6973_p7, %p6972_p6 }
  0x18   :  { %p6975_p9 = pnand %p6974_p8, %p6968_p5 }
  0x1a   :  { %6978 = shalt.err (!%p6975_p9)
}
  0x1b   :  { %s7135_s23 = smov 512   ;;  %s7136_s24 = smov 32  }
  0x1c   :  { %70 = dma.hbm_to_vmem [thread:$0]  %s7420_s4, 32768, %s65_s21, [#allocation9], %s7135_s23, %s7135_s23, %s7136_s24  }
  0x1d   :  { %s7137_s27 = smov [#allocation11]   ;;  %s7138_s29 = smov [#allocation2]  }
  0x1e   :  { %s88_s28 = sshll.u32 %s7137_s27, 4  ;;  %s28_s2 = sshll.u32 %s7138_s29, 4  ;;  %s89_s28 = int_to_ptr.vmem [resolvable:$true] %s88_s28  ;;  %s29_s2 = int_to_ptr.vmem [resolvable:$true] %s28_s2 }
  0x1f   :  { %s6987_s30 = scalar_lea.vmem %s89_s28, 8192  ;;  %p6992_p11 = scmp.lt.s32.totalorder %s89_s28, %s89_s28 }
  0x20   :  { %p6988_p10 = scmp.ne.s32.totalorder %s89_s28, %s6987_s30  ;;  %p6993_p12 = scmp.lt.s32.totalorder %s6987_s30, %s6987_s30 }
  0x22   :  { %p6994_p13 = por %p6993_p12, %p6992_p11 }
  0x24   :  { %p6995_p0 = pnand %p6994_p13, %p6988_p10 }
  0x26   :  { %6998 = shalt.err (!%p6995_p0)
}
  0x27   :  { %94 = dma.hbm_to_vmem [thread:$0]  %s7422_s6, 8192, %s89_s28, [#allocation12], %s7132_s16, %s7132_s16, %s7133_s17  }
  0x28   :  { %s7007_s4 = scalar_lea.vmem %s29_s2, 1024  ;;  %p7012_p2 = scmp.lt.s32.totalorder %s29_s2, %s29_s2 }
  0x29   :  { %p7008_p1 = scmp.ne.s32.totalorder %s29_s2, %s7007_s4  ;;  %p7013_p3 = scmp.lt.s32.totalorder %s7007_s4, %s7007_s4 }
  0x2b   :  { %p7014_p4 = por %p7013_p3, %p7012_p2 }
  0x2d   :  { %p7015_p5 = pnand %p7014_p4, %p7008_p1 }
  0x2f   :  { %7018 = shalt.err (!%p7015_p5)
}
  0x30   :  { %s7139_s13 = smov 64   ;;  %s7140_s14 = smov 4  }
  0x31   :  { %34 = dma.hbm_to_vmem [thread:$0]  %s7417_s1, 1024, %s29_s2, [#allocation3], %s7139_s13, %s7139_s13, %s7140_s14  }
  0x32   :  { %s7141_s19 = smov [#allocation7]  }
  0x33   :  { %s52_s20 = sshll.u32 %s7141_s19, 4  ;;  %s53_s20 = int_to_ptr.vmem [resolvable:$true] %s52_s20 }
  0x34   :  { %s7027_s6 = scalar_lea.vmem %s53_s20, 8192  ;;  %p7032_p7 = scmp.lt.s32.totalorder %s53_s20, %s53_s20 }
  0x35   :  { %p7028_p6 = scmp.ne.s32.totalorder %s53_s20, %s7027_s6  ;;  %p7033_p8 = scmp.lt.s32.totalorder %s7027_s6, %s7027_s6 }
  0x37   :  { %p7034_p9 = por %p7033_p8, %p7032_p7 }
  0x39   :  { %p7035_p10 = pnand %p7034_p9, %p7028_p6 }
  0x3b   :  { %7038 = shalt.err (!%p7035_p10)
}
  0x3c   :  { %s7142_s16 = smov 256   ;;  %s7143_s17 = smov 16  }
  0x3d   :  { %58 = dma.hbm_to_vmem [thread:$0]  %s7419_s3, 8192, %s53_s20, [#allocation6], %s7142_s16, %s7142_s16, %s7143_s17  }
  0x3e   :  { %s7144_s23 = smov [#allocation10]   ;;  %s7145_s1 = smov [#allocation13]  }
  0x3f   :  { %s76_s24 = sshll.u32 %s7144_s23, 4  ;;  %s100_s25 = sshll.u32 %s7145_s1, 4  ;;  %s77_s24 = int_to_ptr.vmem [resolvable:$true] %s76_s24  ;;  %s101_s25 = int_to_ptr.vmem [resolvable:$true] %s100_s25 }
  0x40   :  { %s7047_s26 = scalar_lea.vmem %s77_s24, 32768  ;;  %p7052_p12 = scmp.lt.s32.totalorder %s77_s24, %s77_s24 }
  0x41   :  { %p7048_p11 = scmp.ne.s32.totalorder %s77_s24, %s7047_s26  ;;  %p7053_p13 = scmp.lt.s32.totalorder %s7047_s26, %s7047_s26 }
  0x43   :  { %p7054_p0 = por %p7053_p13, %p7052_p12 }
  0x45   :  { %p7055_p1 = pnand %p7054_p0, %p7048_p11 }
  0x47   :  { %7058 = shalt.err (!%p7055_p1)
}
  0x48   :  { %82 = dma.hbm_to_vmem [thread:$0]  %s7421_s5, 32768, %s77_s24, [#allocation9], %s7142_s16, %s7142_s16, %s7143_s17  }
  0x49   :  { %s7067_s29 = scalar_lea.vmem %s101_s25, 2048  ;;  %p7072_p3 = scmp.lt.s32.totalorder %s101_s25, %s101_s25 }
  0x4a   :  { %p7068_p2 = scmp.ne.s32.totalorder %s101_s25, %s7067_s29  ;;  %p7073_p4 = scmp.lt.s32.totalorder %s7067_s29, %s7067_s29 }
  0x4c   :  { %p7074_p5 = por %p7073_p4, %p7072_p3 }
  0x4e   :  { %p7075_p6 = pnand %p7074_p5, %p7068_p2 }
  0x50   :  { %7078 = shalt.err (!%p7075_p6)
}
  0x51   :  { %106 = dma.hbm_to_vmem [thread:$0]  %s7423_s7, 2048, %s101_s25, [#allocation12], %s7139_s13, %s7139_s13, %s7140_s14  }
  0x52   :  { %s7146_s30 = smov [#allocation14]  }
  0x53   :  { %s112_s11 = sshll.u32 %s7146_s30, 4  ;;  %s113_s11 = int_to_ptr.vmem [resolvable:$true] %s112_s11 }
  0x54   :  { %s7087_s12 = scalar_lea.vmem %s113_s11, 1024  ;;  %p7092_p8 = scmp.lt.s32.totalorder %s113_s11, %s113_s11 }
  0x55   :  { %p7088_p7 = scmp.ne.s32.totalorder %s113_s11, %s7087_s12  ;;  %p7093_p9 = scmp.lt.s32.totalorder %s7087_s12, %s7087_s12 }
  0x57   :  { %p7094_p10 = por %p7093_p9, %p7092_p8 }
  0x59   :  { %p7095_p11 = pnand %p7094_p10, %p7088_p7 }
  0x5b   :  { %7098 = shalt.err (!%p7095_p11)
}
  0x5c   :  { %118 = dma.hbm_to_vmem [thread:$0]  %s7424_s8, 1024, %s113_s11, [#allocation15], %s7139_s13, %s7139_s13, %s7140_s14  }
  0x5d   :  { %7119 = dma.done.wait [#allocation3], 1024  }
  0x5e   :  { %7120 = vsyncadd [#allocation3], 4294966272 }
  0x5f   :  { %7121 = dma.done.wait [#allocation6], 10240  }
  0x60   :  { %7122 = vsyncadd [#allocation6], 4294957056 }
  0x61   :  { %7123 = dma.done.wait [#allocation9], 65536  }
  0x62   :  { %7124 = vsyncadd [#allocation9], 4294901760 }
  0x63   :  { %7125 = dma.done.wait [#allocation12], 10240  }
  0x64   :  { %7126 = vsyncadd [#allocation12], 4294957056 }
  0x65   :  { %7127 = dma.done.wait [#allocation15], 1024  }
  0x66   :  { %7128 = vsyncadd [#allocation15], 4294966272  ;;  %v7147_v0 = vmov 0.0   ;;  %vm7148_vm0 = vmmov 0   ;;  %v6307_v1 = vld [vmem:[#allocation2 + $0x38] sm:$0xff]   ;;  %v6308_v2 = vld [vmem:[#allocation2 + $0x30] sm:$0xff]  }
  0x67   :  { %6247 = vmatprep.subr.bf16.mxu0 %v7147_v0  ;;  %6263 = vmatprep.mubr.msk.bf16.mxu0 %vm7148_vm0, %v7147_v0  ;;  %v6309_v3 = vld [vmem:[#allocation2 + $0x28] sm:$0xff]   ;;  %v6315_v4 = vld [vmem:[#allocation5 + $0x74] ss:$8 sps:$4 sm:$0xff]   ;;  %v6317_v5 = vld [vmem:[#allocation5 + $0x70] ss:$8 sps:$4 sm:$0xff]   ;;  %v7149_v27 = vmov 0  }
  0x68   :  { %6248 = vmatpush3.bf16.msra.mxu0 %v6307_v1  ;;  %v6310_v6 = vld [vmem:[#allocation2 + $0x20] sm:$0xff]   ;;  %369 = vmatprep.subr.bf16.mxu1 %v6315_v4  ;;  %v6321_v9 = vld [vmem:[#allocation5 + $0x54] ss:$8 sps:$4 sm:$0xff]   ;;  %v6323_v11 = vld [vmem:[#allocation5 + $0x50] ss:$8 sps:$4 sm:$0xff]   ;;  %s7150_s26 = smov [#allocation16]  }
  0x69   :  { %6249 = vmatprep.subr.bf16.mxu0 %v7147_v0  ;;  %v6318_v7 = vld [vmem:[#allocation5 + $0x64] ss:$8 sps:$4 sm:$0xff]   ;;  %370 = vmatpush1.bf16.msra.mxu1 %v6317_v5  ;;  %v6320_v8 = vld [vmem:[#allocation5 + $0x60] ss:$8 sps:$4 sm:$0xff]   ;;  %v6311_v10 = vld [vmem:[#allocation2 + $0x18] sm:$0xff]   ;;  %s5503_s27 = sshll.u32 %s7150_s26, 4  ;;  %s5504_s27 = int_to_ptr.vmem [resolvable:$true] %s5503_s27 }
  0x6a   :  { %371 = vmatprep.subr.bf16.mxu1 %v6318_v7  ;;  %v6312_v12 = vld [vmem:[#allocation2 + $0x10] sm:$0xff]   ;;  %v6324_v13 = vld [vmem:[#allocation5 + $0x44] ss:$8 sps:$4 sm:$0xff]   ;;  %v6326_v14 = vld [vmem:[#allocation5 + $0x40] ss:$8 sps:$4 sm:$0xff]   ;;  %401 = vmatprep.mubr.bf16.mxu1 %v7149_v27  ;;  %s7099_s28 = scalar_lea.vmem %s5504_s27, 128  ;;  %p7104_p13 = scmp.lt.s32.totalorder %s5504_s27, %s5504_s27 }
  0x6b   :  { %v6327_v15 = vld [vmem:[#allocation5 + $0x34] ss:$8 sps:$4 sm:$0xff]   ;;  %v6313_v16 = vld [vmem:[#allocation2 + $0x8] sm:$0xff]   ;;  %v6329_v17 = vld [vmem:[#allocation5 + $0x30] ss:$8 sps:$4 sm:$0xff]   ;;  %p7100_p12 = scmp.ne.s32.totalorder %s5504_s27, %s7099_s28  ;;  %p7105_p0 = scmp.lt.s32.totalorder %s7099_s28, %s7099_s28 }
  0x6c   :  { %6250 = vmatpush3.bf16.msra.mxu0 %v6308_v2  ;;  %v6330_v18 = vld [vmem:[#allocation5 + $0x24] ss:$8 sps:$4 sm:$0xff]   ;;  %v6332_v21 = vld [vmem:[#allocation5 + $0x20] ss:$8 sps:$4 sm:$0xff]   ;;  %v6333_v22 = vld [vmem:[#allocation5 + $0x14] ss:$8 sps:$4 sm:$0xff]  }
  0x6d   :  { %6251 = vmatprep.subr.bf16.mxu0 %v7147_v0  ;;  %372 = vmatpush1.bf16.msra.mxu1 %v6320_v8  ;;  %v6314_v19 = vld [vmem:[#allocation2] sm:$0xff]   ;;  %v146_v20 = vld [vmem:[%s7416_s0] sm:$0xff]  ;;  %v6335_v24 = vld [vmem:[#allocation5 + $0x10] ss:$8 sps:$4 sm:$0xff]   ;;  %p7106_p1 = por %p7105_p0, %p7104_p13 }
  0x6e   :  { %373 = vmatprep.subr.bf16.mxu1 %v6321_v9  ;;  %v147_v23 = vpack.c.bf16 %v146_v20, %v146_v20  ;;  %v6336_v25 = vld [vmem:[#allocation5 + $0x4] ss:$8 sps:$4 sm:$0xff]   ;;  %v6338_v26 = vld [vmem:[#allocation5] ss:$8 sps:$4 sm:$0xff]  }
  0x6f   :  { %v6339_v28 = vld [vmem:[#allocation7 + $0xe0] ss:$16 sps:$4 sm:$0xff]   ;;  %v6341_v29 = vld [vmem:[#allocation7 + $0xe4] ss:$16 sps:$4 sm:$0xff]   ;;  %v6344_v30 = vld [vmem:[#allocation7 + $0xec] ss:$16 sps:$4 sm:$0xff]   ;;  %p7107_p2 = pnand %p7106_p1, %p7100_p12 }
  0x70   :  { %6252 = vmatpush3.bf16.msra.mxu0 %v6309_v3  ;;  %v6347_v31 = vld [vmem:[#allocation7 + $0xc4] ss:$16 sps:$4 sm:$0xff]   ;;  %v6345_v32 = vld [vmem:[#allocation7 + $0xc0] ss:$16 sps:$4 sm:$0xff]   ;;  %v5516_v57 = vld [vmem:[%s7425_s9] ss:$0 sm:$0xff] }
  0x71   :  { %6253 = vmatprep.subr.bf16.mxu0 %v7147_v0  ;;  %374 = vmatpush1.bf16.msra.mxu1 %v6323_v11  ;;  %v6353_v33 = vld [vmem:[#allocation7 + $0xa4] ss:$16 sps:$4 sm:$0xff]   ;;  %v6351_v34 = vld [vmem:[#allocation7 + $0xa0] ss:$16 sps:$4 sm:$0xff]   ;;  %v6342_v63 = vld [vmem:[#allocation7 + $0xe8] ss:$16 sps:$4 sm:$0xff]  }
  0x72   :  { %375 = vmatprep.subr.bf16.mxu1 %v6324_v13  ;;  %v6359_v35 = vld [vmem:[#allocation7 + $0x84] ss:$16 sps:$4 sm:$0xff]   ;;  %v6357_v36 = vld [vmem:[#allocation7 + $0x80] ss:$16 sps:$4 sm:$0xff]   ;;  %v6350_v2 = vld [vmem:[#allocation7 + $0xcc] ss:$16 sps:$4 sm:$0xff]  }
  0x73   :  { %v6365_v37 = vld [vmem:[#allocation7 + $0x64] ss:$16 sps:$4 sm:$0xff]   ;;  %v6363_v38 = vld [vmem:[#allocation7 + $0x60] ss:$16 sps:$4 sm:$0xff]   ;;  %v6348_v4 = vld [vmem:[#allocation7 + $0xc8] ss:$16 sps:$4 sm:$0xff]  }
  0x74   :  { %6254 = vmatpush3.bf16.msra.mxu0 %v6310_v6  ;;  %v6371_v39 = vld [vmem:[#allocation7 + $0x44] ss:$16 sps:$4 sm:$0xff]   ;;  %v6369_v40 = vld [vmem:[#allocation7 + $0x40] ss:$16 sps:$4 sm:$0xff]   ;;  %v6356_v5 = vld [vmem:[#allocation7 + $0xac] ss:$16 sps:$4 sm:$0xff]  }
  0x75   :  { %6255 = vmatprep.subr.bf16.mxu0 %v7147_v0  ;;  %376 = vmatpush1.bf16.msra.mxu1 %v6326_v14  ;;  %v6377_v41 = vld [vmem:[#allocation7 + $0x24] ss:$16 sps:$4 sm:$0xff]   ;;  %v6375_v42 = vld [vmem:[#allocation7 + $0x20] ss:$16 sps:$4 sm:$0xff]   ;;  %v6354_v6 = vld [vmem:[#allocation7 + $0xa8] ss:$16 sps:$4 sm:$0xff]  }
  0x76   :  { %377 = vmatprep.subr.bf16.mxu1 %v6327_v15  ;;  %v6383_v43 = vld [vmem:[#allocation7 + $0x4] ss:$16 sps:$4 sm:$0xff]   ;;  %v6381_v44 = vld [vmem:[#allocation7] ss:$16 sps:$4 sm:$0xff]   ;;  %v6362_v7 = vld [vmem:[#allocation7 + $0x8c] ss:$16 sps:$4 sm:$0xff]  }
  0x77   :  { %v6389_v45 = vld [vmem:[#allocation7 + $0x1e4] ss:$16 sps:$4 sm:$0xff]   ;;  %v6387_v46 = vld [vmem:[#allocation7 + $0x1e0] ss:$16 sps:$4 sm:$0xff]   ;;  %v6360_v8 = vld [vmem:[#allocation7 + $0x88] ss:$16 sps:$4 sm:$0xff]  }
  0x78   :  { %6256 = vmatpush3.bf16.msra.mxu0 %v6311_v10  ;;  %v6395_v47 = vld [vmem:[#allocation7 + $0x1c4] ss:$16 sps:$4 sm:$0xff]   ;;  %v6393_v48 = vld [vmem:[#allocation7 + $0x1c0] ss:$16 sps:$4 sm:$0xff]   ;;  %v6368_v9 = vld [vmem:[#allocation7 + $0x6c] ss:$16 sps:$4 sm:$0xff]  }
  0x79   :  { %6257 = vmatprep.subr.bf16.mxu0 %v7147_v0  ;;  %378 = vmatpush1.bf16.msra.mxu1 %v6329_v17  ;;  %v6401_v49 = vld [vmem:[#allocation7 + $0x1a4] ss:$16 sps:$4 sm:$0xff]   ;;  %v6399_v50 = vld [vmem:[#allocation7 + $0x1a0] ss:$16 sps:$4 sm:$0xff]   ;;  %v6366_v10 = vld [vmem:[#allocation7 + $0x68] ss:$16 sps:$4 sm:$0xff]  }
  0x7a   :  { %379 = vmatprep.subr.bf16.mxu1 %v6330_v18  ;;  %v6407_v51 = vld [vmem:[#allocation7 + $0x184] ss:$16 sps:$4 sm:$0xff]   ;;  %v6405_v52 = vld [vmem:[#allocation7 + $0x180] ss:$16 sps:$4 sm:$0xff]   ;;  %v6374_v11 = vld [vmem:[#allocation7 + $0x4c] ss:$16 sps:$4 sm:$0xff]  }
  0x7b   :  { %v6413_v53 = vld [vmem:[#allocation7 + $0x164] ss:$16 sps:$4 sm:$0xff]   ;;  %v6411_v54 = vld [vmem:[#allocation7 + $0x160] ss:$16 sps:$4 sm:$0xff]   ;;  %v6380_v13 = vld [vmem:[#allocation7 + $0x2c] ss:$16 sps:$4 sm:$0xff]  }
  0x7c   :  { %6258 = vmatpush3.bf16.msra.mxu0 %v6312_v12  ;;  %v6419_v55 = vld [vmem:[#allocation7 + $0x144] ss:$16 sps:$4 sm:$0xff]   ;;  %v6417_v56 = vld [vmem:[#allocation7 + $0x140] ss:$16 sps:$4 sm:$0xff]   ;;  %v6372_v12 = vld [vmem:[#allocation7 + $0x48] ss:$16 sps:$4 sm:$0xff]  }
  0x7d   :  { %6259 = vmatprep.subr.bf16.mxu0 %v7147_v0  ;;  %380 = vmatpush1.bf16.msra.mxu1 %v6332_v21  ;;  %v6378_v14 = vld [vmem:[#allocation7 + $0x28] ss:$16 sps:$4 sm:$0xff]   ;;  %v6386_v15 = vld [vmem:[#allocation7 + $0xc] ss:$16 sps:$4 sm:$0xff]  }
  0x7e   :  { %381 = vmatprep.subr.bf16.mxu1 %v6333_v22  ;;  %v6392_v17 = vld [vmem:[#allocation7 + $0x1ec] ss:$16 sps:$4 sm:$0xff]   ;;  %v6390_v18 = vld [vmem:[#allocation7 + $0x1e8] ss:$16 sps:$4 sm:$0xff]  }
  0x7f   :  { %v6396_v20 = vld [vmem:[#allocation7 + $0x1c8] ss:$16 sps:$4 sm:$0xff]   ;;  %v6404_v21 = vld [vmem:[#allocation7 + $0x1ac] ss:$16 sps:$4 sm:$0xff]  }
  0x80   :  { %6260 = vmatpush3.bf16.msra.mxu0 %v6313_v16  ;;  %v6384_v16 = vld [vmem:[#allocation7 + $0x8] ss:$16 sps:$4 sm:$0xff]   ;;  %v6422_v27 = vld [vmem:[#allocation7 + $0x14c] ss:$16 sps:$4 sm:$0xff]  }
  0x81   :  { %6261 = vmatprep.subr.bf16.mxu0 %v7147_v0  ;;  %382 = vmatpush1.bf16.msra.mxu1 %v6335_v24  ;;  %v6402_v22 = vld [vmem:[#allocation7 + $0x1a8] ss:$16 sps:$4 sm:$0xff]  }
  0x82   :  { %383 = vmatprep.subr.bf16.mxu1 %v6336_v25  ;;  %v6408_v24 = vld [vmem:[#allocation7 + $0x188] ss:$16 sps:$4 sm:$0xff]   ;;  %v6416_v25 = vld [vmem:[#allocation7 + $0x16c] ss:$16 sps:$4 sm:$0xff]  }
  0x84   :  { %6262 = vmatpush3.bf16.msra.mxu0 %v6314_v19  ;;  %v6398_v19 = vld [vmem:[#allocation7 + $0x1cc] ss:$16 sps:$4 sm:$0xff]  }
  0x85   :  { %384 = vmatpush1.bf16.msra.mxu1 %v6338_v26  ;;  %820 = vmatprep.subr.bf16.mxu0 %v6341_v29  ;;  %v6414_v26 = vld [vmem:[#allocation7 + $0x168] ss:$16 sps:$4 sm:$0xff]   ;;  %v6425_v29 = vld [vmem:[#allocation7 + $0x124] ss:$16 sps:$4 sm:$0xff]  }
  0x86   :  { %861 = vmatprep.subr.bf16.mxu1 %v6344_v30  ;;  %v6428_v30 = vld [vmem:[#allocation7 + $0x12c] ss:$16 sps:$4 sm:$0xff]  }
  0x87   :  { %6264 = vmatmul.mubr.bf16.vlgmr.msra.gmra.mxu0 %v147_v23  ;;  %v6410_v23 = vld [vmem:[#allocation7 + $0x18c] ss:$16 sps:$4 sm:$0xff]  }
  0x88   :  { %821 = vmatpush1.bf16.msra.mxu0 %v6339_v28  ;;  %v6420_v28 = vld [vmem:[#allocation7 + $0x148] ss:$16 sps:$4 sm:$0xff]  }
  0x89   :  { %822 = vmatprep.subr.bf16.mxu0 %v6347_v31  ;;  %v6423_v31 = vld [vmem:[#allocation7 + $0x120] ss:$16 sps:$4 sm:$0xff]  }
  0x8c   :  { %823 = vmatpush1.bf16.msra.mxu0 %v6345_v32  ;;  %v6426_v32 = vld [vmem:[#allocation7 + $0x128] ss:$16 sps:$4 sm:$0xff]  }
  0x8d   :  { %824 = vmatprep.subr.bf16.mxu0 %v6353_v33  ;;  %v6431_v33 = vld [vmem:[#allocation7 + $0x104] ss:$16 sps:$4 sm:$0xff]  }
  0x90   :  { %825 = vmatpush1.bf16.msra.mxu0 %v6351_v34  ;;  %v6434_v34 = vld [vmem:[#allocation7 + $0x10c] ss:$16 sps:$4 sm:$0xff]  }
  0x91   :  { %826 = vmatprep.subr.bf16.mxu0 %v6359_v35  ;;  %v6429_v35 = vld [vmem:[#allocation7 + $0x100] ss:$16 sps:$4 sm:$0xff]  }
  0x94   :  { %827 = vmatpush1.bf16.msra.mxu0 %v6357_v36  ;;  %v6432_v36 = vld [vmem:[#allocation7 + $0x108] ss:$16 sps:$4 sm:$0xff]  }
  0x95   :  { %828 = vmatprep.subr.bf16.mxu0 %v6365_v37  ;;  %v966_v37 = vld [vmem:[#allocation8 + $0x1c0] sm:$0xff] }
  0x98   :  { %829 = vmatpush1.bf16.msra.mxu0 %v6363_v38  ;;  %v970_v38 = vld [vmem:[#allocation8 + $0x1e0] sm:$0xff] }
  0x99   :  { %830 = vmatprep.subr.bf16.mxu0 %v6371_v39  ;;  %v1094_v39 = vld [vmem:[#allocation8 + $0x5c0] sm:$0xff] }
  0x9c   :  { %831 = vmatpush1.bf16.msra.mxu0 %v6369_v40  ;;  %v5661_v40 = vcombine.low %v966_v37, %v970_v38 }
  0x9d   :  { %832 = vmatprep.subr.bf16.mxu0 %v6377_v41  ;;  %v5662_v41 = vcombine.high %v966_v37, %v970_v38  ;;  %v918_v37 = vld [vmem:[#allocation8 + $0x40] sm:$0xff] }
  0x9e   :  { %v922_v38 = vld [vmem:[#allocation8 + $0x60] sm:$0xff] }
  0xa0   :  { %833 = vmatpush1.bf16.msra.mxu0 %v6375_v42  ;;  %v1098_v42 = vld [vmem:[#allocation8 + $0x5e0] sm:$0xff] }
  0xa1   :  { %834 = vmatprep.subr.bf16.mxu0 %v6383_v43  ;;  %v5789_v43 = vcombine.low %v1094_v39, %v1098_v42 }
  0xa4   :  { %835 = vmatpush1.bf16.msra.mxu0 %v6381_v44  ;;  %v5790_v44 = vcombine.high %v1094_v39, %v1098_v42  ;;  %v1046_v39 = vld [vmem:[#allocation8 + $0x440] sm:$0xff] }
  0xa5   :  { %836 = vmatprep.subr.bf16.mxu0 %v6389_v45  ;;  %v279_v45 = vlaneseq }
  0xa8   :  { %837 = vmatpush2.bf16.msra.mxu0 %v6387_v46  ;;  %v7261_v46 = vshrl.u32 %v279_v45, 7  ;;  %v910_v45 = vld [vmem:[#allocation8] sm:$0xff] }
  0xa9   :  { %838 = vmatprep.subr.bf16.mxu0 %v6395_v47 }
  0xaa   :  { %v7264_v47 = vsub.s32 0, %v7261_v46 }
  0xac   :  { %839 = vmatpush2.bf16.msra.mxu0 %v6393_v48  ;;  %v277_v48 = vld [vmem:[%s7425_s9 + $0x1] sm:$0x3] }
  0xad   :  { %840 = vmatprep.subr.bf16.mxu0 %v6401_v49  ;;  %v7270_v49 = vsub.s32 1, %v7261_v46 }
  0xb0   :  { %841 = vmatpush2.bf16.msra.mxu0 %v6399_v50  ;;  %v282_v50 = vrot.slane %v277_v48, %v7264_v47 }
  0xb1   :  { %842 = vmatprep.subr.bf16.mxu0 %v6407_v51  ;;  %v286_v51 = vrot.slane %v277_v48, %v7270_v49  ;;  %v914_v48 = vld [vmem:[#allocation8 + $0x20] sm:$0xff] }
  0xb4   :  { %843 = vmatpush2.bf16.msra.mxu0 %v6405_v52 }
  0xb5   :  { %844 = vmatprep.subr.bf16.mxu0 %v6413_v53 }
  0xb8   :  { %845 = vmatpush2.bf16.msra.mxu0 %v6411_v54 }
  0xb9   :  { %846 = vmatprep.subr.bf16.mxu0 %v6419_v55 }
  0xbc   :  { %847 = vmatpush2.bf16.msra.mxu0 %v6417_v56 }
  0xbd   :  { %848 = vmatprep.subr.bf16.mxu0 %v6425_v29  ;;  %v926_v29 = vld [vmem:[#allocation8 + $0x80] sm:$0xff] }
  0xc0   :  { %849 = vmatpush2.bf16.msra.mxu0 %v6423_v31  ;;  %v1054_v31 = vld [vmem:[#allocation8 + $0x480] sm:$0xff] }
  0xc1   :  { %850 = vmatprep.subr.bf16.mxu0 %v6431_v33 }
  0xc4   :  { %851 = vmatpush2.bf16.msra.mxu0 %v6429_v35 }
  0xc5   :  { %2488 = vmatprep.subr.bf16.mxu0 %v5662_v41 }
 0x147   :  { %v253_v58 = vpop.f32.mrf.mxu0 }
 0x148   :  { %v254_v59 = vadd.f32 %v5516_v57, %v253_v58  ;;  %v958_v58 = vld [vmem:[#allocation8 + $0x180] sm:$0xff] }
 0x149   :  { %v6265_v60 = vpop.f32.mrf.mxu0 }
 0x14a   :  { %v259_v61 = vmax.f32 %v254_v59, 0.0  ;;  %v962_v60 = vld [vmem:[#allocation8 + $0x1a0] sm:$0xff] }
 0x14b   :  { %v256_v62 = vpop.f32.mrf.mxu0 }
 0x14c   :  { %v260_v1 = vpack.c.bf16 %v259_v61, %v259_v61  ;;  %v1086_v61 = vld [vmem:[#allocation8 + $0x580] sm:$0xff] }
 0x14d   :  { %v6266_v3 = vpop.f32.mrf.mxu0  ;;  %v1090_v62 = vld [vmem:[#allocation8 + $0x5a0] sm:$0xff] }
 0x14e   :  { %402 = vmatmul.mubr.bf16.vlgmr.msra.gmra.mxu1 %v260_v1  ;;  %v5654_v3 = vcombine.high %v958_v58, %v962_v60 }
 0x14f   :  { %862 = vmatpush1.bf16.msra.mxu1 %v6342_v63 }
 0x150   :  { %863 = vmatprep.subr.bf16.mxu1 %v6350_v2 }
 0x153   :  { %864 = vmatpush1.bf16.msra.mxu1 %v6348_v4  ;;  %v5782_v4 = vcombine.high %v1086_v61, %v1090_v62 }
 0x154   :  { %865 = vmatprep.subr.bf16.mxu1 %v6356_v5  ;;  %v950_v5 = vld [vmem:[#allocation8 + $0x140] sm:$0xff] }
 0x157   :  { %866 = vmatpush1.bf16.msra.mxu1 %v6354_v6  ;;  %v954_v6 = vld [vmem:[#allocation8 + $0x160] sm:$0xff] }
 0x158   :  { %867 = vmatprep.subr.bf16.mxu1 %v6362_v7  ;;  %v1078_v7 = vld [vmem:[#allocation8 + $0x540] sm:$0xff] }
 0x15b   :  { %868 = vmatpush1.bf16.msra.mxu1 %v6360_v8  ;;  %v1082_v8 = vld [vmem:[#allocation8 + $0x560] sm:$0xff] }
 0x15c   :  { %869 = vmatprep.subr.bf16.mxu1 %v6368_v9  ;;  %v5653_v9 = vcombine.low %v958_v58, %v962_v60  ;;  %v1158_v58 = vld [vmem:[#allocation8 + $0x7c0] sm:$0xff]  ;;  %v5605_v60 = vcombine.low %v910_v45, %v914_v48 }
 0x15f   :  { %870 = vmatpush1.bf16.msra.mxu1 %v6366_v10  ;;  %v5781_v10 = vcombine.low %v1086_v61, %v1090_v62 }
 0x160   :  { %871 = vmatprep.subr.bf16.mxu1 %v6374_v11  ;;  %v5646_v11 = vcombine.high %v950_v5, %v954_v6 }
 0x163   :  { %872 = vmatpush1.bf16.msra.mxu1 %v6372_v12  ;;  %v5774_v12 = vcombine.high %v1078_v7, %v1082_v8 }
 0x164   :  { %873 = vmatprep.subr.bf16.mxu1 %v6380_v13  ;;  %v942_v13 = vld [vmem:[#allocation8 + $0x100] sm:$0xff] }
 0x167   :  { %874 = vmatpush1.bf16.msra.mxu1 %v6378_v14  ;;  %v946_v14 = vld [vmem:[#allocation8 + $0x120] sm:$0xff] }
 0x168   :  { %875 = vmatprep.subr.bf16.mxu1 %v6386_v15  ;;  %v1070_v15 = vld [vmem:[#allocation8 + $0x500] sm:$0xff] }
 0x16b   :  { %876 = vmatpush1.bf16.msra.mxu1 %v6384_v16  ;;  %v1074_v16 = vld [vmem:[#allocation8 + $0x520] sm:$0xff] }
 0x16c   :  { %877 = vmatprep.subr.bf16.mxu1 %v6392_v17  ;;  %v5645_v17 = vcombine.low %v950_v5, %v954_v6 }
 0x16f   :  { %878 = vmatpush2.bf16.msra.mxu1 %v6390_v18  ;;  %v5773_v18 = vcombine.low %v1078_v7, %v1082_v8 }
 0x170   :  { %879 = vmatprep.subr.bf16.mxu1 %v6398_v19  ;;  %v5638_v19 = vcombine.high %v942_v13, %v946_v14 }
 0x173   :  { %880 = vmatpush2.bf16.msra.mxu1 %v6396_v20  ;;  %v5766_v20 = vcombine.high %v1070_v15, %v1074_v16 }
 0x174   :  { %881 = vmatprep.subr.bf16.mxu1 %v6404_v21  ;;  %v934_v21 = vld [vmem:[#allocation8 + $0xc0] sm:$0xff] }
 0x177   :  { %882 = vmatpush2.bf16.msra.mxu1 %v6402_v22  ;;  %v938_v22 = vld [vmem:[#allocation8 + $0xe0] sm:$0xff] }
 0x178   :  { %883 = vmatprep.subr.bf16.mxu1 %v6410_v23  ;;  %v1062_v23 = vld [vmem:[#allocation8 + $0x4c0] sm:$0xff]  ;;  %v5629_v33 = vcombine.low %v934_v21, %v938_v22 }
 0x17b   :  { %884 = vmatpush2.bf16.msra.mxu1 %v6408_v24  ;;  %v1066_v24 = vld [vmem:[#allocation8 + $0x4e0] sm:$0xff] }
 0x17c   :  { %885 = vmatprep.subr.bf16.mxu1 %v6416_v25  ;;  %v5637_v25 = vcombine.low %v942_v13, %v946_v14 }
 0x17f   :  { %886 = vmatpush2.bf16.msra.mxu1 %v6414_v26  ;;  %v5765_v26 = vcombine.low %v1070_v15, %v1074_v16 }
 0x180   :  { %887 = vmatprep.subr.bf16.mxu1 %v6422_v27  ;;  %v5630_v27 = vcombine.high %v934_v21, %v938_v22 }
 0x183   :  { %888 = vmatpush2.bf16.msra.mxu1 %v6420_v28  ;;  %v5758_v28 = vcombine.high %v1062_v23, %v1066_v24 }
 0x184   :  { %889 = vmatprep.subr.bf16.mxu1 %v6428_v30  ;;  %v930_v30 = vld [vmem:[#allocation8 + $0xa0] sm:$0xff] }
 0x185   :  { %v5622_v35 = vcombine.high %v926_v29, %v930_v30  ;;  %v5621_v41 = vcombine.low %v926_v29, %v930_v30 }
 0x187   :  { %890 = vmatpush2.bf16.msra.mxu1 %v6426_v32  ;;  %v1058_v32 = vld [vmem:[#allocation8 + $0x4a0] sm:$0xff] }
 0x188   :  { %891 = vmatprep.subr.bf16.mxu1 %v6434_v34  ;;  %v5757_v34 = vcombine.low %v1062_v23, %v1066_v24  ;;  %v5749_v42 = vcombine.low %v1054_v31, %v1058_v32 }
 0x18b   :  { %892 = vmatpush2.bf16.msra.mxu1 %v6432_v36  ;;  %v5750_v36 = vcombine.high %v1054_v31, %v1058_v32 }
 0x18c   :  { %2529 = vmatprep.subr.bf16.mxu1 %v5790_v44 }
 0x20e   :  { %v403_v52 = vpop.f32.mrf.mxu1 }
 0x20f   :  { %v404_v53 = vadd.f32 %v403_v52, %v282_v50  ;;  %v1038_v50 = vld [vmem:[#allocation8 + $0x400] sm:$0xff]  ;;  %v5613_v52 = vcombine.low %v918_v37, %v922_v38 }
 0x210   :  { %v405_v54 = vpop.f32.mrf.mxu1 }
 0x211   :  { %v406_v55 = vadd.f32 %v405_v54, %v286_v51  ;;  %v410_v56 = vmax.f32 %v404_v53, 0.0  ;;  %v1042_v51 = vld [vmem:[#allocation8 + $0x420] sm:$0xff]  ;;  %v5606_v54 = vcombine.high %v910_v45, %v914_v48 }
 0x212   :  { %v407_v57 = vpop.f32.mrf.mxu1  ;;  %v5733_v61 = vcombine.low %v1038_v50, %v1042_v51  ;;  %v1110_v45 = vld [vmem:[#allocation8 + $0x640] sm:$0xff] }
 0x213   :  { %v411_v59 = vmax.f32 %v406_v55, 0.0  ;;  %v412_v2 = vpack.c.bf16 %v410_v56, %v410_v56  ;;  %v5734_v55 = vcombine.high %v1038_v50, %v1042_v51  ;;  %v1030_v56 = vld [vmem:[#allocation8 + $0x3c0] sm:$0xff] }
 0x214   :  { %v408_v63 = vpop.f32.mrf.mxu1  ;;  %v1034_v57 = vld [vmem:[#allocation8 + $0x3e0] sm:$0xff] }
 0x215   :  { %v413_v1 = vpack.c.bf16 %v411_v59, %v411_v59  ;;  %v1162_v59 = vld [vmem:[#allocation8 + $0x7e0] sm:$0xff]  ;;  %v5726_v62 = vcombine.high %v1030_v56, %v1034_v57  ;;  %v5725_v5 = vcombine.low %v1030_v56, %v1034_v57 }
 0x216   :  { %v5854_v63 = vcombine.high %v1158_v58, %v1162_v59  ;;  %v5853_v6 = vcombine.low %v1158_v58, %v1162_v59  ;;  %v1114_v50 = vld [vmem:[#allocation8 + $0x660] sm:$0xff] }
 0x217   :  { %852 = vmatprep.mubr.bf16.mxu0 %v413_v1  ;;  %893 = vmatprep.mubr.bf16.mxu1 %v413_v1  ;;  %v1022_v1 = vld [vmem:[#allocation8 + $0x380] sm:$0xff] }
 0x218   :  { %853 = vmatmul.mubr.bf16.vlgmr.msra.gmra.mxu0 %v412_v2  ;;  %894 = vmatmul.mubr.bf16.vlgmr.msra.gmra.mxu1 %v412_v2  ;;  %v1026_v2 = vld [vmem:[#allocation8 + $0x3a0] sm:$0xff] }
 0x219   :  { %2489 = vmatpush1.bf16.msra.mxu0 %v5661_v40  ;;  %2530 = vmatpush1.bf16.msra.mxu1 %v5789_v43  ;;  %v1050_v40 = vld [vmem:[#allocation8 + $0x460] sm:$0xff]  ;;  %v5614_v43 = vcombine.high %v918_v37, %v922_v38  ;;  %v5718_v7 = vcombine.high %v1022_v1, %v1026_v2  ;;  %v5717_v13 = vcombine.low %v1022_v1, %v1026_v2  ;;  %v1095_v1 = vld [vmem:[#allocation8 + $0x5c8] sm:$0xff] }
 0x21a   :  { %2490 = vmatprep.subr.bf16.mxu0 %v5654_v3  ;;  %2531 = vmatprep.subr.bf16.mxu1 %v5782_v4  ;;  %v5742_v44 = vcombine.high %v1046_v39, %v1050_v40  ;;  %v5741_v53 = vcombine.low %v1046_v39, %v1050_v40  ;;  %v1150_v3 = vld [vmem:[#allocation8 + $0x780] sm:$0xff] }
 0x21b   :  { %v1154_v4 = vld [vmem:[#allocation8 + $0x7a0] sm:$0xff] }
 0x21c   :  { %v5846_v8 = vcombine.high %v1150_v3, %v1154_v4  ;;  %v5845_v14 = vcombine.low %v1150_v3, %v1154_v4  ;;  %v1102_v56 = vld [vmem:[#allocation8 + $0x600] sm:$0xff]  ;;  %v1099_v3 = vld [vmem:[#allocation8 + $0x5e8] sm:$0xff] }
 0x21d   :  { %2491 = vmatpush1.bf16.msra.mxu0 %v5653_v9  ;;  %2532 = vmatpush1.bf16.msra.mxu1 %v5781_v10  ;;  %v1014_v9 = vld [vmem:[#allocation8 + $0x340] sm:$0xff] }
 0x21e   :  { %2492 = vmatprep.subr.bf16.mxu0 %v5646_v11  ;;  %2533 = vmatprep.subr.bf16.mxu1 %v5774_v12  ;;  %v1018_v10 = vld [vmem:[#allocation8 + $0x360] sm:$0xff] }
 0x21f   :  { %v1142_v11 = vld [vmem:[#allocation8 + $0x740] sm:$0xff]  ;;  %v5710_v15 = vcombine.high %v1014_v9, %v1018_v10  ;;  %v5709_v21 = vcombine.low %v1014_v9, %v1018_v10  ;;  %v7281_v9 = vsub.s32 3, %v7261_v46 }
 0x220   :  { %v1146_v12 = vld [vmem:[#allocation8 + $0x760] sm:$0xff] }
 0x221   :  { %2493 = vmatpush1.bf16.msra.mxu0 %v5645_v17  ;;  %2534 = vmatpush1.bf16.msra.mxu1 %v5773_v18  ;;  %v5838_v16 = vcombine.high %v1142_v11, %v1146_v12  ;;  %v1006_v17 = vld [vmem:[#allocation8 + $0x300] sm:$0xff]  ;;  %v5837_v22 = vcombine.low %v1142_v11, %v1146_v12 }
 0x222   :  { %2494 = vmatprep.subr.bf16.mxu0 %v5638_v19  ;;  %2535 = vmatprep.subr.bf16.mxu1 %v5766_v20  ;;  %v1010_v18 = vld [vmem:[#allocation8 + $0x320] sm:$0xff] }
 0x223   :  { %v1134_v19 = vld [vmem:[#allocation8 + $0x700] sm:$0xff]  ;;  %v5702_v23 = vcombine.high %v1006_v17, %v1010_v18  ;;  %v5701_v29 = vcombine.low %v1006_v17, %v1010_v18 }
 0x224   :  { %v1138_v20 = vld [vmem:[#allocation8 + $0x720] sm:$0xff] }
 0x225   :  { %2495 = vmatpush1.bf16.msra.mxu0 %v5637_v25  ;;  %2536 = vmatpush1.bf16.msra.mxu1 %v5765_v26  ;;  %v5830_v24 = vcombine.high %v1134_v19, %v1138_v20  ;;  %v998_v25 = vld [vmem:[#allocation8 + $0x2c0] sm:$0xff]  ;;  %v5829_v30 = vcombine.low %v1134_v19, %v1138_v20 }
 0x226   :  { %2496 = vmatprep.subr.bf16.mxu0 %v5630_v27  ;;  %2537 = vmatprep.subr.bf16.mxu1 %v5758_v28  ;;  %v1002_v26 = vld [vmem:[#allocation8 + $0x2e0] sm:$0xff] }
 0x227   :  { %v1126_v27 = vld [vmem:[#allocation8 + $0x6c0] sm:$0xff]  ;;  %v5694_v31 = vcombine.high %v998_v25, %v1002_v26  ;;  %v5693_v37 = vcombine.low %v998_v25, %v1002_v26 }
 0x228   :  { %v1130_v28 = vld [vmem:[#allocation8 + $0x6e0] sm:$0xff] }
 0x229   :  { %2497 = vmatpush1.bf16.msra.mxu0 %v5629_v33  ;;  %2538 = vmatpush1.bf16.msra.mxu1 %v5757_v34  ;;  %v5822_v32 = vcombine.high %v1126_v27, %v1130_v28  ;;  %v990_v33 = vld [vmem:[#allocation8 + $0x280] sm:$0xff]  ;;  %v5821_v38 = vcombine.low %v1126_v27, %v1130_v28  ;;  %v959_v28 = vld [vmem:[#allocation8 + $0x188] sm:$0xff] }
 0x22a   :  { %2498 = vmatprep.subr.bf16.mxu0 %v5622_v35  ;;  %2539 = vmatprep.subr.bf16.mxu1 %v5750_v36  ;;  %v994_v34 = vld [vmem:[#allocation8 + $0x2a0] sm:$0xff] }
 0x22b   :  { %v1118_v35 = vld [vmem:[#allocation8 + $0x680] sm:$0xff]  ;;  %v5686_v39 = vcombine.high %v990_v33, %v994_v34 }
 0x22c   :  { %v1122_v36 = vld [vmem:[#allocation8 + $0x6a0] sm:$0xff] }
 0x22d   :  { %2499 = vmatpush1.bf16.msra.mxu0 %v5621_v41  ;;  %2540 = vmatpush1.bf16.msra.mxu1 %v5749_v42  ;;  %v5814_v40 = vcombine.high %v1118_v35, %v1122_v36  ;;  %v5685_v41 = vcombine.low %v990_v33, %v994_v34  ;;  %v5813_v42 = vcombine.low %v1118_v35, %v1122_v36  ;;  %v1106_v58 = vld [vmem:[#allocation8 + $0x620] sm:$0xff]  ;;  %v1091_v33 = vld [vmem:[#allocation8 + $0x5a8] sm:$0xff] }
 0x22e   :  { %2500 = vmatprep.subr.bf16.mxu0 %v5614_v43  ;;  %2541 = vmatprep.subr.bf16.mxu1 %v5742_v44  ;;  %v982_v43 = vld [vmem:[#allocation8 + $0x240] sm:$0xff] }
 0x22f   :  { %v986_v44 = vld [vmem:[#allocation8 + $0x260] sm:$0xff] }
 0x230   :  { %v5678_v48 = vcombine.high %v982_v43, %v986_v44  ;;  %v5677_v51 = vcombine.low %v982_v43, %v986_v44  ;;  %v1083_v43 = vld [vmem:[#allocation8 + $0x568] sm:$0xff] }
 0x231   :  { %2501 = vmatpush1.bf16.msra.mxu0 %v5613_v52  ;;  %2542 = vmatpush1.bf16.msra.mxu1 %v5741_v53  ;;  %v5805_v52 = vcombine.low %v1110_v45, %v1114_v50  ;;  %v5806_v53 = vcombine.high %v1110_v45, %v1114_v50 }
 0x232   :  { %2502 = vmatprep.subr.bf16.mxu0 %v5606_v54  ;;  %2543 = vmatprep.subr.bf16.mxu1 %v5734_v55  ;;  %v974_v54 = vld [vmem:[#allocation8 + $0x200] sm:$0xff] }
 0x233   :  { %v978_v55 = vld [vmem:[#allocation8 + $0x220] sm:$0xff] }
 0x234   :  { %v5670_v57 = vcombine.high %v974_v54, %v978_v55  ;;  %v5669_v59 = vcombine.low %v974_v54, %v978_v55  ;;  %v1075_v54 = vld [vmem:[#allocation8 + $0x528] sm:$0xff] }
 0x235   :  { %2503 = vmatpush1.bf16.msra.mxu0 %v5605_v60  ;;  %2544 = vmatpush1.bf16.msra.mxu1 %v5733_v61  ;;  %v5797_v60 = vcombine.low %v1102_v56, %v1106_v58  ;;  %v5798_v61 = vcombine.high %v1102_v56, %v1106_v58 }
 0x236   :  { %2504 = vmatprep.subr.bf16.mxu0 %v5726_v62  ;;  %2545 = vmatprep.subr.bf16.mxu1 %v5854_v63  ;;  %v967_v62 = vld [vmem:[#allocation8 + $0x1c8] sm:$0xff] }
 0x237   :  { %v971_v63 = vld [vmem:[#allocation8 + $0x1e8] sm:$0xff] }
 0x238   :  { %v5664_v2 = vcombine.high %v967_v62, %v971_v63  ;;  %v5663_v4 = vcombine.low %v967_v62, %v971_v63  ;;  %v1067_v62 = vld [vmem:[#allocation8 + $0x4e8] sm:$0xff] }
 0x239   :  { %2505 = vmatpush2.bf16.msra.mxu0 %v5725_v5  ;;  %2546 = vmatpush2.bf16.msra.mxu1 %v5853_v6  ;;  %v5791_v5 = vcombine.low %v1095_v1, %v1099_v3  ;;  %v5792_v6 = vcombine.high %v1095_v1, %v1099_v3 }
 0x23a   :  { %2506 = vmatprep.subr.bf16.mxu0 %v5718_v7  ;;  %2547 = vmatprep.subr.bf16.mxu1 %v5846_v8  ;;  %v7275_v7 = vsub.s32 2, %v7261_v46  ;;  %v478_v8 = vld [vmem:[%s7425_s9 + $0x3] sm:$0xf] }
 0x23b   :  { %v483_v10 = vrot.slane %v478_v8, %v7264_v47  ;;  %v487_v12 = vrot.slane %v478_v8, %v7270_v49 }
 0x23c   :  { %v491_v11 = vrot.slane %v478_v8, %v7275_v7 }
 0x23d   :  { %2507 = vmatpush2.bf16.msra.mxu0 %v5717_v13  ;;  %2548 = vmatpush2.bf16.msra.mxu1 %v5845_v14  ;;  %v495_v13 = vrot.slane %v478_v8, %v7281_v9  ;;  %v1059_v8 = vld [vmem:[#allocation8 + $0x4a8] sm:$0xff] }
 0x23e   :  { %2508 = vmatprep.subr.bf16.mxu0 %v5710_v15  ;;  %2549 = vmatprep.subr.bf16.mxu1 %v5838_v16 }
 0x241   :  { %2509 = vmatpush2.bf16.msra.mxu0 %v5709_v21  ;;  %2550 = vmatpush2.bf16.msra.mxu1 %v5837_v22 }
 0x242   :  { %2510 = vmatprep.subr.bf16.mxu0 %v5702_v23  ;;  %2551 = vmatprep.subr.bf16.mxu1 %v5830_v24 }
 0x245   :  { %2511 = vmatpush2.bf16.msra.mxu0 %v5701_v29  ;;  %2552 = vmatpush2.bf16.msra.mxu1 %v5829_v30 }
 0x246   :  { %2512 = vmatprep.subr.bf16.mxu0 %v5694_v31  ;;  %2553 = vmatprep.subr.bf16.mxu1 %v5822_v32  ;;  %v963_v31 = vld [vmem:[#allocation8 + $0x1a8] sm:$0xff] }
 0x247   :  { %v1087_v32 = vld [vmem:[#allocation8 + $0x588] sm:$0xff]  ;;  %v5655_v44 = vcombine.low %v959_v28, %v963_v31 }
 0x248   :  { %v5783_v45 = vcombine.low %v1087_v32, %v1091_v33 }
 0x249   :  { %2513 = vmatpush2.bf16.msra.mxu0 %v5693_v37  ;;  %2554 = vmatpush2.bf16.msra.mxu1 %v5821_v38  ;;  %v951_v38 = vld [vmem:[#allocation8 + $0x148] sm:$0xff] }
 0x24a   :  { %2514 = vmatprep.subr.bf16.mxu0 %v5686_v39  ;;  %2555 = vmatprep.subr.bf16.mxu1 %v5814_v40  ;;  %v5656_v39 = vcombine.high %v959_v28, %v963_v31  ;;  %v5784_v40 = vcombine.high %v1087_v32, %v1091_v33  ;;  %v1035_v31 = vld [vmem:[#allocation8 + $0x3e8] sm:$0xff] }
 0x24b   :  { %v1159_v32 = vld [vmem:[#allocation8 + $0x7c8] sm:$0xff] }
 0x24c   :  { %v1163_v33 = vld [vmem:[#allocation8 + $0x7e8] sm:$0xff] }
 0x24d   :  { %2515 = vmatpush2.bf16.msra.mxu0 %v5685_v41  ;;  %2556 = vmatpush2.bf16.msra.mxu1 %v5813_v42  ;;  %v955_v41 = vld [vmem:[#allocation8 + $0x168] sm:$0xff] }
 0x24e   :  { %2516 = vmatprep.subr.bf16.mxu0 %v5678_v48  ;;  %2557 = vmatprep.subr.bf16.mxu1 %v5806_v53  ;;  %v1079_v42 = vld [vmem:[#allocation8 + $0x548] sm:$0xff]  ;;  %v5648_v48 = vcombine.high %v951_v38, %v955_v41  ;;  %v5647_v55 = vcombine.low %v951_v38, %v955_v41  ;;  %v5856_v41 = vcombine.high %v1159_v32, %v1163_v33 }
 0x24f   :  { %v5776_v50 = vcombine.high %v1079_v42, %v1083_v43  ;;  %v1071_v53 = vld [vmem:[#allocation8 + $0x508] sm:$0xff]  ;;  %v5775_v56 = vcombine.low %v1079_v42, %v1083_v43 }
 0x250   :  { %v5768_v58 = vcombine.high %v1071_v53, %v1075_v54  ;;  %v5767_v1 = vcombine.low %v1071_v53, %v1075_v54  ;;  %v1023_v42 = vld [vmem:[#allocation8 + $0x388] sm:$0xff] }
 0x251   :  { %2517 = vmatpush2.bf16.msra.mxu0 %v5677_v51  ;;  %2558 = vmatpush2.bf16.msra.mxu1 %v5805_v52  ;;  %v943_v51 = vld [vmem:[#allocation8 + $0x108] sm:$0xff] }
 0x252   :  { %2518 = vmatprep.subr.bf16.mxu0 %v5670_v57  ;;  %2559 = vmatprep.subr.bf16.mxu1 %v5798_v61  ;;  %v947_v52 = vld [vmem:[#allocation8 + $0x128] sm:$0xff] }
 0x253   :  { %v5640_v57 = vcombine.high %v943_v51, %v947_v52  ;;  %v1063_v61 = vld [vmem:[#allocation8 + $0x4c8] sm:$0xff]  ;;  %v5639_v63 = vcombine.low %v943_v51, %v947_v52 }
 0x254   :  { %v5760_v3 = vcombine.high %v1063_v61, %v1067_v62  ;;  %v1027_v43 = vld [vmem:[#allocation8 + $0x3a8] sm:$0xff] }
 0x255   :  { %2519 = vmatpush2.bf16.msra.mxu0 %v5669_v59  ;;  %2560 = vmatpush2.bf16.msra.mxu1 %v5797_v60  ;;  %v935_v59 = vld [vmem:[#allocation8 + $0xc8] sm:$0xff]  ;;  %v5720_v51 = vcombine.high %v1023_v42, %v1027_v43 }
 0x256   :  { %2570 = vmatprep.subr.bf16.mxu0 %v5664_v2  ;;  %2611 = vmatprep.subr.bf16.mxu1 %v5792_v6  ;;  %v939_v60 = vld [vmem:[#allocation8 + $0xe8] sm:$0xff] }
 0x257   :  { %v5632_v2 = vcombine.high %v935_v59, %v939_v60  ;;  %v1055_v6 = vld [vmem:[#allocation8 + $0x488] sm:$0xff] }
 0x258   :  { %v1015_v53 = vld [vmem:[#allocation8 + $0x348] sm:$0xff] }
 0x259   :  { %v1019_v54 = vld [vmem:[#allocation8 + $0x368] sm:$0xff] }
 0x2d8   :  { %v854_v14 = vpop.f32.mrf.mxu0  ;;  %v895_v15 = vpop.f32.mrf.mxu1 }
 0x2d9   :  { %v855_v16 = vadd.f32 %v854_v14, %v483_v10  ;;  %v896_v17 = vadd.f32 %v895_v15, %v491_v11  ;;  %v5631_v10 = vcombine.low %v935_v59, %v939_v60  ;;  %v5759_v11 = vcombine.low %v1063_v61, %v1067_v62  ;;  %v919_v14 = vld [vmem:[#allocation8 + $0x48] sm:$0xff] }
 0x2da   :  { %v856_v18 = vpop.f32.mrf.mxu0  ;;  %v897_v19 = vpop.f32.mrf.mxu1  ;;  %v923_v15 = vld [vmem:[#allocation8 + $0x68] sm:$0xff]  ;;  %v5712_v59 = vcombine.high %v1015_v53, %v1019_v54 }
 0x2db   :  { %v857_v20 = vadd.f32 %v856_v18, %v487_v12  ;;  %v898_v21 = vadd.f32 %v897_v19, %v495_v13  ;;  %v902_v22 = vmax.f32 %v855_v16, 0.0  ;;  %v904_v23 = vmax.f32 %v896_v17, 0.0  ;;  %v1047_v16 = vld [vmem:[#allocation8 + $0x448] sm:$0xff] }
 0x2dc   :  { %v858_v24 = vpop.f32.mrf.mxu0  ;;  %v899_v25 = vpop.f32.mrf.mxu1  ;;  %v5752_v13 = vcombine.high %v1055_v6, %v1059_v8  ;;  %v1051_v17 = vld [vmem:[#allocation8 + $0x468] sm:$0xff]  ;;  %v5751_v19 = vcombine.low %v1055_v6, %v1059_v8 }
 0x2dd   :  { %v903_v26 = vmax.f32 %v857_v20, 0.0  ;;  %v905_v27 = vmax.f32 %v898_v21, 0.0  ;;  %v7291_v36 = vpack.c.bf16 %v902_v22, %v902_v22  ;;  %v7293_v37 = vpack.c.bf16 %v904_v23, %v904_v23  ;;  %v911_v22 = vld [vmem:[#allocation8 + $0x8] sm:$0xff] }
 0x2de   :  { %v859_v29 = vpop.f32.mrf.mxu0  ;;  %v900_v30 = vpop.f32.mrf.mxu1  ;;  %v5616_v20 = vcombine.high %v919_v14, %v923_v15  ;;  %v5744_v21 = vcombine.high %v1047_v16, %v1051_v17  ;;  %v915_v23 = vld [vmem:[#allocation8 + $0x28] sm:$0xff] }
 0x2df   :  { %v7287_v34 = vpack.c.bf16 %v903_v26, %v903_v26  ;;  %v7289_v35 = vpack.c.bf16 %v905_v27, %v905_v27  ;;  %v1039_v24 = vld [vmem:[#allocation8 + $0x408] sm:$0xff]  ;;  %v5615_v26 = vcombine.low %v919_v14, %v923_v15  ;;  %v5743_v27 = vcombine.low %v1047_v16, %v1051_v17 }
 0x2e0   :  { %v1043_v25 = vld [vmem:[#allocation8 + $0x428] sm:$0xff]  ;;  %v5608_v28 = vcombine.high %v911_v22, %v915_v23  ;;  %v5607_v38 = vcombine.low %v911_v22, %v915_v23 }
 0x2e1   :  { %2520 = vmatprep.mubr.bf16.mxu0 %v7287_v34  ;;  %2561 = vmatprep.mubr.bf16.mxu1 %v7289_v35  ;;  %v5736_v29 = vcombine.high %v1039_v24, %v1043_v25  ;;  %v1031_v30 = vld [vmem:[#allocation8 + $0x3c8] sm:$0xff] }
 0x2e2   :  { %2521 = vmatmul.mubr.bf16.vlgmr.msra.gmra.mxu0 %v7291_v36  ;;  %2562 = vmatmul.mubr.bf16.vlgmr.msra.gmra.mxu1 %v7293_v37  ;;  %v1007_v61 = vld [vmem:[#allocation8 + $0x308] sm:$0xff] }
 0x2e3   :  { %2571 = vmatpush1.bf16.msra.mxu0 %v5663_v4  ;;  %2612 = vmatpush1.bf16.msra.mxu1 %v5791_v5  ;;  %v927_v4 = vld [vmem:[#allocation8 + $0x88] sm:$0xff] }
 0x2e4   :  { %2602 = vmatprep.mubr.bf16.mxu0 %v7287_v34  ;;  %2643 = vmatprep.mubr.bf16.mxu1 %v7289_v35  ;;  %v931_v5 = vld [vmem:[#allocation8 + $0xa8] sm:$0xff] }
 0x2e5   :  { %2572 = vmatprep.subr.bf16.mxu0 %v5656_v39  ;;  %2613 = vmatprep.subr.bf16.mxu1 %v5784_v40  ;;  %v5624_v12 = vcombine.high %v927_v4, %v931_v5  ;;  %v5623_v18 = vcombine.low %v927_v4, %v931_v5  ;;  %v5735_v39 = vcombine.low %v1039_v24, %v1043_v25  ;;  %v1011_v62 = vld [vmem:[#allocation8 + $0x328] sm:$0xff] }
 0x2e6   :  { %v5728_v40 = vcombine.high %v1031_v30, %v1035_v31  ;;  %v5704_v4 = vcombine.high %v1007_v61, %v1011_v62  ;;  %v999_v6 = vld [vmem:[#allocation8 + $0x2c8] sm:$0xff] }
 0x2e7   :  { %2573 = vmatpush1.bf16.msra.mxu0 %v5655_v44  ;;  %2614 = vmatpush1.bf16.msra.mxu1 %v5783_v45  ;;  %v1151_v44 = vld [vmem:[#allocation8 + $0x788] sm:$0xff] }
 0x2e8   :  { %2574 = vmatprep.subr.bf16.mxu0 %v5648_v48  ;;  %2615 = vmatprep.subr.bf16.mxu1 %v5776_v50  ;;  %v1155_v45 = vld [vmem:[#allocation8 + $0x7a8] sm:$0xff]  ;;  %v5727_v48 = vcombine.low %v1031_v30, %v1035_v31  ;;  %v5855_v50 = vcombine.low %v1159_v32, %v1163_v33 }
 0x2e9   :  { %v5848_v52 = vcombine.high %v1151_v44, %v1155_v45  ;;  %v1003_v8 = vld [vmem:[#allocation8 + $0x2e8] sm:$0xff] }
 0x2ea   :  { %v5696_v14 = vcombine.high %v999_v6, %v1003_v8  ;;  %v991_v16 = vld [vmem:[#allocation8 + $0x288] sm:$0xff] }
 0x2eb   :  { %2575 = vmatpush1.bf16.msra.mxu0 %v5647_v55  ;;  %2616 = vmatpush1.bf16.msra.mxu1 %v5775_v56  ;;  %v1143_v55 = vld [vmem:[#allocation8 + $0x748] sm:$0xff] }
 0x2ec   :  { %2576 = vmatprep.subr.bf16.mxu0 %v5640_v57  ;;  %2617 = vmatprep.subr.bf16.mxu1 %v5768_v58  ;;  %v1147_v56 = vld [vmem:[#allocation8 + $0x768] sm:$0xff]  ;;  %v5719_v57 = vcombine.low %v1023_v42, %v1027_v43  ;;  %v5847_v58 = vcombine.low %v1151_v44, %v1155_v45  ;;  %v968_v44 = vld [vmem:[#allocation8 + $0x1d0] sm:$0xff] }
 0x2ed   :  { %v5840_v60 = vcombine.high %v1143_v55, %v1147_v56  ;;  %v995_v17 = vld [vmem:[#allocation8 + $0x2a8] sm:$0xff]  ;;  %v972_v45 = vld [vmem:[#allocation8 + $0x1f0] sm:$0xff] }
 0x2ee   :  { %v5688_v22 = vcombine.high %v991_v16, %v995_v17  ;;  %v983_v24 = vld [vmem:[#allocation8 + $0x248] sm:$0xff] }
 0x2ef   :  { %2577 = vmatpush1.bf16.msra.mxu0 %v5639_v63  ;;  %2618 = vmatpush1.bf16.msra.mxu1 %v5767_v1  ;;  %v1135_v63 = vld [vmem:[#allocation8 + $0x708] sm:$0xff] }
 0x2f0   :  { %2578 = vmatprep.subr.bf16.mxu0 %v5632_v2  ;;  %2619 = vmatprep.subr.bf16.mxu1 %v5760_v3  ;;  %v1139_v1 = vld [vmem:[#allocation8 + $0x728] sm:$0xff]  ;;  %v5711_v2 = vcombine.low %v1015_v53, %v1019_v54  ;;  %v5839_v3 = vcombine.low %v1143_v55, %v1147_v56  ;;  %v5666_v53 = vcombine.high %v968_v44, %v972_v45  ;;  %v960_v55 = vld [vmem:[#allocation8 + $0x190] sm:$0xff] }
 0x2f1   :  { %v5832_v5 = vcombine.high %v1135_v63, %v1139_v1  ;;  %v987_v25 = vld [vmem:[#allocation8 + $0x268] sm:$0xff]  ;;  %v964_v56 = vld [vmem:[#allocation8 + $0x1b0] sm:$0xff] }
 0x2f2   :  { %v5680_v30 = vcombine.high %v983_v24, %v987_v25  ;;  %v975_v32 = vld [vmem:[#allocation8 + $0x208] sm:$0xff] }
 0x2f3   :  { %2579 = vmatpush1.bf16.msra.mxu0 %v5631_v10  ;;  %2620 = vmatpush1.bf16.msra.mxu1 %v5759_v11  ;;  %v1127_v10 = vld [vmem:[#allocation8 + $0x6c8] sm:$0xff] }
 0x2f4   :  { %2580 = vmatprep.subr.bf16.mxu0 %v5624_v12  ;;  %2621 = vmatprep.subr.bf16.mxu1 %v5752_v13  ;;  %v1131_v11 = vld [vmem:[#allocation8 + $0x6e8] sm:$0xff]  ;;  %v5703_v12 = vcombine.low %v1007_v61, %v1011_v62  ;;  %v5831_v13 = vcombine.low %v1135_v63, %v1139_v1  ;;  %v5658_v61 = vcombine.high %v960_v55, %v964_v56  ;;  %v952_v63 = vld [vmem:[#allocation8 + $0x150] sm:$0xff] }
 0x2f5   :  { %v5824_v15 = vcombine.high %v1127_v10, %v1131_v11  ;;  %v979_v33 = vld [vmem:[#allocation8 + $0x228] sm:$0xff]  ;;  %v956_v1 = vld [vmem:[#allocation8 + $0x170] sm:$0xff] }
 0x2f6   :  { %v5672_v42 = vcombine.high %v975_v32, %v979_v33 }
 0x2f7   :  { %2581 = vmatpush1.bf16.msra.mxu0 %v5623_v18  ;;  %2622 = vmatpush1.bf16.msra.mxu1 %v5751_v19  ;;  %v1119_v18 = vld [vmem:[#allocation8 + $0x688] sm:$0xff] }
 0x2f8   :  { %2582 = vmatprep.subr.bf16.mxu0 %v5616_v20  ;;  %2623 = vmatprep.subr.bf16.mxu1 %v5744_v21  ;;  %v1123_v19 = vld [vmem:[#allocation8 + $0x6a8] sm:$0xff]  ;;  %v5695_v20 = vcombine.low %v999_v6, %v1003_v8  ;;  %v5823_v21 = vcombine.low %v1127_v10, %v1131_v11  ;;  %v5650_v6 = vcombine.high %v952_v63, %v956_v1  ;;  %v944_v10 = vld [vmem:[#allocation8 + $0x110] sm:$0xff] }
 0x2f9   :  { %v5816_v23 = vcombine.high %v1119_v18, %v1123_v19  ;;  %v948_v11 = vld [vmem:[#allocation8 + $0x130] sm:$0xff] }
 0x2fb   :  { %2583 = vmatpush1.bf16.msra.mxu0 %v5615_v26  ;;  %2624 = vmatpush1.bf16.msra.mxu1 %v5743_v27  ;;  %v1111_v26 = vld [vmem:[#allocation8 + $0x648] sm:$0xff] }
 0x2fc   :  { %2584 = vmatprep.subr.bf16.mxu0 %v5608_v28  ;;  %2625 = vmatprep.subr.bf16.mxu1 %v5736_v29  ;;  %v1115_v27 = vld [vmem:[#allocation8 + $0x668] sm:$0xff]  ;;  %v5687_v28 = vcombine.low %v991_v16, %v995_v17  ;;  %v5815_v29 = vcombine.low %v1119_v18, %v1123_v19  ;;  %v5642_v16 = vcombine.high %v944_v10, %v948_v11  ;;  %v936_v18 = vld [vmem:[#allocation8 + $0xd0] sm:$0xff] }
 0x2fd   :  { %v5808_v31 = vcombine.high %v1111_v26, %v1115_v27  ;;  %v940_v19 = vld [vmem:[#allocation8 + $0xf0] sm:$0xff] }
 0x2ff   :  { %2585 = vmatpush1.bf16.msra.mxu0 %v5607_v38  ;;  %2626 = vmatpush1.bf16.msra.mxu1 %v5735_v39  ;;  %v1103_v38 = vld [vmem:[#allocation8 + $0x608] sm:$0xff] }
 0x300   :  { %2586 = vmatprep.subr.bf16.mxu0 %v5728_v40  ;;  %2627 = vmatprep.subr.bf16.mxu1 %v5856_v41  ;;  %v1107_v39 = vld [vmem:[#allocation8 + $0x628] sm:$0xff]  ;;  %v5679_v40 = vcombine.low %v983_v24, %v987_v25  ;;  %v5807_v41 = vcombine.low %v1111_v26, %v1115_v27  ;;  %v5634_v24 = vcombine.high %v936_v18, %v940_v19  ;;  %v928_v26 = vld [vmem:[#allocation8 + $0x90] sm:$0xff] }
 0x301   :  { %v5800_v43 = vcombine.high %v1103_v38, %v1107_v39  ;;  %v932_v27 = vld [vmem:[#allocation8 + $0xb0] sm:$0xff] }
 0x303   :  { %2587 = vmatpush2.bf16.msra.mxu0 %v5727_v48  ;;  %2628 = vmatpush2.bf16.msra.mxu1 %v5855_v50  ;;  %v1096_v48 = vld [vmem:[#allocation8 + $0x5d0] sm:$0xff] }
 0x304   :  { %2588 = vmatprep.subr.bf16.mxu0 %v5720_v51  ;;  %2629 = vmatprep.subr.bf16.mxu1 %v5848_v52  ;;  %v1100_v50 = vld [vmem:[#allocation8 + $0x5f0] sm:$0xff]  ;;  %v5671_v51 = vcombine.low %v975_v32, %v979_v33  ;;  %v5799_v52 = vcombine.low %v1103_v38, %v1107_v39  ;;  %v5626_v32 = vcombine.high %v928_v26, %v932_v27 }
 0x305   :  { %v5794_v54 = vcombine.high %v1096_v48, %v1100_v50  ;;  %v920_v38 = vld [vmem:[#allocation8 + $0x50] sm:$0xff] }
 0x306   :  { %v924_v39 = vld [vmem:[#allocation8 + $0x70] sm:$0xff] }
 0x307   :  { %2589 = vmatpush2.bf16.msra.mxu0 %v5719_v57  ;;  %2630 = vmatpush2.bf16.msra.mxu1 %v5847_v58  ;;  %v1088_v57 = vld [vmem:[#allocation8 + $0x590] sm:$0xff] }
 0x308   :  { %2590 = vmatprep.subr.bf16.mxu0 %v5712_v59  ;;  %2631 = vmatprep.subr.bf16.mxu1 %v5840_v60  ;;  %v1092_v58 = vld [vmem:[#allocation8 + $0x5b0] sm:$0xff]  ;;  %v5665_v59 = vcombine.low %v968_v44, %v972_v45  ;;  %v5793_v60 = vcombine.low %v1096_v48, %v1100_v50  ;;  %v5618_v44 = vcombine.high %v920_v38, %v924_v39 }
 0x309   :  { %v5786_v62 = vcombine.high %v1088_v57, %v1092_v58  ;;  %v912_v48 = vld [vmem:[#allocation8 + $0x10] sm:$0xff] }
 0x30a   :  { %v916_v50 = vld [vmem:[#allocation8 + $0x30] sm:$0xff] }
 0x30b   :  { %2591 = vmatpush2.bf16.msra.mxu0 %v5711_v2  ;;  %2632 = vmatpush2.bf16.msra.mxu1 %v5839_v3  ;;  %v1080_v2 = vld [vmem:[#allocation8 + $0x550] sm:$0xff] }
 0x30c   :  { %2592 = vmatprep.subr.bf16.mxu0 %v5704_v4  ;;  %2633 = vmatprep.subr.bf16.mxu1 %v5832_v5  ;;  %v1084_v3 = vld [vmem:[#allocation8 + $0x570] sm:$0xff]  ;;  %v5657_v4 = vcombine.low %v960_v55, %v964_v56  ;;  %v5785_v5 = vcombine.low %v1088_v57, %v1092_v58  ;;  %v5610_v55 = vcombine.high %v912_v48, %v916_v50 }
 0x30d   :  { %v5778_v8 = vcombine.high %v1080_v2, %v1084_v3  ;;  %v1032_v57 = vld [vmem:[#allocation8 + $0x3d0] sm:$0xff] }
 0x30e   :  { %v1036_v58 = vld [vmem:[#allocation8 + $0x3f0] sm:$0xff] }
 0x30f   :  { %2593 = vmatpush2.bf16.msra.mxu0 %v5703_v12  ;;  %2634 = vmatpush2.bf16.msra.mxu1 %v5831_v13  ;;  %v1072_v12 = vld [vmem:[#allocation8 + $0x510] sm:$0xff] }
 0x310   :  { %2594 = vmatprep.subr.bf16.mxu0 %v5696_v14  ;;  %2635 = vmatprep.subr.bf16.mxu1 %v5824_v15  ;;  %v1076_v13 = vld [vmem:[#allocation8 + $0x530] sm:$0xff]  ;;  %v5649_v14 = vcombine.low %v952_v63, %v956_v1  ;;  %v5777_v15 = vcombine.low %v1080_v2, %v1084_v3  ;;  %v5730_v63 = vcombine.high %v1032_v57, %v1036_v58 }
 0x311   :  { %v5770_v17 = vcombine.high %v1072_v12, %v1076_v13  ;;  %v1024_v2 = vld [vmem:[#allocation8 + $0x390] sm:$0xff] }
 0x312   :  { %v1028_v3 = vld [vmem:[#allocation8 + $0x3b0] sm:$0xff] }
 0x313   :  { %2595 = vmatpush2.bf16.msra.mxu0 %v5695_v20  ;;  %2636 = vmatpush2.bf16.msra.mxu1 %v5823_v21  ;;  %v1064_v20 = vld [vmem:[#allocation8 + $0x4d0] sm:$0xff] }
 0x314   :  { %2596 = vmatprep.subr.bf16.mxu0 %v5688_v22  ;;  %2637 = vmatprep.subr.bf16.mxu1 %v5816_v23  ;;  %v1068_v21 = vld [vmem:[#allocation8 + $0x4f0] sm:$0xff]  ;;  %v5641_v22 = vcombine.low %v944_v10, %v948_v11  ;;  %v5769_v23 = vcombine.low %v1072_v12, %v1076_v13  ;;  %v5722_v10 = vcombine.high %v1024_v2, %v1028_v3 }
 0x315   :  { %v5762_v25 = vcombine.high %v1064_v20, %v1068_v21  ;;  %v1016_v12 = vld [vmem:[#allocation8 + $0x350] sm:$0xff] }
 0x316   :  { %v1020_v13 = vld [vmem:[#allocation8 + $0x370] sm:$0xff] }
 0x317   :  { %2597 = vmatpush2.bf16.msra.mxu0 %v5687_v28  ;;  %2638 = vmatpush2.bf16.msra.mxu1 %v5815_v29  ;;  %v1056_v28 = vld [vmem:[#allocation8 + $0x490] sm:$0xff] }
 0x318   :  { %2598 = vmatprep.subr.bf16.mxu0 %v5680_v30  ;;  %2639 = vmatprep.subr.bf16.mxu1 %v5808_v31  ;;  %v1060_v29 = vld [vmem:[#allocation8 + $0x4b0] sm:$0xff]  ;;  %v5633_v30 = vcombine.low %v936_v18, %v940_v19  ;;  %v5761_v31 = vcombine.low %v1064_v20, %v1068_v21  ;;  %v5714_v18 = vcombine.high %v1016_v12, %v1020_v13 }
 0x319   :  { %v5754_v33 = vcombine.high %v1056_v28, %v1060_v29  ;;  %v1008_v20 = vld [vmem:[#allocation8 + $0x310] sm:$0xff] }
 0x31a   :  { %v1012_v21 = vld [vmem:[#allocation8 + $0x330] sm:$0xff] }
 0x31b   :  { %2599 = vmatpush2.bf16.msra.mxu0 %v5679_v40  ;;  %2640 = vmatpush2.bf16.msra.mxu1 %v5807_v41  ;;  %v1048_v40 = vld [vmem:[#allocation8 + $0x450] sm:$0xff] }
 0x31c   :  { %2600 = vmatprep.subr.bf16.mxu0 %v5672_v42  ;;  %2641 = vmatprep.subr.bf16.mxu1 %v5800_v43  ;;  %v1052_v41 = vld [vmem:[#allocation8 + $0x470] sm:$0xff]  ;;  %v5625_v42 = vcombine.low %v928_v26, %v932_v27  ;;  %v5753_v43 = vcombine.low %v1056_v28, %v1060_v29  ;;  %v5706_v26 = vcombine.high %v1008_v20, %v1012_v21 }
 0x31d   :  { %v5746_v45 = vcombine.high %v1048_v40, %v1052_v41  ;;  %v1000_v28 = vld [vmem:[#allocation8 + $0x2d0] sm:$0xff] }
 0x31e   :  { %v1004_v29 = vld [vmem:[#allocation8 + $0x2f0] sm:$0xff] }
 0x31f   :  { %2601 = vmatpush2.bf16.msra.mxu0 %v5671_v51  ;;  %2642 = vmatpush2.bf16.msra.mxu1 %v5799_v52  ;;  %v1040_v51 = vld [vmem:[#allocation8 + $0x410] sm:$0xff] }
 0x320   :  { %2652 = vmatprep.subr.bf16.mxu0 %v5666_v53  ;;  %2693 = vmatprep.subr.bf16.mxu1 %v5794_v54  ;;  %v1044_v52 = vld [vmem:[#allocation8 + $0x430] sm:$0xff]  ;;  %v5617_v53 = vcombine.low %v920_v38, %v924_v39  ;;  %v5745_v54 = vcombine.low %v1048_v40, %v1052_v41  ;;  %v5698_v38 = vcombine.high %v1000_v28, %v1004_v29 }
 0x321   :  { %v5738_v56 = vcombine.high %v1040_v51, %v1044_v52  ;;  %v992_v40 = vld [vmem:[#allocation8 + $0x290] sm:$0xff] }
 0x322   :  { %2603 = vmatmul.mubr.bf16.vlgmr.msra.gmra.mxu0 %v7291_v36  ;;  %2644 = vmatmul.mubr.bf16.vlgmr.msra.gmra.mxu1 %v7293_v37  ;;  %v996_v41 = vld [vmem:[#allocation8 + $0x2b0] sm:$0xff] }
 0x323   :  { %2653 = vmatpush1.bf16.msra.mxu0 %v5665_v59  ;;  %2684 = vmatprep.mubr.bf16.mxu0 %v7287_v34  ;;  %v1160_v59 = vld [vmem:[#allocation8 + $0x7d0] sm:$0xff] }
 0x324   :  { %2694 = vmatpush1.bf16.msra.mxu1 %v5793_v60  ;;  %2725 = vmatprep.mubr.bf16.mxu1 %v7289_v35  ;;  %v1164_v60 = vld [vmem:[#allocation8 + $0x7f0] sm:$0xff] }
 0x325   :  { %2654 = vmatprep.subr.bf16.mxu0 %v5658_v61  ;;  %2695 = vmatprep.subr.bf16.mxu1 %v5786_v62  ;;  %v5609_v61 = vcombine.low %v912_v48, %v916_v50  ;;  %v5737_v62 = vcombine.low %v1040_v51, %v1044_v52  ;;  %v5858_v1 = vcombine.high %v1160_v59, %v1164_v60  ;;  %v984_v51 = vld [vmem:[#allocation8 + $0x250] sm:$0xff] }
 0x326   :  { %v5690_v48 = vcombine.high %v992_v40, %v996_v41  ;;  %v988_v52 = vld [vmem:[#allocation8 + $0x270] sm:$0xff] }
 0x327   :  { %2655 = vmatpush1.bf16.msra.mxu0 %v5657_v4  ;;  %v1152_v4 = vld [vmem:[#allocation8 + $0x790] sm:$0xff] }
 0x328   :  { %2696 = vmatpush1.bf16.msra.mxu1 %v5785_v5  ;;  %2656 = vmatprep.subr.bf16.mxu0 %v5650_v6  ;;  %v1156_v5 = vld [vmem:[#allocation8 + $0x7b0] sm:$0xff]  ;;  %v5729_v6 = vcombine.low %v1032_v57, %v1036_v58  ;;  %v5682_v57 = vcombine.high %v984_v51, %v988_v52 }
 0x329   :  { %2697 = vmatprep.subr.bf16.mxu1 %v5778_v8  ;;  %v5857_v8 = vcombine.low %v1160_v59, %v1164_v60  ;;  %v5850_v11 = vcombine.high %v1152_v4, %v1156_v5  ;;  %v976_v59 = vld [vmem:[#allocation8 + $0x210] sm:$0xff] }
 0x32a   :  { %v980_v60 = vld [vmem:[#allocation8 + $0x230] sm:$0xff] }
 0x32b   :  { %2657 = vmatpush1.bf16.msra.mxu0 %v5649_v14  ;;  %v1144_v14 = vld [vmem:[#allocation8 + $0x750] sm:$0xff] }
 0x32c   :  { %2698 = vmatpush1.bf16.msra.mxu1 %v5777_v15  ;;  %2658 = vmatprep.subr.bf16.mxu0 %v5642_v16  ;;  %v1148_v15 = vld [vmem:[#allocation8 + $0x770] sm:$0xff]  ;;  %v5721_v16 = vcombine.low %v1024_v2, %v1028_v3  ;;  %v5674_v2 = vcombine.high %v976_v59, %v980_v60 }
 0x32d   :  { %2699 = vmatprep.subr.bf16.mxu1 %v5770_v17  ;;  %v5849_v17 = vcombine.low %v1152_v4, %v1156_v5  ;;  %v5842_v19 = vcombine.high %v1144_v14, %v1148_v15  ;;  %v969_v4 = vld [vmem:[#allocation8 + $0x1d8] sm:$0xff] }
 0x32e   :  { %v973_v5 = vld [vmem:[#allocation8 + $0x1f8] sm:$0xff] }
 0x32f   :  { %2659 = vmatpush1.bf16.msra.mxu0 %v5641_v22  ;;  %v1136_v22 = vld [vmem:[#allocation8 + $0x710] sm:$0xff] }
 0x330   :  { %2700 = vmatpush1.bf16.msra.mxu1 %v5769_v23  ;;  %2660 = vmatprep.subr.bf16.mxu0 %v5634_v24  ;;  %v1140_v23 = vld [vmem:[#allocation8 + $0x730] sm:$0xff]  ;;  %v5713_v24 = vcombine.low %v1016_v12, %v1020_v13  ;;  %v5668_v12 = vcombine.high %v969_v4, %v973_v5 }
 0x331   :  { %2701 = vmatprep.subr.bf16.mxu1 %v5762_v25  ;;  %v5841_v25 = vcombine.low %v1144_v14, %v1148_v15  ;;  %v5834_v27 = vcombine.high %v1136_v22, %v1140_v23  ;;  %v961_v14 = vld [vmem:[#allocation8 + $0x198] sm:$0xff] }
 0x332   :  { %v965_v15 = vld [vmem:[#allocation8 + $0x1b8] sm:$0xff] }
 0x333   :  { %2661 = vmatpush1.bf16.msra.mxu0 %v5633_v30  ;;  %v1128_v30 = vld [vmem:[#allocation8 + $0x6d0] sm:$0xff] }
 0x334   :  { %2702 = vmatpush1.bf16.msra.mxu1 %v5761_v31  ;;  %2662 = vmatprep.subr.bf16.mxu0 %v5626_v32  ;;  %v1132_v31 = vld [vmem:[#allocation8 + $0x6f0] sm:$0xff]  ;;  %v5705_v32 = vcombine.low %v1008_v20, %v1012_v21  ;;  %v5660_v20 = vcombine.high %v961_v14, %v965_v15  ;;  %v953_v21 = vld [vmem:[#allocation8 + $0x158] sm:$0xff] }
 0x335   :  { %2703 = vmatprep.subr.bf16.mxu1 %v5754_v33  ;;  %v5833_v33 = vcombine.low %v1136_v22, %v1140_v23  ;;  %v5826_v39 = vcombine.high %v1128_v30, %v1132_v31  ;;  %v957_v22 = vld [vmem:[#allocation8 + $0x178] sm:$0xff] }
 0x337   :  { %2663 = vmatpush1.bf16.msra.mxu0 %v5625_v42  ;;  %v1120_v42 = vld [vmem:[#allocation8 + $0x690] sm:$0xff] }
 0x338   :  { %2704 = vmatpush1.bf16.msra.mxu1 %v5753_v43  ;;  %2664 = vmatprep.subr.bf16.mxu0 %v5618_v44  ;;  %v1124_v43 = vld [vmem:[#allocation8 + $0x6b0] sm:$0xff]  ;;  %v5697_v44 = vcombine.low %v1000_v28, %v1004_v29  ;;  %v5652_v28 = vcombine.high %v953_v21, %v957_v22 }
 0x339   :  { %2705 = vmatprep.subr.bf16.mxu1 %v5746_v45  ;;  %v5825_v45 = vcombine.low %v1128_v30, %v1132_v31  ;;  %v5818_v50 = vcombine.high %v1120_v42, %v1124_v43  ;;  %v945_v30 = vld [vmem:[#allocation8 + $0x118] sm:$0xff] }
 0x33a   :  { %v949_v31 = vld [vmem:[#allocation8 + $0x138] sm:$0xff] }
 0x33b   :  { %2665 = vmatpush1.bf16.msra.mxu0 %v5617_v53  ;;  %v1112_v53 = vld [vmem:[#allocation8 + $0x650] sm:$0xff] }
 0x33c   :  { %2706 = vmatpush1.bf16.msra.mxu1 %v5745_v54  ;;  %2666 = vmatprep.subr.bf16.mxu0 %v5610_v55  ;;  %v1116_v54 = vld [vmem:[#allocation8 + $0x670] sm:$0xff]  ;;  %v5689_v55 = vcombine.low %v992_v40, %v996_v41  ;;  %v5644_v40 = vcombine.high %v945_v30, %v949_v31  ;;  %v937_v41 = vld [vmem:[#allocation8 + $0xd8] sm:$0xff] }
 0x33d   :  { %2707 = vmatprep.subr.bf16.mxu1 %v5738_v56  ;;  %v5817_v56 = vcombine.low %v1120_v42, %v1124_v43  ;;  %v5810_v58 = vcombine.high %v1112_v53, %v1116_v54  ;;  %v941_v42 = vld [vmem:[#allocation8 + $0xf8] sm:$0xff] }
 0x33e   :  { %v1065_v43 = vld [vmem:[#allocation8 + $0x4d8] sm:$0xff] }
 0x33f   :  { %2667 = vmatpush1.bf16.msra.mxu0 %v5609_v61  ;;  %v1104_v61 = vld [vmem:[#allocation8 + $0x610] sm:$0xff] }
 0x340   :  { %2708 = vmatpush1.bf16.msra.mxu1 %v5737_v62  ;;  %2668 = vmatprep.subr.bf16.mxu0 %v5730_v63  ;;  %v1108_v62 = vld [vmem:[#allocation8 + $0x630] sm:$0xff]  ;;  %v5681_v63 = vcombine.low %v984_v51, %v988_v52  ;;  %v929_v51 = vld [vmem:[#allocation8 + $0x98] sm:$0xff] }
 0x341   :  { %2709 = vmatprep.subr.bf16.mxu1 %v5858_v1  ;;  %v5809_v1 = vcombine.low %v1112_v53, %v1116_v54  ;;  %v5802_v3 = vcombine.high %v1104_v61, %v1108_v62  ;;  %v933_v52 = vld [vmem:[#allocation8 + $0xb8] sm:$0xff] }
 0x342   :  { %v1057_v53 = vld [vmem:[#allocation8 + $0x498] sm:$0xff] }
 0x343   :  { %2669 = vmatpush2.bf16.msra.mxu0 %v5729_v6  ;;  %v1097_v6 = vld [vmem:[#allocation8 + $0x5d8] sm:$0xff] }
 0x344   :  { %2710 = vmatpush2.bf16.msra.mxu1 %v5857_v8  ;;  %2670 = vmatprep.subr.bf16.mxu0 %v5722_v10  ;;  %v1101_v8 = vld [vmem:[#allocation8 + $0x5f8] sm:$0xff]  ;;  %v5673_v10 = vcombine.low %v976_v59, %v980_v60 }
 0x345   :  { %2711 = vmatprep.subr.bf16.mxu1 %v5850_v11  ;;  %v5801_v11 = vcombine.low %v1104_v61, %v1108_v62  ;;  %v5796_v13 = vcombine.high %v1097_v6, %v1101_v8  ;;  %v1061_v54 = vld [vmem:[#allocation8 + $0x4b8] sm:$0xff] }
 0x346   :  { %v921_v59 = vld [vmem:[#allocation8 + $0x58] sm:$0xff] }
 0x347   :  { %2671 = vmatpush2.bf16.msra.mxu0 %v5721_v16  ;;  %v5667_v16 = vcombine.low %v969_v4, %v973_v5  ;;  %v925_v60 = vld [vmem:[#allocation8 + $0x78] sm:$0xff] }
 0x348   :  { %2712 = vmatpush2.bf16.msra.mxu1 %v5849_v17  ;;  %2672 = vmatprep.subr.bf16.mxu0 %v5714_v18  ;;  %v1089_v17 = vld [vmem:[#allocation8 + $0x598] sm:$0xff] }
 0x349   :  { %2713 = vmatprep.subr.bf16.mxu1 %v5842_v19  ;;  %v1093_v18 = vld [vmem:[#allocation8 + $0x5b8] sm:$0xff]  ;;  %v5795_v19 = vcombine.low %v1097_v6, %v1101_v8 }
 0x34a   :  { %v5788_v23 = vcombine.high %v1089_v17, %v1093_v18  ;;  %v1049_v61 = vld [vmem:[#allocation8 + $0x458] sm:$0xff] }
 0x34b   :  { %2673 = vmatpush2.bf16.msra.mxu0 %v5713_v24  ;;  %v1081_v24 = vld [vmem:[#allocation8 + $0x558] sm:$0xff] }
 0x34c   :  { %2714 = vmatpush2.bf16.msra.mxu1 %v5841_v25  ;;  %2674 = vmatprep.subr.bf16.mxu0 %v5706_v26  ;;  %v1085_v25 = vld [vmem:[#allocation8 + $0x578] sm:$0xff]  ;;  %v5659_v26 = vcombine.low %v961_v14, %v965_v15 }
 0x34d   :  { %2715 = vmatprep.subr.bf16.mxu1 %v5834_v27  ;;  %v5787_v27 = vcombine.low %v1089_v17, %v1093_v18  ;;  %v5780_v29 = vcombine.high %v1081_v24, %v1085_v25  ;;  %v1053_v62 = vld [vmem:[#allocation8 + $0x478] sm:$0xff] }
 0x34e   :  { %v913_v4 = vld [vmem:[#allocation8 + $0x18] sm:$0xff] }
 0x34f   :  { %2675 = vmatpush2.bf16.msra.mxu0 %v5705_v32  ;;  %v1073_v32 = vld [vmem:[#allocation8 + $0x518] sm:$0xff] }
 0x350   :  { %2716 = vmatpush2.bf16.msra.mxu1 %v5833_v33  ;;  %2676 = vmatprep.subr.bf16.mxu0 %v5698_v38  ;;  %v1077_v33 = vld [vmem:[#allocation8 + $0x538] sm:$0xff]  ;;  %v5651_v38 = vcombine.low %v953_v21, %v957_v22 }
 0x351   :  { %2717 = vmatprep.subr.bf16.mxu1 %v5826_v39  ;;  %v5779_v39 = vcombine.low %v1081_v24, %v1085_v25  ;;  %v917_v5 = vld [vmem:[#allocation8 + $0x38] sm:$0xff] }
 0x352   :  { %v1041_v6 = vld [vmem:[#allocation8 + $0x418] sm:$0xff]  ;;  %v5611_v18 = vcombine.low %v913_v4, %v917_v5 }
 0x353   :  { %2677 = vmatpush2.bf16.msra.mxu0 %v5697_v44  ;;  %v1069_v44 = vld [vmem:[#allocation8 + $0x4f8] sm:$0xff] }
 0x354   :  { %2718 = vmatpush2.bf16.msra.mxu1 %v5825_v45  ;;  %2678 = vmatprep.subr.bf16.mxu0 %v5690_v48  ;;  %v5771_v45 = vcombine.low %v1073_v32, %v1077_v33  ;;  %v5636_v48 = vcombine.high %v937_v41, %v941_v42  ;;  %v1045_v8 = vld [vmem:[#allocation8 + $0x438] sm:$0xff] }
 0x355   :  { %2719 = vmatprep.subr.bf16.mxu1 %v5818_v50  ;;  %v5764_v50 = vcombine.high %v1065_v43, %v1069_v44  ;;  %v1033_v14 = vld [vmem:[#allocation8 + $0x3d8] sm:$0xff] }
 0x356   :  { %v1037_v15 = vld [vmem:[#allocation8 + $0x3f8] sm:$0xff] }
 0x357   :  { %2679 = vmatpush2.bf16.msra.mxu0 %v5689_v55  ;;  %v5635_v55 = vcombine.low %v937_v41, %v941_v42  ;;  %v1165_v17 = vld [vmem:[#allocation8 + $0x7f8] sm:$0xff] }
 0x358   :  { %2720 = vmatpush2.bf16.msra.mxu1 %v5817_v56  ;;  %2680 = vmatprep.subr.bf16.mxu0 %v5682_v57  ;;  %v5763_v56 = vcombine.low %v1065_v43, %v1069_v44  ;;  %v5628_v57 = vcombine.high %v929_v51, %v933_v52  ;;  %v1025_v22 = vld [vmem:[#allocation8 + $0x398] sm:$0xff] }
 0x359   :  { %2721 = vmatprep.subr.bf16.mxu1 %v5810_v58  ;;  %v5756_v58 = vcombine.high %v1057_v53, %v1061_v54  ;;  %v1153_v24 = vld [vmem:[#allocation8 + $0x798] sm:$0xff] }
 0x35a   :  { %v1157_v25 = vld [vmem:[#allocation8 + $0x7b8] sm:$0xff] }
 0x35b   :  { %2681 = vmatpush2.bf16.msra.mxu0 %v5681_v63  ;;  %v5627_v63 = vcombine.low %v929_v51, %v933_v52  ;;  %v1009_v41 = vld [vmem:[#allocation8 + $0x318] sm:$0xff] }
 0x35c   :  { %2722 = vmatpush2.bf16.msra.mxu1 %v5809_v1  ;;  %2682 = vmatprep.subr.bf16.mxu0 %v5674_v2  ;;  %v5755_v1 = vcombine.low %v1057_v53, %v1061_v54  ;;  %v5620_v2 = vcombine.high %v921_v59, %v925_v60  ;;  %v1013_v42 = vld [vmem:[#allocation8 + $0x338] sm:$0xff] }
 0x35d   :  { %2723 = vmatprep.subr.bf16.mxu1 %v5802_v3  ;;  %v5748_v3 = vcombine.high %v1049_v61, %v1053_v62  ;;  %v1137_v43 = vld [vmem:[#allocation8 + $0x718] sm:$0xff] }
 0x35e   :  { %v1141_v44 = vld [vmem:[#allocation8 + $0x738] sm:$0xff] }
 0x35f   :  { %2683 = vmatpush2.bf16.msra.mxu0 %v5673_v10  ;;  %v5619_v10 = vcombine.low %v921_v59, %v925_v60  ;;  %v1001_v51 = vld [vmem:[#allocation8 + $0x2d8] sm:$0xff] }
 0x360   :  { %2724 = vmatpush2.bf16.msra.mxu1 %v5801_v11  ;;  %2734 = vmatprep.subr.bf16.mxu0 %v5668_v12  ;;  %v5747_v11 = vcombine.low %v1049_v61, %v1053_v62  ;;  %v5612_v12 = vcombine.high %v913_v4, %v917_v5  ;;  %v1005_v52 = vld [vmem:[#allocation8 + $0x2f8] sm:$0xff] }
 0x361   :  { %2775 = vmatprep.subr.bf16.mxu1 %v5796_v13  ;;  %v5740_v13 = vcombine.high %v1041_v6, %v1045_v8  ;;  %v1129_v53 = vld [vmem:[#allocation8 + $0x6d8] sm:$0xff] }
 0x362   :  { %2685 = vmatmul.mubr.bf16.vlgmr.msra.gmra.mxu0 %v7291_v36  ;;  %v1133_v54 = vld [vmem:[#allocation8 + $0x6f8] sm:$0xff] }
 0x363   :  { %2726 = vmatmul.mubr.bf16.vlgmr.msra.gmra.mxu1 %v7293_v37  ;;  %2735 = vmatpush1.bf16.msra.mxu0 %v5667_v16  ;;  %v1161_v16 = vld [vmem:[#allocation8 + $0x7d8] sm:$0xff] }
 0x364   :  { %2766 = vmatprep.mubr.bf16.mxu0 %v7287_v34  ;;  %2776 = vmatpush1.bf16.msra.mxu1 %v5795_v19  ;;  %v5772_v34 = vcombine.high %v1073_v32, %v1077_v33  ;;  %v5739_v19 = vcombine.low %v1041_v6, %v1045_v8  ;;  %v5860_v21 = vcombine.high %v1161_v16, %v1165_v17  ;;  %v1145_v32 = vld [vmem:[#allocation8 + $0x758] sm:$0xff] }
 0x365   :  { %2807 = vmatprep.mubr.bf16.mxu1 %v7289_v35  ;;  %2736 = vmatprep.subr.bf16.mxu0 %v5660_v20  ;;  %v5643_v35 = vcombine.low %v945_v30, %v949_v31  ;;  %v5732_v20 = vcombine.high %v1033_v14, %v1037_v15  ;;  %v1017_v30 = vld [vmem:[#allocation8 + $0x358] sm:$0xff] }
 0x366   :  { %2777 = vmatprep.subr.bf16.mxu1 %v5788_v23  ;;  %v1029_v23 = vld [vmem:[#allocation8 + $0x3b8] sm:$0xff] }
 0x367   :  { %2737 = vmatpush1.bf16.msra.mxu0 %v5659_v26  ;;  %v5731_v26 = vcombine.low %v1033_v14, %v1037_v15  ;;  %v1021_v31 = vld [vmem:[#allocation8 + $0x378] sm:$0xff] }
 0x368   :  { %2778 = vmatpush1.bf16.msra.mxu1 %v5787_v27  ;;  %2738 = vmatprep.subr.bf16.mxu0 %v5652_v28  ;;  %v5859_v27 = vcombine.low %v1161_v16, %v1165_v17  ;;  %v5724_v28 = vcombine.high %v1025_v22, %v1029_v23  ;;  %v1149_v33 = vld [vmem:[#allocation8 + $0x778] sm:$0xff] }
 0x369   :  { %2779 = vmatprep.subr.bf16.mxu1 %v5780_v29  ;;  %v5852_v29 = vcombine.high %v1153_v24, %v1157_v25  ;;  %v993_v59 = vld [vmem:[#allocation8 + $0x298] sm:$0xff] }
 0x36a   :  { %v997_v60 = vld [vmem:[#allocation8 + $0x2b8] sm:$0xff] }
 0x36b   :  { %2739 = vmatpush1.bf16.msra.mxu0 %v5651_v38  ;;  %v5723_v38 = vcombine.low %v1025_v22, %v1029_v23  ;;  %v1121_v61 = vld [vmem:[#allocation8 + $0x698] sm:$0xff] }
 0x36c   :  { %2780 = vmatpush1.bf16.msra.mxu1 %v5779_v39  ;;  %2740 = vmatprep.subr.bf16.mxu0 %v5644_v40  ;;  %v5851_v39 = vcombine.low %v1153_v24, %v1157_v25  ;;  %v5716_v40 = vcombine.high %v1017_v30, %v1021_v31  ;;  %v1125_v62 = vld [vmem:[#allocation8 + $0x6b8] sm:$0xff]  ;;  %v6437_v24 = vld [vmem:[#allocation10 + $0xe4] ss:$16 sps:$4 sm:$0xff]  }
 0x36d   :  { %2781 = vmatprep.subr.bf16.mxu1 %v5772_v34  ;;  %v5844_v34 = vcombine.high %v1145_v32, %v1149_v33  ;;  %v985_v4 = vld [vmem:[#allocation8 + $0x258] sm:$0xff]  ;;  %v6449_v25 = vld [vmem:[#allocation10 + $0x2e4] ss:$16 sps:$4 sm:$0xff]  }
 0x36e   :  { %v989_v5 = vld [vmem:[#allocation8 + $0x278] sm:$0xff] }
 0x36f   :  { %2741 = vmatpush1.bf16.msra.mxu0 %v5643_v35  ;;  %v5715_v35 = vcombine.low %v1017_v30, %v1021_v31  ;;  %v1113_v6 = vld [vmem:[#allocation8 + $0x658] sm:$0xff]  ;;  %v6455_v31 = vld [vmem:[#allocation10 + $0x2c4] ss:$16 sps:$4 sm:$0xff]  }
 0x370   :  { %2782 = vmatpush1.bf16.msra.mxu1 %v5771_v45  ;;  %2742 = vmatprep.subr.bf16.mxu0 %v5636_v48  ;;  %v5843_v45 = vcombine.low %v1145_v32, %v1149_v33  ;;  %v5708_v48 = vcombine.high %v1009_v41, %v1013_v42  ;;  %v1117_v8 = vld [vmem:[#allocation8 + $0x678] sm:$0xff] }
 0x371   :  { %2783 = vmatprep.subr.bf16.mxu1 %v5764_v50  ;;  %v5836_v50 = vcombine.high %v1137_v43, %v1141_v44  ;;  %v977_v14 = vld [vmem:[#allocation8 + $0x218] sm:$0xff] }
 0x372   :  { %v981_v15 = vld [vmem:[#allocation8 + $0x238] sm:$0xff] }
 0x373   :  { %2743 = vmatpush1.bf16.msra.mxu0 %v5635_v55  ;;  %v5707_v55 = vcombine.low %v1009_v41, %v1013_v42  ;;  %v1105_v16 = vld [vmem:[#allocation8 + $0x618] sm:$0xff]  ;;  %v5675_v22 = vcombine.low %v977_v14, %v981_v15  ;;  %v6453_v41 = vld [vmem:[#allocation10 + $0x2c0] ss:$16 sps:$4 sm:$0xff]  }
 0x374   :  { %2784 = vmatpush1.bf16.msra.mxu1 %v5763_v56  ;;  %2744 = vmatprep.subr.bf16.mxu0 %v5628_v57  ;;  %v5835_v56 = vcombine.low %v1137_v43, %v1141_v44  ;;  %v5700_v57 = vcombine.high %v1001_v51, %v1005_v52  ;;  %v1109_v17 = vld [vmem:[#allocation8 + $0x638] sm:$0xff]  ;;  %v6461_v43 = vld [vmem:[#allocation10 + $0x2a4] ss:$16 sps:$4 sm:$0xff]  }
 0x375   :  { %2785 = vmatprep.subr.bf16.mxu1 %v5756_v58  ;;  %v5828_v58 = vcombine.high %v1129_v53, %v1133_v54  ;;  %v5803_v23 = vcombine.low %v1105_v16, %v1109_v17 }
 0x377   :  { %2745 = vmatpush1.bf16.msra.mxu0 %v5627_v63  ;;  %v5699_v63 = vcombine.low %v1001_v51, %v1005_v52  ;;  %v6459_v51 = vld [vmem:[#allocation10 + $0x2a0] ss:$16 sps:$4 sm:$0xff]  }
 0x378   :  { %2786 = vmatpush1.bf16.msra.mxu1 %v5755_v1  ;;  %2746 = vmatprep.subr.bf16.mxu0 %v5620_v2  ;;  %v5827_v1 = vcombine.low %v1129_v53, %v1133_v54  ;;  %v5692_v2 = vcombine.high %v993_v59, %v997_v60  ;;  %v6467_v53 = vld [vmem:[#allocation10 + $0x284] ss:$16 sps:$4 sm:$0xff]  }
 0x379   :  { %2787 = vmatprep.subr.bf16.mxu1 %v5748_v3  ;;  %v5820_v3 = vcombine.high %v1121_v61, %v1125_v62 }
 0x37b   :  { %2747 = vmatpush1.bf16.msra.mxu0 %v5619_v10  ;;  %v5691_v10 = vcombine.low %v993_v59, %v997_v60  ;;  %v6450_v59 = vld [vmem:[#allocation10 + $0x60] ss:$16 sps:$4 sm:$0xff]   ;;  %v6458_v60 = vld [vmem:[#allocation10 + $0x44] ss:$16 sps:$4 sm:$0xff]  }
 0x37c   :  { %2788 = vmatpush1.bf16.msra.mxu1 %v5747_v11  ;;  %2748 = vmatprep.subr.bf16.mxu0 %v5612_v12  ;;  %v5819_v11 = vcombine.low %v1121_v61, %v1125_v62  ;;  %v5684_v12 = vcombine.high %v985_v4, %v989_v5  ;;  %v6471_v61 = vld [vmem:[#allocation10 + $0x260] ss:$16 sps:$4 sm:$0xff]   ;;  %v6479_v62 = vld [vmem:[#allocation10 + $0x244] ss:$16 sps:$4 sm:$0xff]  }
 0x37d   :  { %2789 = vmatprep.subr.bf16.mxu1 %v5740_v13  ;;  %v5812_v13 = vcombine.high %v1113_v6, %v1117_v8 }
 0x37f   :  { %2749 = vmatpush1.bf16.msra.mxu0 %v5611_v18  ;;  %v5683_v18 = vcombine.low %v985_v4, %v989_v5  ;;  %v6462_v4 = vld [vmem:[#allocation10 + $0x20] ss:$16 sps:$4 sm:$0xff]   ;;  %v6470_v5 = vld [vmem:[#allocation10 + $0x4] ss:$16 sps:$4 sm:$0xff]  }
 0x380   :  { %2790 = vmatpush1.bf16.msra.mxu1 %v5739_v19  ;;  %2750 = vmatprep.subr.bf16.mxu0 %v5732_v20  ;;  %v5811_v19 = vcombine.low %v1113_v6, %v1117_v8  ;;  %v5676_v20 = vcombine.high %v977_v14, %v981_v15  ;;  %v6483_v6 = vld [vmem:[#allocation10 + $0x220] ss:$16 sps:$4 sm:$0xff]   ;;  %v6491_v8 = vld [vmem:[#allocation10 + $0x204] ss:$16 sps:$4 sm:$0xff]  }
 0x381   :  { %2791 = vmatprep.subr.bf16.mxu1 %v5860_v21  ;;  %v5804_v21 = vcombine.high %v1105_v16, %v1109_v17  ;;  %v6474_v14 = vld [vmem:[#allocation10 + $0x1e0] ss:$16 sps:$4 sm:$0xff]   ;;  %v6482_v15 = vld [vmem:[#allocation10 + $0x1c4] ss:$16 sps:$4 sm:$0xff]  }
 0x382   :  { %v6495_v16 = vld [vmem:[#allocation10 + $0x3e0] ss:$16 sps:$4 sm:$0xff]   ;;  %v6503_v17 = vld [vmem:[#allocation10 + $0x3c4] ss:$16 sps:$4 sm:$0xff]  }
 0x383   :  { %2751 = vmatpush2.bf16.msra.mxu0 %v5731_v26  ;;  %v6435_v26 = vld [vmem:[#allocation10 + $0xe0] ss:$16 sps:$4 sm:$0xff]  }
 0x384   :  { %2792 = vmatpush2.bf16.msra.mxu1 %v5859_v27  ;;  %2752 = vmatprep.subr.bf16.mxu0 %v5724_v28  ;;  %v7312_v27 = vld [vmem:[%s7425_s9 + $0x7] sm:$0xff] }
 0x385   :  { %2793 = vmatprep.subr.bf16.mxu1 %v5852_v29  ;;  %v6440_v28 = vld [vmem:[#allocation10 + $0xc4] ss:$16 sps:$4 sm:$0xff]   ;;  %v6447_v29 = vld [vmem:[#allocation10 + $0x2e0] ss:$16 sps:$4 sm:$0xff]   ;;  %v1175_v30 = vrot.slane %v7312_v27, %v7270_v49 }
 0x387   :  { %2753 = vmatpush2.bf16.msra.mxu0 %v5723_v38  ;;  %v6438_v38 = vld [vmem:[#allocation10 + $0xc0] ss:$16 sps:$4 sm:$0xff]  }
 0x388   :  { %2794 = vmatpush2.bf16.msra.mxu1 %v5851_v39  ;;  %2754 = vmatprep.subr.bf16.mxu0 %v5716_v40 }
 0x389   :  { %2795 = vmatprep.subr.bf16.mxu1 %v5844_v34  ;;  %v6443_v34 = vld [vmem:[#allocation10 + $0xa4] ss:$16 sps:$4 sm:$0xff]  }
 0x38b   :  { %2755 = vmatpush2.bf16.msra.mxu0 %v5715_v35 }
 0x38c   :  { %2796 = vmatpush2.bf16.msra.mxu1 %v5843_v45  ;;  %2756 = vmatprep.subr.bf16.mxu0 %v5708_v48  ;;  %v6441_v45 = vld [vmem:[#allocation10 + $0xa0] ss:$16 sps:$4 sm:$0xff]  }
 0x38d   :  { %2797 = vmatprep.subr.bf16.mxu1 %v5836_v50 }
 0x38f   :  { %2757 = vmatpush2.bf16.msra.mxu0 %v5707_v55  ;;  %v6444_v55 = vld [vmem:[#allocation10 + $0x80] ss:$16 sps:$4 sm:$0xff]  }
 0x390   :  { %2798 = vmatpush2.bf16.msra.mxu1 %v5835_v56  ;;  %2758 = vmatprep.subr.bf16.mxu0 %v5700_v57  ;;  %v6452_v56 = vld [vmem:[#allocation10 + $0x64] ss:$16 sps:$4 sm:$0xff]   ;;  %v6465_v57 = vld [vmem:[#allocation10 + $0x280] ss:$16 sps:$4 sm:$0xff]  }
 0x391   :  { %2799 = vmatprep.subr.bf16.mxu1 %v5828_v58  ;;  %v6473_v58 = vld [vmem:[#allocation10 + $0x264] ss:$16 sps:$4 sm:$0xff]  }
 0x393   :  { %2759 = vmatpush2.bf16.msra.mxu0 %v5699_v63  ;;  %v6456_v63 = vld [vmem:[#allocation10 + $0x40] ss:$16 sps:$4 sm:$0xff]  }
 0x394   :  { %2800 = vmatpush2.bf16.msra.mxu1 %v5827_v1  ;;  %2760 = vmatprep.subr.bf16.mxu0 %v5692_v2  ;;  %v6464_v1 = vld [vmem:[#allocation10 + $0x24] ss:$16 sps:$4 sm:$0xff]   ;;  %v6477_v2 = vld [vmem:[#allocation10 + $0x240] ss:$16 sps:$4 sm:$0xff]  }
 0x395   :  { %2801 = vmatprep.subr.bf16.mxu1 %v5820_v3  ;;  %v6485_v3 = vld [vmem:[#allocation10 + $0x224] ss:$16 sps:$4 sm:$0xff]  }
 0x397   :  { %2761 = vmatpush2.bf16.msra.mxu0 %v5691_v10  ;;  %v6468_v10 = vld [vmem:[#allocation10] ss:$16 sps:$4 sm:$0xff]  }
 0x398   :  { %2802 = vmatpush2.bf16.msra.mxu1 %v5819_v11  ;;  %2762 = vmatprep.subr.bf16.mxu0 %v5684_v12  ;;  %v6476_v11 = vld [vmem:[#allocation10 + $0x1e4] ss:$16 sps:$4 sm:$0xff]   ;;  %v6489_v12 = vld [vmem:[#allocation10 + $0x200] ss:$16 sps:$4 sm:$0xff]  }
 0x399   :  { %2803 = vmatprep.subr.bf16.mxu1 %v5812_v13  ;;  %v6497_v13 = vld [vmem:[#allocation10 + $0x3e4] ss:$16 sps:$4 sm:$0xff]  }
 0x39b   :  { %2763 = vmatpush2.bf16.msra.mxu0 %v5683_v18  ;;  %v6480_v18 = vld [vmem:[#allocation10 + $0x1c0] ss:$16 sps:$4 sm:$0xff]  }
 0x39c   :  { %2804 = vmatpush2.bf16.msra.mxu1 %v5811_v19  ;;  %2764 = vmatprep.subr.bf16.mxu0 %v5676_v20  ;;  %v6488_v19 = vld [vmem:[#allocation10 + $0x1a4] ss:$16 sps:$4 sm:$0xff]   ;;  %v6501_v20 = vld [vmem:[#allocation10 + $0x3c0] ss:$16 sps:$4 sm:$0xff]  }
 0x39d   :  { %2805 = vmatprep.subr.bf16.mxu1 %v5804_v21  ;;  %v6509_v21 = vld [vmem:[#allocation10 + $0x3a4] ss:$16 sps:$4 sm:$0xff]  }
 0x39f   :  { %2765 = vmatpush2.bf16.msra.mxu0 %v5675_v22  ;;  %v6486_v22 = vld [vmem:[#allocation10 + $0x1a0] ss:$16 sps:$4 sm:$0xff]  }
 0x3a0   :  { %2806 = vmatpush2.bf16.msra.mxu1 %v5803_v23  ;;  %4390 = vmatprep.subr.bf16.mxu0 %v6437_v24  ;;  %v6494_v23 = vld [vmem:[#allocation10 + $0x184] ss:$16 sps:$4 sm:$0xff]   ;;  %v6507_v24 = vld [vmem:[#allocation10 + $0x3a0] ss:$16 sps:$4 sm:$0xff]  }
 0x3a1   :  { %4431 = vmatprep.subr.bf16.mxu1 %v6449_v25  ;;  %v6515_v25 = vld [vmem:[#allocation10 + $0x384] ss:$16 sps:$4 sm:$0xff]  }
 0x3a2   :  { %2767 = vmatmul.mubr.bf16.vlgmr.msra.gmra.mxu0 %v7291_v36  ;;  %v7317_v32 = vpop.f32.mrf.mxu0  ;;  %v7319_v33 = vpop.f32.mrf.mxu1 }
 0x3a3   :  { %2808 = vmatmul.mubr.bf16.vlgmr.msra.gmra.mxu1 %v7293_v37  ;;  %4391 = vmatpush1.bf16.msra.mxu0 %v6435_v26  ;;  %v6446_v37 = vld [vmem:[#allocation10 + $0x84] ss:$16 sps:$4 sm:$0xff]   ;;  %v6492_v26 = vld [vmem:[#allocation10 + $0x180] ss:$16 sps:$4 sm:$0xff]  }
 0x3a4   :  { %v2524_v39 = vpop.f32.mrf.mxu0  ;;  %v2565_v40 = vpop.f32.mrf.mxu1  ;;  %4392 = vmatprep.subr.bf16.mxu0 %v6440_v28  ;;  %4432 = vmatpush1.bf16.msra.mxu1 %v6447_v29  ;;  %v6500_v28 = vld [vmem:[#allocation10 + $0x164] ss:$16 sps:$4 sm:$0xff]   ;;  %v6513_v29 = vld [vmem:[#allocation10 + $0x380] ss:$16 sps:$4 sm:$0xff]  }
 0x3a5   :  { %v2525_v42 = vadd.f32 %v2524_v39, %v1175_v30  ;;  %4433 = vmatprep.subr.bf16.mxu1 %v6455_v31  ;;  %v6521_v30 = vld [vmem:[#allocation10 + $0x364] ss:$16 sps:$4 sm:$0xff]   ;;  %v6498_v31 = vld [vmem:[#allocation10 + $0x160] ss:$16 sps:$4 sm:$0xff]  }
 0x3a6   :  { %v2526_v44 = vpop.f32.mrf.mxu0  ;;  %v2567_v35 = vpop.f32.mrf.mxu1  ;;  %v6506_v39 = vld [vmem:[#allocation10 + $0x144] ss:$16 sps:$4 sm:$0xff]  }
 0x3a7   :  { %v2566_v36 = vadd.f32 %v2565_v40, %v2525_v42  ;;  %4393 = vmatpush1.bf16.msra.mxu0 %v6438_v38  ;;  %v1171_v38 = vrot.slane %v7312_v27, %v7264_v47  ;;  %v6519_v40 = vld [vmem:[#allocation10 + $0x360] ss:$16 sps:$4 sm:$0xff]   ;;  %v6527_v35 = vld [vmem:[#allocation10 + $0x324] ss:$16 sps:$4 sm:$0xff]  }
 0x3a8   :  { %v2527_v48 = vpop.f32.mrf.mxu0  ;;  %v2568_v50 = vpop.f32.mrf.mxu1  ;;  %4394 = vmatprep.subr.bf16.mxu0 %v6443_v34  ;;  %4434 = vmatpush1.bf16.msra.mxu1 %v6453_v41  ;;  %v6524_v34 = vld [vmem:[#allocation10 + $0x344] ss:$16 sps:$4 sm:$0xff]   ;;  %v6504_v41 = vld [vmem:[#allocation10 + $0x140] ss:$16 sps:$4 sm:$0xff]  }
 0x3a9   :  { %v2817_v52 = vmax.f32 %v2566_v36, 0.0  ;;  %4435 = vmatprep.subr.bf16.mxu1 %v6461_v43  ;;  %v2523_v42 = vadd.f32 %v7317_v32, %v1171_v38  ;;  %v6512_v43 = vld [vmem:[#allocation10 + $0x124] ss:$16 sps:$4 sm:$0xff]   ;;  %v6522_v44 = vld [vmem:[#allocation10 + $0x340] ss:$16 sps:$4 sm:$0xff]  }
 0x3aa   :  { %v6510_v36 = vld [vmem:[#allocation10 + $0x120] ss:$16 sps:$4 sm:$0xff]   ;;  %v6518_v48 = vld [vmem:[#allocation10 + $0x104] ss:$16 sps:$4 sm:$0xff]  }
 0x3ab   :  { %v7322_v54 = vpack.c.bf16 %v2817_v52, %v2817_v52  ;;  %4395 = vmatpush1.bf16.msra.mxu0 %v6441_v45  ;;  %v2564_v45 = vadd.f32 %v7319_v33, %v2523_v42  ;;  %v6525_v50 = vld [vmem:[#allocation10 + $0x320] ss:$16 sps:$4 sm:$0xff]  }
 0x3ac   :  { %4396 = vmatprep.subr.bf16.mxu0 %v6446_v37  ;;  %4436 = vmatpush1.bf16.msra.mxu1 %v6459_v51  ;;  %v6530_v37 = vld [vmem:[#allocation10 + $0x304] ss:$16 sps:$4 sm:$0xff]   ;;  %v6516_v51 = vld [vmem:[#allocation10 + $0x100] ss:$16 sps:$4 sm:$0xff]  }
 0x3ad   :  { %4422 = vmatprep.mubr.bf16.mxu0 %v7322_v54  ;;  %4437 = vmatprep.subr.bf16.mxu1 %v6467_v53  ;;  %v2816_v52 = vmax.f32 %v2564_v45, 0.0  ;;  %v6528_v32 = vld [vmem:[#allocation10 + $0x300] ss:$16 sps:$4 sm:$0xff]   ;;  %v6533_v53 = vld [vmem:[#allocation10 + $0x4e4] ss:$16 sps:$4 sm:$0xff]  }
 0x3ae   :  { %v6531_v33 = vld [vmem:[#allocation10 + $0x4e0] ss:$16 sps:$4 sm:$0xff]   ;;  %v6560_v45 = vld [vmem:[#allocation10 + $0x5c4] ss:$16 sps:$4 sm:$0xff]  }
 0x3af   :  { %4397 = vmatpush1.bf16.msra.mxu0 %v6444_v55  ;;  %v6581_v55 = vld [vmem:[#allocation10 + $0x6e4] ss:$16 sps:$4 sm:$0xff]   ;;  %v6549_v38 = vld [vmem:[#allocation10 + $0x420] ss:$16 sps:$4 sm:$0xff]  }
 0x3b0   :  { %4398 = vmatprep.subr.bf16.mxu0 %v6452_v56  ;;  %4438 = vmatpush1.bf16.msra.mxu1 %v6465_v57  ;;  %v1179_v56 = vrot.slane %v7312_v27, %v7275_v7  ;;  %v7331_v57 = vpack.c.bf16 %v2816_v52, %v2816_v52  ;;  %v6603_v42 = vld [vmem:[#allocation10 + $0x660] ss:$16 sps:$4 sm:$0xff]   ;;  %v6623_v52 = vld [vmem:[#allocation10 + $0x604] ss:$16 sps:$4 sm:$0xff]  }
 0x3b1   :  { %4439 = vmatprep.subr.bf16.mxu1 %v6473_v58  ;;  %v6536_v58 = vld [vmem:[#allocation10 + $0x4c4] ss:$16 sps:$4 sm:$0xff]  }
 0x3b3   :  { %4399 = vmatpush1.bf16.msra.mxu0 %v6450_v59  ;;  %v1183_v59 = vrot.slane %v7312_v27, %v7281_v9 }
 0x3b4   :  { %4400 = vmatprep.subr.bf16.mxu0 %v6458_v60  ;;  %4440 = vmatpush1.bf16.msra.mxu1 %v6471_v61 }
 0x3b5   :  { %4441 = vmatprep.subr.bf16.mxu1 %v6479_v62 }
 0x3b7   :  { %4401 = vmatpush1.bf16.msra.mxu0 %v6456_v63  ;;  %v6534_v63 = vld [vmem:[#allocation10 + $0x4c0] ss:$16 sps:$4 sm:$0xff]  }
 0x3b8   :  { %4402 = vmatprep.subr.bf16.mxu0 %v6464_v1  ;;  %4442 = vmatpush1.bf16.msra.mxu1 %v6477_v2 }
 0x3b9   :  { %4443 = vmatprep.subr.bf16.mxu1 %v6485_v3  ;;  %v6539_v3 = vld [vmem:[#allocation10 + $0x4a4] ss:$16 sps:$4 sm:$0xff]  }
 0x3bb   :  { %4403 = vmatpush1.bf16.msra.mxu0 %v6462_v4 }
 0x3bc   :  { %4404 = vmatprep.subr.bf16.mxu0 %v6470_v5  ;;  %4444 = vmatpush1.bf16.msra.mxu1 %v6483_v6 }
 0x3bd   :  { %4445 = vmatprep.subr.bf16.mxu1 %v6491_v8 }
 0x3bf   :  { %4405 = vmatpush1.bf16.msra.mxu0 %v6468_v10 }
 0x3c0   :  { %4406 = vmatprep.subr.bf16.mxu0 %v6476_v11  ;;  %4446 = vmatpush1.bf16.msra.mxu1 %v6489_v12  ;;  %v6537_v11 = vld [vmem:[#allocation10 + $0x4a0] ss:$16 sps:$4 sm:$0xff]  }
 0x3c1   :  { %4447 = vmatprep.subr.bf16.mxu1 %v6497_v13 }
 0x3c3   :  { %4407 = vmatpush2.bf16.msra.mxu0 %v6474_v14 }
 0x3c4   :  { %4408 = vmatprep.subr.bf16.mxu0 %v6482_v15  ;;  %4448 = vmatpush2.bf16.msra.mxu1 %v6495_v16  ;;  %v6542_v15 = vld [vmem:[#allocation10 + $0x484] ss:$16 sps:$4 sm:$0xff]  }
 0x3c5   :  { %4449 = vmatprep.subr.bf16.mxu1 %v6503_v17 }
 0x3c7   :  { %4409 = vmatpush2.bf16.msra.mxu0 %v6480_v18  ;;  %v6540_v18 = vld [vmem:[#allocation10 + $0x480] ss:$16 sps:$4 sm:$0xff]  }
 0x3c8   :  { %4410 = vmatprep.subr.bf16.mxu0 %v6488_v19  ;;  %4450 = vmatpush2.bf16.msra.mxu1 %v6501_v20  ;;  %v6579_v19 = vld [vmem:[#allocation10 + $0x6e0] ss:$16 sps:$4 sm:$0xff]  }
 0x3c9   :  { %4451 = vmatprep.subr.bf16.mxu1 %v6509_v21  ;;  %v6545_v21 = vld [vmem:[#allocation10 + $0x464] ss:$16 sps:$4 sm:$0xff]  }
 0x3cb   :  { %4411 = vmatpush2.bf16.msra.mxu0 %v6486_v22  ;;  %v6587_v22 = vld [vmem:[#allocation10 + $0x6c4] ss:$16 sps:$4 sm:$0xff]  }
 0x3cc   :  { %4412 = vmatprep.subr.bf16.mxu0 %v6494_v23  ;;  %4452 = vmatpush2.bf16.msra.mxu1 %v6507_v24  ;;  %v6543_v23 = vld [vmem:[#allocation10 + $0x460] ss:$16 sps:$4 sm:$0xff]  }
 0x3cd   :  { %4453 = vmatprep.subr.bf16.mxu1 %v6515_v25  ;;  %v6585_v24 = vld [vmem:[#allocation10 + $0x6c0] ss:$16 sps:$4 sm:$0xff]   ;;  %v6548_v25 = vld [vmem:[#allocation10 + $0x444] ss:$16 sps:$4 sm:$0xff]  }
 0x3cf   :  { %4413 = vmatpush2.bf16.msra.mxu0 %v6492_v26  ;;  %v6593_v26 = vld [vmem:[#allocation10 + $0x6a4] ss:$16 sps:$4 sm:$0xff]  }
 0x3d0   :  { %4414 = vmatprep.subr.bf16.mxu0 %v6500_v28  ;;  %4454 = vmatpush2.bf16.msra.mxu1 %v6513_v29  ;;  %v6546_v28 = vld [vmem:[#allocation10 + $0x440] ss:$16 sps:$4 sm:$0xff]  }
 0x3d1   :  { %4455 = vmatprep.subr.bf16.mxu1 %v6521_v30  ;;  %v6591_v29 = vld [vmem:[#allocation10 + $0x6a0] ss:$16 sps:$4 sm:$0xff]   ;;  %v6551_v30 = vld [vmem:[#allocation10 + $0x424] ss:$16 sps:$4 sm:$0xff]  }
 0x3d3   :  { %4415 = vmatpush2.bf16.msra.mxu0 %v6498_v31  ;;  %v6599_v31 = vld [vmem:[#allocation10 + $0x684] ss:$16 sps:$4 sm:$0xff]  }
 0x3d4   :  { %4416 = vmatprep.subr.bf16.mxu0 %v6506_v39  ;;  %4456 = vmatpush2.bf16.msra.mxu1 %v6519_v40  ;;  %v6597_v39 = vld [vmem:[#allocation10 + $0x680] ss:$16 sps:$4 sm:$0xff]   ;;  %v6554_v40 = vld [vmem:[#allocation10 + $0x404] ss:$16 sps:$4 sm:$0xff]  }
 0x3d5   :  { %4457 = vmatprep.subr.bf16.mxu1 %v6524_v34  ;;  %v6605_v34 = vld [vmem:[#allocation10 + $0x664] ss:$16 sps:$4 sm:$0xff]  }
 0x3d7   :  { %4417 = vmatpush2.bf16.msra.mxu0 %v6504_v41  ;;  %v6552_v41 = vld [vmem:[#allocation10 + $0x400] ss:$16 sps:$4 sm:$0xff]  }
 0x3d8   :  { %4418 = vmatprep.subr.bf16.mxu0 %v6512_v43  ;;  %4458 = vmatpush2.bf16.msra.mxu1 %v6522_v44  ;;  %v6557_v43 = vld [vmem:[#allocation10 + $0x5e4] ss:$16 sps:$4 sm:$0xff]  }
 0x3d9   :  { %4459 = vmatprep.subr.bf16.mxu1 %v6527_v35  ;;  %v6611_v44 = vld [vmem:[#allocation10 + $0x644] ss:$16 sps:$4 sm:$0xff]   ;;  %v6555_v35 = vld [vmem:[#allocation10 + $0x5e0] ss:$16 sps:$4 sm:$0xff]  }
 0x3db   :  { %4419 = vmatpush2.bf16.msra.mxu0 %v6510_v36  ;;  %v6609_v36 = vld [vmem:[#allocation10 + $0x640] ss:$16 sps:$4 sm:$0xff]  }
 0x3dc   :  { %4420 = vmatprep.subr.bf16.mxu0 %v6518_v48  ;;  %4460 = vmatpush2.bf16.msra.mxu1 %v6525_v50  ;;  %v6617_v48 = vld [vmem:[#allocation10 + $0x624] ss:$16 sps:$4 sm:$0xff]   ;;  %v6558_v50 = vld [vmem:[#allocation10 + $0x5c0] ss:$16 sps:$4 sm:$0xff]  }
 0x3dd   :  { %4461 = vmatprep.subr.bf16.mxu1 %v6530_v37  ;;  %v6615_v37 = vld [vmem:[#allocation10 + $0x620] ss:$16 sps:$4 sm:$0xff]  }
 0x3df   :  { %4421 = vmatpush2.bf16.msra.mxu0 %v6516_v51  ;;  %v6563_v51 = vld [vmem:[#allocation10 + $0x5a4] ss:$16 sps:$4 sm:$0xff]  }
 0x3e0   :  { %4462 = vmatpush2.bf16.msra.mxu1 %v6528_v32  ;;  %4472 = vmatprep.subr.bf16.mxu0 %v6533_v53  ;;  %v6561_v32 = vld [vmem:[#allocation10 + $0x5a0] ss:$16 sps:$4 sm:$0xff]  }
 0x3e1   :  { %4513 = vmatprep.subr.bf16.mxu1 %v6581_v55  ;;  %v6621_v53 = vld [vmem:[#allocation10 + $0x600] ss:$16 sps:$4 sm:$0xff]   ;;  %v6566_v55 = vld [vmem:[#allocation10 + $0x584] ss:$16 sps:$4 sm:$0xff]  }
 0x3e2   :  { %v2604_v60 = vpop.f32.mrf.mxu0  ;;  %v2645_v61 = vpop.f32.mrf.mxu1  ;;  %4423 = vmatmul.mubr.bf16.vlgmr.msra.gmra.mxu0 %v7331_v57 }
 0x3e3   :  { %v2605_v62 = vadd.f32 %v2604_v60, %v1179_v56  ;;  %4473 = vmatpush1.bf16.msra.mxu0 %v6531_v33  ;;  %v6629_v56 = vld [vmem:[#allocation10 + $0x7e4] ss:$16 sps:$4 sm:$0xff]   ;;  %v6564_v33 = vld [vmem:[#allocation10 + $0x580] ss:$16 sps:$4 sm:$0xff]  }
 0x3e4   :  { %v2606_v1 = vpop.f32.mrf.mxu0  ;;  %v2647_v2 = vpop.f32.mrf.mxu1  ;;  %4474 = vmatprep.subr.bf16.mxu0 %v6536_v58  ;;  %v6627_v58 = vld [vmem:[#allocation10 + $0x7e0] ss:$16 sps:$4 sm:$0xff]   ;;  %v6635_v60 = vld [vmem:[#allocation10 + $0x7c4] ss:$16 sps:$4 sm:$0xff]  }
 0x3e5   :  { %v2646_v4 = vadd.f32 %v2645_v61, %v2605_v62  ;;  %v2607_v5 = vadd.f32 %v2606_v1, %v1183_v59  ;;  %v6569_v59 = vld [vmem:[#allocation10 + $0x564] ss:$16 sps:$4 sm:$0xff]   ;;  %v6567_v61 = vld [vmem:[#allocation10 + $0x560] ss:$16 sps:$4 sm:$0xff]  }
 0x3e6   :  { %v2608_v6 = vpop.f32.mrf.mxu0  ;;  %v2649_v8 = vpop.f32.mrf.mxu1  ;;  %v6633_v62 = vld [vmem:[#allocation10 + $0x7c0] ss:$16 sps:$4 sm:$0xff]   ;;  %v6641_v1 = vld [vmem:[#allocation10 + $0x7a4] ss:$16 sps:$4 sm:$0xff]  }
 0x3e7   :  { %v2648_v10 = vadd.f32 %v2647_v2, %v2607_v5  ;;  %4475 = vmatpush1.bf16.msra.mxu0 %v6534_v63  ;;  %v2818_v12 = vmax.f32 %v2646_v4, 0.0  ;;  %v6572_v63 = vld [vmem:[#allocation10 + $0x544] ss:$16 sps:$4 sm:$0xff]   ;;  %v6570_v2 = vld [vmem:[#allocation10 + $0x540] ss:$16 sps:$4 sm:$0xff]  }
 0x3e8   :  { %v2609_v13 = vpop.f32.mrf.mxu0  ;;  %v2650_v14 = vpop.f32.mrf.mxu1  ;;  %4476 = vmatprep.subr.bf16.mxu0 %v6539_v3  ;;  %v6639_v3 = vld [vmem:[#allocation10 + $0x7a0] ss:$16 sps:$4 sm:$0xff]   ;;  %v6575_v4 = vld [vmem:[#allocation10 + $0x524] ss:$16 sps:$4 sm:$0xff]  }
 0x3e9   :  { %v2819_v16 = vmax.f32 %v2648_v10, 0.0  ;;  %v7338_v20 = vpack.c.bf16 %v2818_v12, %v2818_v12  ;;  %v6647_v5 = vld [vmem:[#allocation10 + $0x784] ss:$16 sps:$4 sm:$0xff]   ;;  %v6573_v6 = vld [vmem:[#allocation10 + $0x520] ss:$16 sps:$4 sm:$0xff]   ;;  %v1186_v12 = vsub.s32 4, %v7261_v46 }
 0x3ea   :  { %v6645_v8 = vld [vmem:[#allocation10 + $0x780] ss:$16 sps:$4 sm:$0xff]   ;;  %v6578_v10 = vld [vmem:[#allocation10 + $0x504] ss:$16 sps:$4 sm:$0xff]  }
 0x3eb   :  { %v7336_v17 = vpack.c.bf16 %v2819_v16, %v2819_v16  ;;  %4477 = vmatpush1.bf16.msra.mxu0 %v6537_v11  ;;  %v6653_v11 = vld [vmem:[#allocation10 + $0x764] ss:$16 sps:$4 sm:$0xff]   ;;  %v6576_v13 = vld [vmem:[#allocation10 + $0x500] ss:$16 sps:$4 sm:$0xff]  }
 0x3ec   :  { %4478 = vmatprep.subr.bf16.mxu0 %v6542_v15  ;;  %v6651_v14 = vld [vmem:[#allocation10 + $0x760] ss:$16 sps:$4 sm:$0xff]   ;;  %v6584_v15 = vld [vmem:[#allocation10 + $0xec] ss:$16 sps:$4 sm:$0xff]   ;;  %v6659_v16 = vld [vmem:[#allocation10 + $0x744] ss:$16 sps:$4 sm:$0xff]  }
 0x3ed   :  { %4463 = vmatprep.mubr.bf16.mxu1 %v7336_v17 }
 0x3ee   :  { %4464 = vmatmul.mubr.bf16.vlgmr.msra.gmra.mxu1 %v7338_v20 }
 0x3ef   :  { %4479 = vmatpush1.bf16.msra.mxu0 %v6540_v18  ;;  %4514 = vmatpush1.bf16.msra.mxu1 %v6579_v19  ;;  %v1190_v18 = vsub.s32 5, %v7261_v46  ;;  %v1187_v19 = vrot.slane %v7312_v27, %v1186_v12  ;;  %v6654_v12 = vld [vmem:[#allocation10 + $0x168] ss:$16 sps:$4 sm:$0xff]  }
 0x3f0   :  { %4480 = vmatprep.subr.bf16.mxu0 %v6545_v21  ;;  %4515 = vmatprep.subr.bf16.mxu1 %v6587_v22  ;;  %v6657_v21 = vld [vmem:[#allocation10 + $0x740] ss:$16 sps:$4 sm:$0xff]   ;;  %v6665_v22 = vld [vmem:[#allocation10 + $0x724] ss:$16 sps:$4 sm:$0xff]  }
 0x3f3   :  { %4481 = vmatpush1.bf16.msra.mxu0 %v6543_v23  ;;  %4516 = vmatpush1.bf16.msra.mxu1 %v6585_v24  ;;  %v1191_v23 = vrot.slane %v7312_v27, %v1190_v18 }
 0x3f4   :  { %4482 = vmatprep.subr.bf16.mxu0 %v6548_v25  ;;  %4517 = vmatprep.subr.bf16.mxu1 %v6593_v26 }
 0x3f7   :  { %4483 = vmatpush1.bf16.msra.mxu0 %v6546_v28  ;;  %4518 = vmatpush1.bf16.msra.mxu1 %v6591_v29  ;;  %v6663_v28 = vld [vmem:[#allocation10 + $0x720] ss:$16 sps:$4 sm:$0xff]  }
 0x3f8   :  { %4484 = vmatprep.subr.bf16.mxu0 %v6551_v30  ;;  %4519 = vmatprep.subr.bf16.mxu1 %v6599_v31  ;;  %v6671_v30 = vld [vmem:[#allocation10 + $0x704] ss:$16 sps:$4 sm:$0xff]  }
 0x3fb   :  { %4485 = vmatpush1.bf16.msra.mxu0 %v6549_v38  ;;  %4520 = vmatpush1.bf16.msra.mxu1 %v6597_v39 }
 0x3fc   :  { %4486 = vmatprep.subr.bf16.mxu0 %v6554_v40  ;;  %4521 = vmatprep.subr.bf16.mxu1 %v6605_v34 }
 0x3ff   :  { %4487 = vmatpush1.bf16.msra.mxu0 %v6552_v41  ;;  %4522 = vmatpush1.bf16.msra.mxu1 %v6603_v42  ;;  %v6669_v42 = vld [vmem:[#allocation10 + $0x700] ss:$16 sps:$4 sm:$0xff]  }
 0x400   :  { %4488 = vmatprep.subr.bf16.mxu0 %v6557_v43  ;;  %4523 = vmatprep.subr.bf16.mxu1 %v6611_v44 }
 0x403   :  { %4489 = vmatpush2.bf16.msra.mxu0 %v6555_v35  ;;  %4524 = vmatpush1.bf16.msra.mxu1 %v6609_v36  ;;  %v6677_v35 = vld [vmem:[#allocation10 + $0x2ec] ss:$16 sps:$4 sm:$0xff]  }
 0x404   :  { %4490 = vmatprep.subr.bf16.mxu0 %v6560_v45  ;;  %4525 = vmatprep.subr.bf16.mxu1 %v6617_v48 }
 0x407   :  { %4491 = vmatpush2.bf16.msra.mxu0 %v6558_v50  ;;  %4526 = vmatpush1.bf16.msra.mxu1 %v6615_v37  ;;  %v6582_v50 = vld [vmem:[#allocation10 + $0xe8] ss:$16 sps:$4 sm:$0xff]  }
 0x408   :  { %4492 = vmatprep.subr.bf16.mxu0 %v6563_v51  ;;  %4527 = vmatprep.subr.bf16.mxu1 %v6623_v52  ;;  %v6590_v51 = vld [vmem:[#allocation10 + $0xcc] ss:$16 sps:$4 sm:$0xff]   ;;  %v6588_v52 = vld [vmem:[#allocation10 + $0xc8] ss:$16 sps:$4 sm:$0xff]  }
 0x40b   :  { %4493 = vmatpush2.bf16.msra.mxu0 %v6561_v32  ;;  %4528 = vmatpush1.bf16.msra.mxu1 %v6621_v53  ;;  %v6596_v32 = vld [vmem:[#allocation10 + $0xac] ss:$16 sps:$4 sm:$0xff]   ;;  %v6594_v53 = vld [vmem:[#allocation10 + $0xa8] ss:$16 sps:$4 sm:$0xff]  }
 0x40c   :  { %4494 = vmatprep.subr.bf16.mxu0 %v6566_v55  ;;  %4529 = vmatprep.subr.bf16.mxu1 %v6629_v56  ;;  %v6602_v55 = vld [vmem:[#allocation10 + $0x8c] ss:$16 sps:$4 sm:$0xff]   ;;  %v6600_v56 = vld [vmem:[#allocation10 + $0x88] ss:$16 sps:$4 sm:$0xff]  }
 0x40f   :  { %4495 = vmatpush2.bf16.msra.mxu0 %v6564_v33  ;;  %4530 = vmatpush2.bf16.msra.mxu1 %v6627_v58  ;;  %v6608_v33 = vld [vmem:[#allocation10 + $0x6c] ss:$16 sps:$4 sm:$0xff]   ;;  %v6606_v58 = vld [vmem:[#allocation10 + $0x68] ss:$16 sps:$4 sm:$0xff]  }
 0x410   :  { %4496 = vmatprep.subr.bf16.mxu0 %v6569_v59  ;;  %4531 = vmatprep.subr.bf16.mxu1 %v6635_v60  ;;  %v6614_v59 = vld [vmem:[#allocation10 + $0x4c] ss:$16 sps:$4 sm:$0xff]   ;;  %v6612_v60 = vld [vmem:[#allocation10 + $0x48] ss:$16 sps:$4 sm:$0xff]  }
 0x413   :  { %4497 = vmatpush2.bf16.msra.mxu0 %v6567_v61  ;;  %4532 = vmatpush2.bf16.msra.mxu1 %v6633_v62  ;;  %v6620_v61 = vld [vmem:[#allocation10 + $0x2c] ss:$16 sps:$4 sm:$0xff]  }
 0x414   :  { %4498 = vmatprep.subr.bf16.mxu0 %v6572_v63  ;;  %4533 = vmatprep.subr.bf16.mxu1 %v6641_v1  ;;  %v6626_v62 = vld [vmem:[#allocation10 + $0xc] ss:$16 sps:$4 sm:$0xff]   ;;  %v6624_v63 = vld [vmem:[#allocation10 + $0x8] ss:$16 sps:$4 sm:$0xff]  }
 0x415   :  { %v6632_v1 = vld [vmem:[#allocation10 + $0x1ec] ss:$16 sps:$4 sm:$0xff]  }
 0x417   :  { %4499 = vmatpush2.bf16.msra.mxu0 %v6570_v2  ;;  %4534 = vmatpush2.bf16.msra.mxu1 %v6639_v3  ;;  %v6630_v2 = vld [vmem:[#allocation10 + $0x1e8] ss:$16 sps:$4 sm:$0xff]   ;;  %v6638_v3 = vld [vmem:[#allocation10 + $0x1cc] ss:$16 sps:$4 sm:$0xff]  }
 0x418   :  { %4500 = vmatprep.subr.bf16.mxu0 %v6575_v4  ;;  %4535 = vmatprep.subr.bf16.mxu1 %v6647_v5  ;;  %v6636_v4 = vld [vmem:[#allocation10 + $0x1c8] ss:$16 sps:$4 sm:$0xff]   ;;  %v6644_v5 = vld [vmem:[#allocation10 + $0x1ac] ss:$16 sps:$4 sm:$0xff]  }
 0x41b   :  { %4501 = vmatpush2.bf16.msra.mxu0 %v6573_v6  ;;  %4536 = vmatpush2.bf16.msra.mxu1 %v6645_v8  ;;  %v6642_v6 = vld [vmem:[#allocation10 + $0x1a8] ss:$16 sps:$4 sm:$0xff]   ;;  %v6650_v8 = vld [vmem:[#allocation10 + $0x18c] ss:$16 sps:$4 sm:$0xff]  }
 0x41c   :  { %4502 = vmatprep.subr.bf16.mxu0 %v6578_v10  ;;  %4537 = vmatprep.subr.bf16.mxu1 %v6653_v11  ;;  %v6648_v10 = vld [vmem:[#allocation10 + $0x188] ss:$16 sps:$4 sm:$0xff]   ;;  %v6656_v11 = vld [vmem:[#allocation10 + $0x16c] ss:$16 sps:$4 sm:$0xff]  }
 0x41f   :  { %4503 = vmatpush2.bf16.msra.mxu0 %v6576_v13  ;;  %4538 = vmatpush2.bf16.msra.mxu1 %v6651_v14  ;;  %v1194_v13 = vsub.s32 6, %v7261_v46  ;;  %v6662_v14 = vld [vmem:[#allocation10 + $0x14c] ss:$16 sps:$4 sm:$0xff]  }
 0x420   :  { %4554 = vmatprep.subr.bf16.mxu0 %v6584_v15  ;;  %4539 = vmatprep.subr.bf16.mxu1 %v6659_v16  ;;  %v1198_v15 = vsub.s32 7, %v7261_v46  ;;  %v6660_v16 = vld [vmem:[#allocation10 + $0x148] ss:$16 sps:$4 sm:$0xff]  }
 0x421   :  { %v1195_v18 = vrot.slane %v7312_v27, %v1194_v13  ;;  %v6725_v13 = vld [vmem:[#allocation10 + $0x3ec] ss:$16 sps:$4 sm:$0xff]  }
 0x422   :  { %v2686_v24 = vpop.f32.mrf.mxu0 }
 0x423   :  { %v2687_v25 = vadd.f32 %v2686_v24, %v1187_v19  ;;  %v2727_v26 = vpop.f32.mrf.mxu1  ;;  %4540 = vmatpush2.bf16.msra.mxu1 %v6657_v21  ;;  %v6668_v19 = vld [vmem:[#allocation10 + $0x12c] ss:$16 sps:$4 sm:$0xff]   ;;  %v1199_v21 = vrot.slane %v7312_v27, %v1198_v15  ;;  %v6723_v15 = vld [vmem:[#allocation10 + $0x3e8] ss:$16 sps:$4 sm:$0xff]  }
 0x424   :  { %v2688_v29 = vpop.f32.mrf.mxu0  ;;  %4541 = vmatprep.subr.bf16.mxu1 %v6665_v22  ;;  %v6680_v27 = vld [vmem:[#allocation10 + $0x4ec] ss:$16 sps:$4 sm:$0xff]  }
 0x425   :  { %v2728_v31 = vadd.f32 %v2727_v26, %v2687_v25  ;;  %v2689_v38 = vadd.f32 %v2688_v29, %v1191_v23  ;;  %v2729_v39 = vpop.f32.mrf.mxu1  ;;  %v6666_v25 = vld [vmem:[#allocation10 + $0x128] ss:$16 sps:$4 sm:$0xff]  }
 0x426   :  { %v2690_v40 = vpop.f32.mrf.mxu0 }
 0x427   :  { %v2730_v34 = vadd.f32 %v2729_v39, %v2689_v38  ;;  %v2731_v41 = vpop.f32.mrf.mxu1  ;;  %4542 = vmatpush2.bf16.msra.mxu1 %v6663_v28  ;;  %v2820_v43 = vmax.f32 %v2728_v31, 0.0  ;;  %v6674_v28 = vld [vmem:[#allocation10 + $0x10c] ss:$16 sps:$4 sm:$0xff]   ;;  %v6672_v40 = vld [vmem:[#allocation10 + $0x108] ss:$16 sps:$4 sm:$0xff]  }
 0x428   :  { %v2691_v44 = vpop.f32.mrf.mxu0  ;;  %4543 = vmatprep.subr.bf16.mxu1 %v6671_v30 }
 0x429   :  { %v2821_v36 = vmax.f32 %v2730_v34, 0.0  ;;  %v2732_v45 = vpop.f32.mrf.mxu1  ;;  %v7348_v37 = vpack.c.bf16 %v2820_v43, %v2820_v43 }
 0x42b   :  { %v7346_v48 = vpack.c.bf16 %v2821_v36, %v2821_v36  ;;  %4544 = vmatpush2.bf16.msra.mxu1 %v6669_v42  ;;  %v6678_v36 = vld [vmem:[#allocation10 + $0x4e8] ss:$16 sps:$4 sm:$0xff]  }
 0x42c   :  { %4595 = vmatprep.subr.bf16.mxu1 %v6677_v35  ;;  %v6675_v35 = vld [vmem:[#allocation10 + $0x2e8] ss:$16 sps:$4 sm:$0xff]  }
 0x42d   :  { %4504 = vmatprep.mubr.bf16.mxu0 %v7346_v48 }
 0x42e   :  { %4505 = vmatmul.mubr.bf16.vlgmr.msra.gmra.mxu0 %v7348_v37 }
 0x42f   :  { %4555 = vmatpush1.bf16.msra.mxu0 %v6582_v50  ;;  %4586 = vmatprep.mubr.bf16.mxu0 %v7322_v54  ;;  %v6618_v54 = vld [vmem:[#allocation10 + $0x28] ss:$16 sps:$4 sm:$0xff]   ;;  %v6683_v50 = vld [vmem:[#allocation10 + $0x2cc] ss:$16 sps:$4 sm:$0xff]  }
 0x430   :  { %4556 = vmatprep.subr.bf16.mxu0 %v6590_v51  ;;  %v6686_v51 = vld [vmem:[#allocation10 + $0x4cc] ss:$16 sps:$4 sm:$0xff]  }
 0x433   :  { %4557 = vmatpush1.bf16.msra.mxu0 %v6588_v52  ;;  %v6681_v52 = vld [vmem:[#allocation10 + $0x2c8] ss:$16 sps:$4 sm:$0xff]  }
 0x434   :  { %4558 = vmatprep.subr.bf16.mxu0 %v6596_v32  ;;  %v6684_v32 = vld [vmem:[#allocation10 + $0x4c8] ss:$16 sps:$4 sm:$0xff]  }
 0x437   :  { %4559 = vmatpush1.bf16.msra.mxu0 %v6594_v53  ;;  %v6689_v53 = vld [vmem:[#allocation10 + $0x2ac] ss:$16 sps:$4 sm:$0xff]  }
 0x438   :  { %4560 = vmatprep.subr.bf16.mxu0 %v6602_v55  ;;  %v6692_v55 = vld [vmem:[#allocation10 + $0x4ac] ss:$16 sps:$4 sm:$0xff]  }
 0x43b   :  { %4561 = vmatpush1.bf16.msra.mxu0 %v6600_v56  ;;  %v6687_v56 = vld [vmem:[#allocation10 + $0x2a8] ss:$16 sps:$4 sm:$0xff]  }
 0x43c   :  { %4562 = vmatprep.subr.bf16.mxu0 %v6608_v33  ;;  %v6690_v33 = vld [vmem:[#allocation10 + $0x4a8] ss:$16 sps:$4 sm:$0xff]  }
 0x43f   :  { %4563 = vmatpush1.bf16.msra.mxu0 %v6606_v58  ;;  %v6698_v58 = vld [vmem:[#allocation10 + $0x48c] ss:$16 sps:$4 sm:$0xff]  }
 0x440   :  { %4564 = vmatprep.subr.bf16.mxu0 %v6614_v59  ;;  %v6693_v59 = vld [vmem:[#allocation10 + $0x288] ss:$16 sps:$4 sm:$0xff]  }
 0x443   :  { %4565 = vmatpush1.bf16.msra.mxu0 %v6612_v60  ;;  %v6696_v60 = vld [vmem:[#allocation10 + $0x488] ss:$16 sps:$4 sm:$0xff]  }
 0x444   :  { %4566 = vmatprep.subr.bf16.mxu0 %v6620_v61  ;;  %v6699_v61 = vld [vmem:[#allocation10 + $0x268] ss:$16 sps:$4 sm:$0xff]  }
 0x447   :  { %4567 = vmatpush1.bf16.msra.mxu0 %v6618_v54  ;;  %v6702_v54 = vld [vmem:[#allocation10 + $0x468] ss:$16 sps:$4 sm:$0xff]  }
 0x448   :  { %4568 = vmatprep.subr.bf16.mxu0 %v6626_v62  ;;  %v6707_v62 = vld [vmem:[#allocation10 + $0x24c] ss:$16 sps:$4 sm:$0xff]  }
 0x44b   :  { %4569 = vmatpush1.bf16.msra.mxu0 %v6624_v63  ;;  %v6710_v63 = vld [vmem:[#allocation10 + $0x44c] ss:$16 sps:$4 sm:$0xff]  }
 0x44c   :  { %4570 = vmatprep.subr.bf16.mxu0 %v6632_v1  ;;  %v6705_v1 = vld [vmem:[#allocation10 + $0x248] ss:$16 sps:$4 sm:$0xff]  }
 0x44f   :  { %4571 = vmatpush2.bf16.msra.mxu0 %v6630_v2  ;;  %v6708_v2 = vld [vmem:[#allocation10 + $0x448] ss:$16 sps:$4 sm:$0xff]  }
 0x450   :  { %4572 = vmatprep.subr.bf16.mxu0 %v6638_v3  ;;  %v6713_v3 = vld [vmem:[#allocation10 + $0x22c] ss:$16 sps:$4 sm:$0xff]  }
 0x453   :  { %4573 = vmatpush2.bf16.msra.mxu0 %v6636_v4  ;;  %v6716_v4 = vld [vmem:[#allocation10 + $0x42c] ss:$16 sps:$4 sm:$0xff]  }
 0x454   :  { %4574 = vmatprep.subr.bf16.mxu0 %v6644_v5  ;;  %v6711_v5 = vld [vmem:[#allocation10 + $0x228] ss:$16 sps:$4 sm:$0xff]  }
 0x457   :  { %4575 = vmatpush2.bf16.msra.mxu0 %v6642_v6  ;;  %v6714_v6 = vld [vmem:[#allocation10 + $0x428] ss:$16 sps:$4 sm:$0xff]  }
 0x458   :  { %4576 = vmatprep.subr.bf16.mxu0 %v6650_v8  ;;  %v6719_v8 = vld [vmem:[#allocation10 + $0x20c] ss:$16 sps:$4 sm:$0xff]  }
 0x45b   :  { %4577 = vmatpush2.bf16.msra.mxu0 %v6648_v10  ;;  %v6722_v10 = vld [vmem:[#allocation10 + $0x40c] ss:$16 sps:$4 sm:$0xff]  }
 0x45c   :  { %4578 = vmatprep.subr.bf16.mxu0 %v6656_v11  ;;  %v6717_v11 = vld [vmem:[#allocation10 + $0x208] ss:$16 sps:$4 sm:$0xff]  }
 0x45f   :  { %4579 = vmatpush2.bf16.msra.mxu0 %v6654_v12  ;;  %v6720_v12 = vld [vmem:[#allocation10 + $0x408] ss:$16 sps:$4 sm:$0xff]  }
 0x460   :  { %4580 = vmatprep.subr.bf16.mxu0 %v6662_v14  ;;  %v6728_v14 = vld [vmem:[#allocation10 + $0x5ec] ss:$16 sps:$4 sm:$0xff]  }
 0x462   :  { %v2768_v22 = vpop.f32.mrf.mxu0 }
 0x463   :  { %v2769_v23 = vadd.f32 %v2768_v22, %v1195_v18  ;;  %v2809_v24 = vpop.f32.mrf.mxu1  ;;  %4581 = vmatpush2.bf16.msra.mxu0 %v6660_v16  ;;  %v6726_v16 = vld [vmem:[#allocation10 + $0x5e8] ss:$16 sps:$4 sm:$0xff]   ;;  %v6731_v18 = vld [vmem:[#allocation10 + $0x3cc] ss:$16 sps:$4 sm:$0xff]  }
 0x464   :  { %v2770_v26 = vpop.f32.mrf.mxu0  ;;  %4582 = vmatprep.subr.bf16.mxu0 %v6668_v19  ;;  %v6734_v19 = vld [vmem:[#allocation10 + $0x5cc] ss:$16 sps:$4 sm:$0xff]   ;;  %v6732_v22 = vld [vmem:[#allocation10 + $0x5c8] ss:$16 sps:$4 sm:$0xff]  }
 0x465   :  { %v2810_v29 = vadd.f32 %v2809_v24, %v2769_v23  ;;  %v2771_v30 = vadd.f32 %v2770_v26, %v1199_v21  ;;  %v2811_v31 = vpop.f32.mrf.mxu1  ;;  %v6729_v21 = vld [vmem:[#allocation10 + $0x3c8] ss:$16 sps:$4 sm:$0xff]   ;;  %v6737_v23 = vld [vmem:[#allocation10 + $0x3ac] ss:$16 sps:$4 sm:$0xff]  }
 0x466   :  { %v2772_v46 = vpop.f32.mrf.mxu0  ;;  %v6740_v24 = vld [vmem:[#allocation10 + $0x5ac] ss:$16 sps:$4 sm:$0xff]   ;;  %v6738_v26 = vld [vmem:[#allocation10 + $0x5a8] ss:$16 sps:$4 sm:$0xff]  }
 0x467   :  { %v2812_v38 = vadd.f32 %v2811_v31, %v2771_v30  ;;  %v2813_v39 = vpop.f32.mrf.mxu1  ;;  %4583 = vmatpush2.bf16.msra.mxu0 %v6666_v25  ;;  %v2822_v34 = vmax.f32 %v2810_v29, 0.0  ;;  %v6735_v25 = vld [vmem:[#allocation10 + $0x3a8] ss:$16 sps:$4 sm:$0xff]   ;;  %v6746_v29 = vld [vmem:[#allocation10 + $0x58c] ss:$16 sps:$4 sm:$0xff]  }
 0x468   :  { %v2773_v41 = vpop.f32.mrf.mxu0  ;;  %4584 = vmatprep.subr.bf16.mxu0 %v6674_v28  ;;  %v6743_v28 = vld [vmem:[#allocation10 + $0x38c] ss:$16 sps:$4 sm:$0xff]   ;;  %v6741_v30 = vld [vmem:[#allocation10 + $0x388] ss:$16 sps:$4 sm:$0xff]  }
 0x469   :  { %v2823_v42 = vmax.f32 %v2812_v38, 0.0  ;;  %v2814_v43 = vpop.f32.mrf.mxu1  ;;  %v7359_v45 = vpack.c.bf16 %v2822_v34, %v2822_v34  ;;  %v6744_v31 = vld [vmem:[#allocation10 + $0x588] ss:$16 sps:$4 sm:$0xff]   ;;  %v6749_v46 = vld [vmem:[#allocation10 + $0x36c] ss:$16 sps:$4 sm:$0xff]  }
 0x46a   :  { %v6752_v38 = vld [vmem:[#allocation10 + $0x56c] ss:$16 sps:$4 sm:$0xff]   ;;  %v6747_v39 = vld [vmem:[#allocation10 + $0x368] ss:$16 sps:$4 sm:$0xff]  }
 0x46b   :  { %v7357_v44 = vpack.c.bf16 %v2823_v42, %v2823_v42  ;;  %4585 = vmatpush2.bf16.msra.mxu0 %v6672_v40  ;;  %v6750_v40 = vld [vmem:[#allocation10 + $0x568] ss:$16 sps:$4 sm:$0xff]   ;;  %v6755_v34 = vld [vmem:[#allocation10 + $0x34c] ss:$16 sps:$4 sm:$0xff]  }
 0x46c   :  { %4636 = vmatprep.subr.bf16.mxu0 %v6680_v27  ;;  %v6758_v41 = vld [vmem:[#allocation10 + $0x54c] ss:$16 sps:$4 sm:$0xff]   ;;  %v6753_v27 = vld [vmem:[#allocation10 + $0x348] ss:$16 sps:$4 sm:$0xff]  }
 0x46d   :  { %4545 = vmatprep.mubr.bf16.mxu1 %v7357_v44  ;;  %v6756_v42 = vld [vmem:[#allocation10 + $0x548] ss:$16 sps:$4 sm:$0xff]   ;;  %v6761_v43 = vld [vmem:[#allocation10 + $0x32c] ss:$16 sps:$4 sm:$0xff]  }
 0x46e   :  { %4587 = vmatmul.mubr.bf16.vlgmr.msra.gmra.mxu0 %v7331_v57  ;;  %4546 = vmatmul.mubr.bf16.vlgmr.msra.gmra.mxu1 %v7359_v45  ;;  %v6695_v57 = vld [vmem:[#allocation10 + $0x28c] ss:$16 sps:$4 sm:$0xff]  }
 0x46f   :  { %4596 = vmatpush1.bf16.msra.mxu1 %v6675_v35  ;;  %4637 = vmatpush1.bf16.msra.mxu0 %v6678_v36  ;;  %v6764_v35 = vld [vmem:[#allocation10 + $0x52c] ss:$16 sps:$4 sm:$0xff]  }
 0x470   :  { %4668 = vmatprep.mubr.bf16.mxu0 %v7346_v48  ;;  %4627 = vmatprep.mubr.bf16.mxu1 %v7336_v17  ;;  %v6701_v48 = vld [vmem:[#allocation10 + $0x26c] ss:$16 sps:$4 sm:$0xff]  }
 0x471   :  { %4597 = vmatprep.subr.bf16.mxu1 %v6683_v50  ;;  %4638 = vmatprep.subr.bf16.mxu0 %v6686_v51  ;;  %v6704_v17 = vld [vmem:[#allocation10 + $0x46c] ss:$16 sps:$4 sm:$0xff]   ;;  %v6759_v50 = vld [vmem:[#allocation10 + $0x328] ss:$16 sps:$4 sm:$0xff]  }
 0x472   :  { %v6762_v51 = vld [vmem:[#allocation10 + $0x528] ss:$16 sps:$4 sm:$0xff]  }
 0x473   :  { %4598 = vmatpush1.bf16.msra.mxu1 %v6681_v52  ;;  %4639 = vmatpush1.bf16.msra.mxu0 %v6684_v32  ;;  %v6767_v32 = vld [vmem:[#allocation10 + $0x30c] ss:$16 sps:$4 sm:$0xff]  }
 0x474   :  { %4599 = vmatprep.subr.bf16.mxu1 %v6689_v53  ;;  %4640 = vmatprep.subr.bf16.mxu0 %v6692_v55  ;;  %v6770_v53 = vld [vmem:[#allocation10 + $0x50c] ss:$16 sps:$4 sm:$0xff]   ;;  %v7369_v55 = vld [vmem:[%s7425_s9 + $0xf] sm:$0xf] }
 0x477   :  { %4600 = vmatpush1.bf16.msra.mxu1 %v6687_v56  ;;  %4641 = vmatpush1.bf16.msra.mxu0 %v6690_v33  ;;  %v6765_v33 = vld [vmem:[#allocation10 + $0x308] ss:$16 sps:$4 sm:$0xff]  }
 0x478   :  { %4601 = vmatprep.subr.bf16.mxu1 %v6695_v57  ;;  %4642 = vmatprep.subr.bf16.mxu0 %v6698_v58  ;;  %v6768_v57 = vld [vmem:[#allocation10 + $0x508] ss:$16 sps:$4 sm:$0xff]  }
 0x47b   :  { %4602 = vmatpush1.bf16.msra.mxu1 %v6693_v59  ;;  %4643 = vmatpush1.bf16.msra.mxu0 %v6696_v60  ;;  %v6773_v59 = vld [vmem:[#allocation10 + $0x6ec] ss:$16 sps:$4 sm:$0xff]  }
 0x47c   :  { %4603 = vmatprep.subr.bf16.mxu1 %v6701_v48  ;;  %4644 = vmatprep.subr.bf16.mxu0 %v6704_v17  ;;  %v6821_v60 = vld [vmem:[#allocation11 + $0x74] ss:$8 sps:$4 sm:$0xff]   ;;  %v3093_v48 = vrot.slane %v7369_v55, %v7264_v47  ;;  %v3097_v17 = vrot.slane %v7369_v55, %v7270_v49 }
 0x47f   :  { %4604 = vmatpush1.bf16.msra.mxu1 %v6699_v61  ;;  %4645 = vmatpush1.bf16.msra.mxu0 %v6702_v54  ;;  %v6771_v61 = vld [vmem:[#allocation10 + $0x6e8] ss:$16 sps:$4 sm:$0xff]   ;;  %v6776_v54 = vld [vmem:[#allocation10 + $0x6cc] ss:$16 sps:$4 sm:$0xff]  }
 0x480   :  { %4605 = vmatprep.subr.bf16.mxu1 %v6707_v62  ;;  %4646 = vmatprep.subr.bf16.mxu0 %v6710_v63  ;;  %v6819_v62 = vld [vmem:[#allocation11 + $0x70] ss:$8 sps:$4 sm:$0xff]  }
 0x483   :  { %4606 = vmatpush1.bf16.msra.mxu1 %v6705_v1  ;;  %4647 = vmatpush1.bf16.msra.mxu0 %v6708_v2  ;;  %v6824_v1 = vld [vmem:[#allocation11 + $0x64] ss:$8 sps:$4 sm:$0xff]  }
 0x484   :  { %4607 = vmatprep.subr.bf16.mxu1 %v6713_v3  ;;  %4648 = vmatprep.subr.bf16.mxu0 %v6716_v4 }
 0x487   :  { %4608 = vmatpush1.bf16.msra.mxu1 %v6711_v5  ;;  %4649 = vmatpush1.bf16.msra.mxu0 %v6714_v6  ;;  %v6774_v5 = vld [vmem:[#allocation10 + $0x6c8] ss:$16 sps:$4 sm:$0xff]  }
 0x488   :  { %4609 = vmatprep.subr.bf16.mxu1 %v6719_v8  ;;  %4650 = vmatprep.subr.bf16.mxu0 %v6722_v10  ;;  %v6779_v8 = vld [vmem:[#allocation10 + $0x6ac] ss:$16 sps:$4 sm:$0xff]   ;;  %v6822_v10 = vld [vmem:[#allocation11 + $0x60] ss:$8 sps:$4 sm:$0xff]  }
 0x48b   :  { %4610 = vmatpush1.bf16.msra.mxu1 %v6717_v11  ;;  %4651 = vmatpush1.bf16.msra.mxu0 %v6720_v12  ;;  %v6827_v12 = vld [vmem:[#allocation11 + $0x54] ss:$8 sps:$4 sm:$0xff]  }
 0x48c   :  { %4611 = vmatprep.subr.bf16.mxu1 %v6725_v13  ;;  %4652 = vmatprep.subr.bf16.mxu0 %v6728_v14  ;;  %v6782_v14 = vld [vmem:[#allocation10 + $0x68c] ss:$16 sps:$4 sm:$0xff]  }
 0x48f   :  { %4612 = vmatpush2.bf16.msra.mxu1 %v6723_v15  ;;  %4653 = vmatpush2.bf16.msra.mxu0 %v6726_v16  ;;  %v6825_v15 = vld [vmem:[#allocation11 + $0x50] ss:$8 sps:$4 sm:$0xff]  }
 0x490   :  { %4613 = vmatprep.subr.bf16.mxu1 %v6731_v18  ;;  %4654 = vmatprep.subr.bf16.mxu0 %v6734_v19  ;;  %v6780_v16 = vld [vmem:[#allocation10 + $0x688] ss:$16 sps:$4 sm:$0xff]   ;;  %v6785_v18 = vld [vmem:[#allocation10 + $0x66c] ss:$16 sps:$4 sm:$0xff]  }
 0x491   :  { %v6828_v19 = vld [vmem:[#allocation11 + $0x40] ss:$8 sps:$4 sm:$0xff]  }
 0x493   :  { %4614 = vmatpush2.bf16.msra.mxu1 %v6729_v21  ;;  %4655 = vmatpush2.bf16.msra.mxu0 %v6732_v22  ;;  %v6833_v21 = vld [vmem:[#allocation11 + $0x34] ss:$8 sps:$4 sm:$0xff]   ;;  %v6783_v22 = vld [vmem:[#allocation10 + $0x668] ss:$16 sps:$4 sm:$0xff]  }
 0x494   :  { %4615 = vmatprep.subr.bf16.mxu1 %v6737_v23  ;;  %4656 = vmatprep.subr.bf16.mxu0 %v6740_v24  ;;  %v6788_v23 = vld [vmem:[#allocation10 + $0x64c] ss:$16 sps:$4 sm:$0xff]   ;;  %v6831_v24 = vld [vmem:[#allocation11 + $0x30] ss:$8 sps:$4 sm:$0xff]  }
 0x497   :  { %4616 = vmatpush2.bf16.msra.mxu1 %v6735_v25  ;;  %4657 = vmatpush2.bf16.msra.mxu0 %v6738_v26  ;;  %v6836_v25 = vld [vmem:[#allocation11 + $0x24] ss:$8 sps:$4 sm:$0xff]   ;;  %v6786_v26 = vld [vmem:[#allocation10 + $0x648] ss:$16 sps:$4 sm:$0xff]  }
 0x498   :  { %4617 = vmatprep.subr.bf16.mxu1 %v6743_v28  ;;  %4658 = vmatprep.subr.bf16.mxu0 %v6746_v29  ;;  %v6791_v28 = vld [vmem:[#allocation10 + $0x62c] ss:$16 sps:$4 sm:$0xff]   ;;  %v6834_v29 = vld [vmem:[#allocation11 + $0x20] ss:$8 sps:$4 sm:$0xff]  }
 0x49b   :  { %4618 = vmatpush2.bf16.msra.mxu1 %v6741_v30  ;;  %4659 = vmatpush2.bf16.msra.mxu0 %v6744_v31  ;;  %v6839_v30 = vld [vmem:[#allocation11 + $0x14] ss:$8 sps:$4 sm:$0xff]   ;;  %v6789_v31 = vld [vmem:[#allocation10 + $0x628] ss:$16 sps:$4 sm:$0xff]  }
 0x49c   :  { %4619 = vmatprep.subr.bf16.mxu1 %v6749_v46  ;;  %4660 = vmatprep.subr.bf16.mxu0 %v6752_v38  ;;  %v6794_v46 = vld [vmem:[#allocation10 + $0x60c] ss:$16 sps:$4 sm:$0xff]   ;;  %v6837_v38 = vld [vmem:[#allocation11 + $0x10] ss:$8 sps:$4 sm:$0xff]  }
 0x49f   :  { %4620 = vmatpush2.bf16.msra.mxu1 %v6747_v39  ;;  %4661 = vmatpush2.bf16.msra.mxu0 %v6750_v40  ;;  %v6842_v39 = vld [vmem:[#allocation11 + $0x4] ss:$8 sps:$4 sm:$0xff]   ;;  %v6792_v40 = vld [vmem:[#allocation10 + $0x608] ss:$16 sps:$4 sm:$0xff]  }
 0x4a0   :  { %4621 = vmatprep.subr.bf16.mxu1 %v6755_v34  ;;  %4662 = vmatprep.subr.bf16.mxu0 %v6758_v41  ;;  %v6797_v34 = vld [vmem:[#allocation10 + $0x7ec] ss:$16 sps:$4 sm:$0xff]   ;;  %v6840_v41 = vld [vmem:[#allocation11] ss:$8 sps:$4 sm:$0xff]  }
 0x4a2   :  { %v4424_v36 = vpop.f32.mrf.mxu0 }
 0x4a3   :  { %4622 = vmatpush2.bf16.msra.mxu1 %v6753_v27  ;;  %4663 = vmatpush2.bf16.msra.mxu0 %v6756_v42  ;;  %v4425_v63 = vadd.f32 %v4424_v36, %v3093_v48  ;;  %v6845_v27 = vld [vmem:[#allocation11 + $0xf4] ss:$8 sps:$4 sm:$0xff]   ;;  %v6795_v42 = vld [vmem:[#allocation10 + $0x7e8] ss:$16 sps:$4 sm:$0xff]   ;;  %v6848_v36 = vld [vmem:[#allocation11 + $0xe4] ss:$8 sps:$4 sm:$0xff]  }
 0x4a4   :  { %v4426_v52 = vpop.f32.mrf.mxu0  ;;  %4623 = vmatprep.subr.bf16.mxu1 %v6761_v43  ;;  %4664 = vmatprep.subr.bf16.mxu0 %v6764_v35  ;;  %v6800_v43 = vld [vmem:[#allocation10 + $0x7cc] ss:$16 sps:$4 sm:$0xff]   ;;  %v6843_v35 = vld [vmem:[#allocation11 + $0xf0] ss:$8 sps:$4 sm:$0xff]  }
 0x4a5   :  { %v4427_v3 = vadd.f32 %v4426_v52, %v3097_v17  ;;  %v6846_v52 = vld [vmem:[#allocation11 + $0xe0] ss:$8 sps:$4 sm:$0xff]   ;;  %v6857_v48 = vld [vmem:[#allocation11 + $0xb4] ss:$8 sps:$4 sm:$0xff]  }
 0x4a6   :  { %v4428_v56 = vpop.f32.mrf.mxu0  ;;  %v6807_v17 = vld [vmem:[#allocation10 + $0x768] ss:$16 sps:$4 sm:$0xff]  }
 0x4a7   :  { %4624 = vmatpush2.bf16.msra.mxu1 %v6759_v50  ;;  %4665 = vmatpush2.bf16.msra.mxu0 %v6762_v51  ;;  %v6798_v50 = vld [vmem:[#allocation10 + $0x7c8] ss:$16 sps:$4 sm:$0xff]   ;;  %v6803_v51 = vld [vmem:[#allocation10 + $0x7ac] ss:$16 sps:$4 sm:$0xff]  }
 0x4a8   :  { %v4429_v58 = vpop.f32.mrf.mxu0  ;;  %4625 = vmatprep.subr.bf16.mxu1 %v6767_v32  ;;  %4666 = vmatprep.subr.bf16.mxu0 %v6770_v53  ;;  %v6851_v32 = vld [vmem:[#allocation11 + $0xd4] ss:$8 sps:$4 sm:$0xff]   ;;  %v6801_v53 = vld [vmem:[#allocation10 + $0x7a8] ss:$16 sps:$4 sm:$0xff]  }
 0x4a9   :  { %v6806_v56 = vld [vmem:[#allocation10 + $0x78c] ss:$16 sps:$4 sm:$0xff]   ;;  %v6804_v58 = vld [vmem:[#allocation10 + $0x788] ss:$16 sps:$4 sm:$0xff]  }
 0x4ab   :  { %4626 = vmatpush2.bf16.msra.mxu1 %v6765_v33  ;;  %4667 = vmatpush2.bf16.msra.mxu0 %v6768_v57  ;;  %v6849_v33 = vld [vmem:[#allocation11 + $0xd0] ss:$8 sps:$4 sm:$0xff]   ;;  %v6854_v57 = vld [vmem:[#allocation11 + $0xc4] ss:$8 sps:$4 sm:$0xff]  }
 0x4ac   :  { %4677 = vmatprep.subr.bf16.mxu1 %v6773_v59  ;;  %5122 = vmatprep.subr.bf16.mxu0 %v6821_v60  ;;  %v6809_v59 = vld [vmem:[#allocation10 + $0x76c] ss:$16 sps:$4 sm:$0xff]   ;;  %v6852_v60 = vld [vmem:[#allocation11 + $0xc0] ss:$8 sps:$4 sm:$0xff]  }
 0x4ae   :  { %4628 = vmatmul.mubr.bf16.vlgmr.msra.gmra.mxu1 %v7338_v20  ;;  %4669 = vmatmul.mubr.bf16.vlgmr.msra.gmra.mxu0 %v7348_v37  ;;  %v4465_v2 = vpop.f32.mrf.mxu1  ;;  %v6777_v37 = vld [vmem:[#allocation10 + $0x6a8] ss:$16 sps:$4 sm:$0xff]  }
 0x4af   :  { %v7377_v4 = vadd.f32 %v4465_v2, %v4425_v63  ;;  %4678 = vmatpush1.bf16.msra.mxu1 %v6771_v61  ;;  %4709 = vmatprep.mubr.bf16.mxu1 %v7357_v44  ;;  %v6830_v44 = vld [vmem:[#allocation11 + $0x44] ss:$8 sps:$4 sm:$0xff]   ;;  %v6810_v63 = vld [vmem:[#allocation10 + $0x748] ss:$16 sps:$4 sm:$0xff]  }
 0x4b0   :  { %v4467_v6 = vpop.f32.mrf.mxu1  ;;  %4679 = vmatprep.subr.bf16.mxu1 %v6776_v54  ;;  %5123 = vmatpush1.bf16.msra.mxu0 %v6819_v62  ;;  %v6812_v61 = vld [vmem:[#allocation10 + $0x74c] ss:$16 sps:$4 sm:$0xff]   ;;  %v6855_v54 = vld [vmem:[#allocation11 + $0xb0] ss:$8 sps:$4 sm:$0xff]   ;;  %v6858_v2 = vld [vmem:[#allocation11 + $0xa0] ss:$8 sps:$4 sm:$0xff]  }
 0x4b1   :  { %v7380_v11 = vadd.f32 %v4467_v6, %v4427_v3  ;;  %5124 = vmatprep.subr.bf16.mxu0 %v6824_v1  ;;  %v6860_v62 = vld [vmem:[#allocation11 + $0xa4] ss:$8 sps:$4 sm:$0xff]   ;;  %v6863_v3 = vld [vmem:[#allocation11 + $0x94] ss:$8 sps:$4 sm:$0xff]  }
 0x4b2   :  { %v4469_v20 = vpop.f32.mrf.mxu1  ;;  %v6815_v1 = vld [vmem:[#allocation10 + $0x72c] ss:$16 sps:$4 sm:$0xff]  }
 0x4b3   :  { %4680 = vmatpush1.bf16.msra.mxu1 %v6774_v5  ;;  %v6813_v5 = vld [vmem:[#allocation10 + $0x728] ss:$16 sps:$4 sm:$0xff]   ;;  %v6818_v6 = vld [vmem:[#allocation10 + $0x70c] ss:$16 sps:$4 sm:$0xff]  }
 0x4b4   :  { %v4470_v13 = vpop.f32.mrf.mxu1  ;;  %4681 = vmatprep.subr.bf16.mxu1 %v6779_v8  ;;  %5125 = vmatpush1.bf16.msra.mxu0 %v6822_v10  ;;  %v6861_v8 = vld [vmem:[#allocation11 + $0x90] ss:$8 sps:$4 sm:$0xff]   ;;  %v6866_v10 = vld [vmem:[#allocation11 + $0x84] ss:$8 sps:$4 sm:$0xff]   ;;  %v6864_v20 = vld [vmem:[#allocation11 + $0x80] ss:$8 sps:$4 sm:$0xff]  }
 0x4b5   :  { %5126 = vmatprep.subr.bf16.mxu0 %v6827_v12  ;;  %v6816_v12 = vld [vmem:[#allocation10 + $0x708] ss:$16 sps:$4 sm:$0xff]  }
 0x4b7   :  { %4682 = vmatpush1.bf16.msra.mxu1 %v6777_v37 }
 0x4b8   :  { %4683 = vmatprep.subr.bf16.mxu1 %v6782_v14  ;;  %5127 = vmatpush1.bf16.msra.mxu0 %v6825_v15 }
 0x4b9   :  { %5128 = vmatprep.subr.bf16.mxu0 %v6830_v44 }
 0x4bb   :  { %4684 = vmatpush1.bf16.msra.mxu1 %v6780_v16  ;;  %v6867_v16 = vld [vmem:[#allocation11 + $0x170] ss:$8 sps:$4 sm:$0xff]  }
 0x4bc   :  { %4685 = vmatprep.subr.bf16.mxu1 %v6785_v18  ;;  %5129 = vmatpush1.bf16.msra.mxu0 %v6828_v19  ;;  %v6869_v18 = vld [vmem:[#allocation11 + $0x174] ss:$8 sps:$4 sm:$0xff]   ;;  %v6872_v19 = vld [vmem:[#allocation11 + $0x164] ss:$8 sps:$4 sm:$0xff]  }
 0x4bd   :  { %5130 = vmatprep.subr.bf16.mxu0 %v6833_v21  ;;  %v6870_v21 = vld [vmem:[#allocation11 + $0x160] ss:$8 sps:$4 sm:$0xff]  }
 0x4bf   :  { %4686 = vmatpush1.bf16.msra.mxu1 %v6783_v22  ;;  %v6875_v22 = vld [vmem:[#allocation11 + $0x154] ss:$8 sps:$4 sm:$0xff]  }
 0x4c0   :  { %4687 = vmatprep.subr.bf16.mxu1 %v6788_v23  ;;  %5131 = vmatpush1.bf16.msra.mxu0 %v6831_v24  ;;  %v6873_v23 = vld [vmem:[#allocation11 + $0x150] ss:$8 sps:$4 sm:$0xff]   ;;  %v6878_v24 = vld [vmem:[#allocation11 + $0x144] ss:$8 sps:$4 sm:$0xff]  }
 0x4c1   :  { %5132 = vmatprep.subr.bf16.mxu0 %v6836_v25  ;;  %v6879_v25 = vld [vmem:[#allocation11 + $0x130] ss:$8 sps:$4 sm:$0xff]  }
 0x4c3   :  { %4688 = vmatpush1.bf16.msra.mxu1 %v6786_v26  ;;  %v6884_v26 = vld [vmem:[#allocation11 + $0x124] ss:$8 sps:$4 sm:$0xff]  }
 0x4c4   :  { %4689 = vmatprep.subr.bf16.mxu1 %v6791_v28  ;;  %5133 = vmatpush1.bf16.msra.mxu0 %v6834_v29  ;;  %v6882_v28 = vld [vmem:[#allocation11 + $0x120] ss:$8 sps:$4 sm:$0xff]   ;;  %v6887_v29 = vld [vmem:[#allocation11 + $0x114] ss:$8 sps:$4 sm:$0xff]  }
 0x4c5   :  { %5134 = vmatprep.subr.bf16.mxu0 %v6839_v30  ;;  %v6885_v30 = vld [vmem:[#allocation11 + $0x110] ss:$8 sps:$4 sm:$0xff]  }
 0x4c7   :  { %4690 = vmatpush1.bf16.msra.mxu1 %v6789_v31  ;;  %v6890_v31 = vld [vmem:[#allocation11 + $0x104] ss:$8 sps:$4 sm:$0xff]  }
 0x4c8   :  { %4691 = vmatprep.subr.bf16.mxu1 %v6794_v46  ;;  %5135 = vmatpush1.bf16.msra.mxu0 %v6837_v38  ;;  %v6888_v46 = vld [vmem:[#allocation11 + $0x100] ss:$8 sps:$4 sm:$0xff]   ;;  %v6893_v38 = vld [vmem:[#allocation11 + $0x1f4] ss:$8 sps:$4 sm:$0xff]  }
 0x4c9   :  { %5136 = vmatprep.subr.bf16.mxu0 %v6842_v39  ;;  %v6891_v39 = vld [vmem:[#allocation11 + $0x1f0] ss:$8 sps:$4 sm:$0xff]  }
 0x4cb   :  { %4692 = vmatpush1.bf16.msra.mxu1 %v6792_v40  ;;  %v6896_v40 = vld [vmem:[#allocation11 + $0x1e4] ss:$8 sps:$4 sm:$0xff]  }
 0x4cc   :  { %4693 = vmatprep.subr.bf16.mxu1 %v6797_v34  ;;  %5137 = vmatpush1.bf16.msra.mxu0 %v6840_v41  ;;  %v6894_v34 = vld [vmem:[#allocation11 + $0x1e0] ss:$8 sps:$4 sm:$0xff]   ;;  %v6899_v41 = vld [vmem:[#allocation11 + $0x1d4] ss:$8 sps:$4 sm:$0xff]  }
 0x4cd   :  { %5138 = vmatprep.subr.bf16.mxu0 %v6845_v27  ;;  %v6897_v27 = vld [vmem:[#allocation11 + $0x1d0] ss:$8 sps:$4 sm:$0xff]  }
 0x4cf   :  { %4694 = vmatpush2.bf16.msra.mxu1 %v6795_v42  ;;  %v6902_v42 = vld [vmem:[#allocation11 + $0x1c4] ss:$8 sps:$4 sm:$0xff]  }
 0x4d0   :  { %4695 = vmatprep.subr.bf16.mxu1 %v6800_v43  ;;  %5139 = vmatpush2.bf16.msra.mxu0 %v6843_v35  ;;  %v6900_v43 = vld [vmem:[#allocation11 + $0x1c0] ss:$8 sps:$4 sm:$0xff]   ;;  %v6905_v35 = vld [vmem:[#allocation11 + $0x1b4] ss:$8 sps:$4 sm:$0xff]  }
 0x4d1   :  { %5140 = vmatprep.subr.bf16.mxu0 %v6848_v36  ;;  %v6903_v36 = vld [vmem:[#allocation11 + $0x1b0] ss:$8 sps:$4 sm:$0xff]  }
 0x4d3   :  { %4696 = vmatpush2.bf16.msra.mxu1 %v6798_v50  ;;  %v6908_v50 = vld [vmem:[#allocation11 + $0x1a4] ss:$8 sps:$4 sm:$0xff]  }
 0x4d4   :  { %4697 = vmatprep.subr.bf16.mxu1 %v6803_v51  ;;  %5141 = vmatpush2.bf16.msra.mxu0 %v6846_v52  ;;  %v6906_v51 = vld [vmem:[#allocation11 + $0x1a0] ss:$8 sps:$4 sm:$0xff]  }
 0x4d5   :  { %5142 = vmatprep.subr.bf16.mxu0 %v6851_v32 }
 0x4d7   :  { %4698 = vmatpush2.bf16.msra.mxu1 %v6801_v53 }
 0x4d8   :  { %4699 = vmatprep.subr.bf16.mxu1 %v6806_v56  ;;  %5143 = vmatpush2.bf16.msra.mxu0 %v6849_v33  ;;  %v6911_v33 = vld [vmem:[#allocation11 + $0x194] ss:$8 sps:$4 sm:$0xff]  }
 0x4d9   :  { %5144 = vmatprep.subr.bf16.mxu0 %v6854_v57 }
 0x4db   :  { %4700 = vmatpush2.bf16.msra.mxu1 %v6804_v58 }
 0x4dc   :  { %4701 = vmatprep.subr.bf16.mxu1 %v6809_v59  ;;  %5145 = vmatpush2.bf16.msra.mxu0 %v6852_v60  ;;  %v6909_v59 = vld [vmem:[#allocation11 + $0x190] ss:$8 sps:$4 sm:$0xff]  }
 0x4dd   :  { %5146 = vmatprep.subr.bf16.mxu0 %v6857_v48 }
 0x4df   :  { %4702 = vmatpush2.bf16.msra.mxu1 %v6807_v17 }
 0x4e0   :  { %4703 = vmatprep.subr.bf16.mxu1 %v6812_v61  ;;  %5147 = vmatpush2.bf16.msra.mxu0 %v6855_v54 }
 0x4e1   :  { %5148 = vmatprep.subr.bf16.mxu0 %v6860_v62  ;;  %v6914_v62 = vld [vmem:[#allocation11 + $0x184] ss:$8 sps:$4 sm:$0xff]  }
 0x4e3   :  { %4704 = vmatpush2.bf16.msra.mxu1 %v6810_v63 }
 0x4e4   :  { %4705 = vmatprep.subr.bf16.mxu1 %v6815_v1  ;;  %5149 = vmatpush2.bf16.msra.mxu0 %v6858_v2  ;;  %v6912_v2 = vld [vmem:[#allocation11 + $0x180] ss:$8 sps:$4 sm:$0xff]  }
 0x4e5   :  { %5150 = vmatprep.subr.bf16.mxu0 %v6863_v3 }
 0x4e7   :  { %4706 = vmatpush2.bf16.msra.mxu1 %v6813_v5  ;;  %v3101_v5 = vrot.slane %v7369_v55, %v7275_v7  ;;  %v6920_v7 = vld [vmem:[#allocation13 + $0x28] sm:$0xff]  }
 0x4e8   :  { %4707 = vmatprep.subr.bf16.mxu1 %v6818_v6  ;;  %5151 = vmatpush2.bf16.msra.mxu0 %v6861_v8 }
 0x4e9   :  { %5152 = vmatprep.subr.bf16.mxu0 %v6866_v10 }
 0x4eb   :  { %4708 = vmatpush2.bf16.msra.mxu1 %v6816_v12 }
 0x4ec   :  { %5153 = vmatpush2.bf16.msra.mxu0 %v6864_v20  ;;  %5163 = vmatprep.subr.bf16.mxu1 %v6869_v18  ;;  %v6915_v18 = vld [vmem:[#allocation13 + $0x78] sm:$0xff]  }
 0x4ed   :  { %6216 = vmatprep.subr.bf16.mxu0 %v6915_v18 }
 0x4ee   :  { %4710 = vmatmul.mubr.bf16.vlgmr.msra.gmra.mxu1 %v7359_v45  ;;  %v4506_v37 = vpop.f32.mrf.mxu0  ;;  %v6876_v45 = vld [vmem:[#allocation11 + $0x140] ss:$8 sps:$4 sm:$0xff]  }
 0x4ef   :  { %v7384_v13 = vadd.f32 %v4506_v37, %v7377_v4  ;;  %5164 = vmatpush1.bf16.msra.mxu1 %v6867_v16  ;;  %v6881_v4 = vld [vmem:[#allocation11 + $0x134] ss:$8 sps:$4 sm:$0xff]  }
 0x4f0   :  { %v4508_v14 = vpop.f32.mrf.mxu0  ;;  %5165 = vmatprep.subr.bf16.mxu1 %v6872_v19  ;;  %v6916_v19 = vld [vmem:[#allocation13 + $0x38] sm:$0xff]  }
 0x4f1   :  { %v4509_v53 = vadd.f32 %v4508_v14, %v7380_v11 }
 0x4f2   :  { %v4510_v15 = vpop.f32.mrf.mxu0 }
 0x4f3   :  { %5166 = vmatpush1.bf16.msra.mxu1 %v6870_v21  ;;  %v6917_v21 = vld [vmem:[#allocation13 + $0x70] sm:$0xff]  }
 0x4f4   :  { %v4511_v44 = vpop.f32.mrf.mxu0  ;;  %5167 = vmatprep.subr.bf16.mxu1 %v6875_v22  ;;  %v6918_v22 = vld [vmem:[#allocation13 + $0x30] sm:$0xff]  }
 0x4f7   :  { %5168 = vmatpush1.bf16.msra.mxu1 %v6873_v23  ;;  %v6919_v23 = vld [vmem:[#allocation13 + $0x68] sm:$0xff]  }
 0x4f8   :  { %5169 = vmatprep.subr.bf16.mxu1 %v6878_v24  ;;  %v6921_v24 = vld [vmem:[#allocation13 + $0x60] sm:$0xff]  }
 0x4fb   :  { %5170 = vmatpush1.bf16.msra.mxu1 %v6876_v45  ;;  %v6922_v45 = vld [vmem:[#allocation13 + $0x20] sm:$0xff]  }
 0x4fc   :  { %5171 = vmatprep.subr.bf16.mxu1 %v6881_v4  ;;  %v6923_v4 = vld [vmem:[#allocation13 + $0x58] sm:$0xff]  }
 0x4ff   :  { %5172 = vmatpush1.bf16.msra.mxu1 %v6879_v25  ;;  %v6924_v25 = vld [vmem:[#allocation13 + $0x18] sm:$0xff]  }
 0x500   :  { %5173 = vmatprep.subr.bf16.mxu1 %v6884_v26  ;;  %v6925_v26 = vld [vmem:[#allocation13 + $0x50] sm:$0xff]  }
 0x503   :  { %5174 = vmatpush1.bf16.msra.mxu1 %v6882_v28  ;;  %v6926_v28 = vld [vmem:[#allocation13 + $0x10] sm:$0xff]  }
 0x504   :  { %5175 = vmatprep.subr.bf16.mxu1 %v6887_v29  ;;  %v3105_v29 = vrot.slane %v7369_v55, %v7281_v9  ;;  %v6927_v9 = vld [vmem:[#allocation13 + $0x48] sm:$0xff]  }
 0x507   :  { %5176 = vmatpush1.bf16.msra.mxu1 %v6885_v30 }
 0x508   :  { %5177 = vmatprep.subr.bf16.mxu1 %v6890_v31 }
 0x50b   :  { %5178 = vmatpush1.bf16.msra.mxu1 %v6888_v46 }
 0x50c   :  { %5179 = vmatprep.subr.bf16.mxu1 %v6893_v38 }
 0x50f   :  { %5180 = vmatpush2.bf16.msra.mxu1 %v6891_v39 }
 0x510   :  { %5181 = vmatprep.subr.bf16.mxu1 %v6896_v40 }
 0x513   :  { %5182 = vmatpush2.bf16.msra.mxu1 %v6894_v34 }
 0x514   :  { %5183 = vmatprep.subr.bf16.mxu1 %v6899_v41 }
 0x517   :  { %5184 = vmatpush2.bf16.msra.mxu1 %v6897_v27 }
 0x518   :  { %5185 = vmatprep.subr.bf16.mxu1 %v6902_v42 }
 0x51b   :  { %5186 = vmatpush2.bf16.msra.mxu1 %v6900_v43 }
 0x51c   :  { %5187 = vmatprep.subr.bf16.mxu1 %v6905_v35 }
 0x51f   :  { %5188 = vmatpush2.bf16.msra.mxu1 %v6903_v36 }
 0x520   :  { %5189 = vmatprep.subr.bf16.mxu1 %v6908_v50 }
 0x523   :  { %5190 = vmatpush2.bf16.msra.mxu1 %v6906_v51  ;;  %v6928_v51 = vld [vmem:[#allocation13 + $0x8] sm:$0xff]  }
 0x524   :  { %5191 = vmatprep.subr.bf16.mxu1 %v6911_v33  ;;  %v6931_v33 = vld [vmem:[#allocation14 + $0x38] sm:$0xff]  }
 0x527   :  { %5192 = vmatpush2.bf16.msra.mxu1 %v6909_v59  ;;  %v6934_v59 = vld [vmem:[#allocation14 + $0x20] sm:$0xff]  }
 0x528   :  { %5193 = vmatprep.subr.bf16.mxu1 %v6914_v62 }
 0x52b   :  { %5194 = vmatpush2.bf16.msra.mxu1 %v6912_v2 }
 0x52c   :  { %6267 = vmatprep.subr.bf16.mxu1 %v7147_v0 }
 0x52e   :  { %v4588_v52 = vpop.f32.mrf.mxu0  ;;  %v4547_v32 = vpop.f32.mrf.mxu1 }
 0x52f   :  { %v4548_v56 = vadd.f32 %v4547_v32, %v7384_v13  ;;  %v4589_v6 = vadd.f32 %v4588_v52, %v3101_v5  ;;  %v6929_v32 = vld [vmem:[#allocation13 + $0x40] sm:$0xff]  }
 0x530   :  { %v4590_v57 = vpop.f32.mrf.mxu0  ;;  %v4549_v58 = vpop.f32.mrf.mxu1 }
 0x531   :  { %v4550_v60 = vadd.f32 %v4549_v58, %v4509_v53  ;;  %v4718_v48 = vmax.f32 %v4548_v56, 0.0  ;;  %v4591_v30 = vadd.f32 %v4590_v57, %v3105_v29  ;;  %v6930_v56 = vld [vmem:[#allocation13] sm:$0xff]   ;;  %v6932_v57 = vld [vmem:[#allocation14 + $0x30] sm:$0xff]   ;;  %v6933_v58 = vld [vmem:[#allocation14 + $0x28] sm:$0xff]  }
 0x532   :  { %v4592_v17 = vpop.f32.mrf.mxu0  ;;  %v4551_v61 = vpop.f32.mrf.mxu1 }
 0x533   :  { %v4719_v54 = vmax.f32 %v4550_v60, 0.0  ;;  %v4722_v11 = vpack.c.bf16 %v4718_v48, %v4718_v48  ;;  %v6935_v60 = vld [vmem:[#allocation14 + $0x18] sm:$0xff]  }
 0x534   :  { %v4593_v63 = vpop.f32.mrf.mxu0  ;;  %v4552_v1 = vpop.f32.mrf.mxu1  ;;  %v4790_v48 = vld [vmem:[%s7425_s9 + $0x13] sm:$0x3] }
 0x535   :  { %v4723_v3 = vpack.c.bf16 %v4719_v54, %v4719_v54  ;;  %v4795_v17 = vrot.slane %v4790_v48, %v7264_v47  ;;  %v4799_v61 = vrot.slane %v4790_v48, %v7270_v49  ;;  %v6937_v47 = vld [vmem:[#allocation14 + $0x8] sm:$0xff]   ;;  %v6938_v49 = vld [vmem:[#allocation14] sm:$0xff]  }
 0x537   :  { %5154 = vmatprep.mubr.bf16.mxu0 %v4723_v3 }
 0x538   :  { %5155 = vmatmul.mubr.bf16.vlgmr.msra.gmra.mxu0 %v4722_v11 }
 0x539   :  { %6217 = vmatpush3.bf16.msra.mxu0 %v6916_v19 }
 0x53a   :  { %6218 = vmatprep.subr.bf16.mxu0 %v6917_v21 }
 0x53d   :  { %6219 = vmatpush3.bf16.msra.mxu0 %v6918_v22  ;;  %v6198_v22 = vld [vmem:[%s7425_s9 + $0x16] ss:$0 sm:$0xff] }
 0x53e   :  { %6220 = vmatprep.subr.bf16.mxu0 %v6919_v23 }
 0x541   :  { %6221 = vmatpush3.bf16.msra.mxu0 %v6920_v7 }
 0x542   :  { %6222 = vmatprep.subr.bf16.mxu0 %v6921_v24 }
 0x545   :  { %6223 = vmatpush3.bf16.msra.mxu0 %v6922_v45 }
 0x546   :  { %6224 = vmatprep.subr.bf16.mxu0 %v6923_v4 }
 0x549   :  { %6225 = vmatpush3.bf16.msra.mxu0 %v6924_v25 }
 0x54a   :  { %6226 = vmatprep.subr.bf16.mxu0 %v6925_v26 }
 0x54d   :  { %6227 = vmatpush3.bf16.msra.mxu0 %v6926_v28 }
 0x54e   :  { %6228 = vmatprep.subr.bf16.mxu0 %v6927_v9 }
 0x551   :  { %6229 = vmatpush3.bf16.msra.mxu0 %v6928_v51 }
 0x552   :  { %6230 = vmatprep.subr.bf16.mxu0 %v6929_v32 }
 0x555   :  { %6231 = vmatpush3.bf16.msra.mxu0 %v6930_v56 }
 0x56e   :  { %v4629_v8 = vpop.f32.mrf.mxu1  ;;  %v4670_v10 = vpop.f32.mrf.mxu0 }
 0x56f   :  { %v4630_v12 = vadd.f32 %v4629_v8, %v4589_v6 }
 0x570   :  { %v4631_v20 = vpop.f32.mrf.mxu1  ;;  %v4672_v37 = vpop.f32.mrf.mxu0 }
 0x571   :  { %v4671_v13 = vadd.f32 %v4670_v10, %v4630_v12  ;;  %v4632_v31 = vadd.f32 %v4631_v20, %v4591_v30  ;;  %v6936_v20 = vld [vmem:[#allocation14 + $0x10] sm:$0xff]  }
 0x572   :  { %v4633_v14 = vpop.f32.mrf.mxu1  ;;  %v4674_v15 = vpop.f32.mrf.mxu0 }
 0x573   :  { %v4673_v38 = vadd.f32 %v4672_v37, %v4632_v31 }
 0x574   :  { %v4634_v44 = vpop.f32.mrf.mxu1  ;;  %v4675_v16 = vpop.f32.mrf.mxu0 }
 0x5ae   :  { %v4711_v46 = vpop.f32.mrf.mxu1 }
 0x5af   :  { %v4712_v39 = vadd.f32 %v4711_v46, %v4671_v13  ;;  %v6181_v13 = vld [vmem:[%s7425_s9 + $0x15] ss:$0 sm:$0xff] }
 0x5b0   :  { %v4713_v40 = vpop.f32.mrf.mxu1 }
 0x5b1   :  { %v4714_v34 = vadd.f32 %v4713_v40, %v4673_v38  ;;  %v4720_v41 = vmax.f32 %v4712_v39, 0.0 }
 0x5b2   :  { %v4715_v27 = vpop.f32.mrf.mxu1 }
 0x5b3   :  { %v4721_v42 = vmax.f32 %v4714_v34, 0.0  ;;  %v4724_v36 = vpack.c.bf16 %v4720_v41, %v4720_v41 }
 0x5b4   :  { %v4716_v43 = vpop.f32.mrf.mxu1 }
 0x5b5   :  { %v4725_v35 = vpack.c.bf16 %v4721_v42, %v4721_v42 }
 0x5b7   :  { %5195 = vmatprep.mubr.bf16.mxu1 %v4725_v35 }
 0x5b8   :  { %5196 = vmatmul.mubr.bf16.vlgmr.msra.gmra.mxu1 %v4724_v36 }
 0x5b9   :  { %6283 = vmatprep.mubr.msk.bf16.mxu1 %vm7148_vm0, %v7147_v0  ;;  %6268 = vmatpush3.bf16.msra.mxu1 %v6931_v33 }
 0x5ba   :  { %6269 = vmatprep.subr.bf16.mxu1 %v7147_v0 }
 0x5bd   :  { %6270 = vmatpush3.bf16.msra.mxu1 %v6932_v57 }
 0x5be   :  { %6271 = vmatprep.subr.bf16.mxu1 %v7147_v0 }
 0x5c1   :  { %6272 = vmatpush3.bf16.msra.mxu1 %v6933_v58 }
 0x5c2   :  { %6273 = vmatprep.subr.bf16.mxu1 %v7147_v0 }
 0x5c5   :  { %6274 = vmatpush3.bf16.msra.mxu1 %v6934_v59 }
 0x5c6   :  { %6275 = vmatprep.subr.bf16.mxu1 %v7147_v0 }
 0x5c9   :  { %6276 = vmatpush3.bf16.msra.mxu1 %v6935_v60 }
 0x5ca   :  { %6277 = vmatprep.subr.bf16.mxu1 %v7147_v0 }
 0x5cd   :  { %6278 = vmatpush3.bf16.msra.mxu1 %v6936_v20 }
 0x5ce   :  { %6279 = vmatprep.subr.bf16.mxu1 %v7147_v0 }
 0x5d1   :  { %6280 = vmatpush3.bf16.msra.mxu1 %v6937_v47 }
 0x5d2   :  { %6281 = vmatprep.subr.bf16.mxu1 %v7147_v0 }
 0x5d5   :  { %6282 = vmatpush3.bf16.msra.mxu1 %v6938_v49 }
 0x5f8   :  { %v5156_v50 = vpop.f32.mrf.mxu0 }
 0x5f9   :  { %v5157_v54 = vadd.f32 %v5156_v50, %v4795_v17 }
 0x5fa   :  { %v5158_v55 = vpop.f32.mrf.mxu0 }
 0x5fb   :  { %v5159_v63 = vadd.f32 %v5158_v55, %v4799_v61 }
 0x5fc   :  { %v5160_v52 = vpop.f32.mrf.mxu0 }
 0x5fe   :  { %v5161_v53 = vpop.f32.mrf.mxu0 }
 0x678   :  { %v5197_v62 = vpop.f32.mrf.mxu1 }
 0x679   :  { %v5198_v1 = vadd.f32 %v5197_v62, %v5157_v54 }
 0x67a   :  { %v5199_v2 = vpop.f32.mrf.mxu1 }
 0x67b   :  { %v5200_v3 = vadd.f32 %v5199_v2, %v5159_v63  ;;  %v5204_v11 = vmax.f32 %v5198_v1, 0.0 }
 0x67c   :  { %v5201_v5 = vpop.f32.mrf.mxu1 }
 0x67d   :  { %v5205_v6 = vmax.f32 %v5200_v3, 0.0  ;;  %v5206_v12 = vpack.c.bf16 %v5204_v11, %v5204_v11 }
 0x67e   :  { %v5202_v8 = vpop.f32.mrf.mxu1 }
 0x67f   :  { %v5207_v10 = vpack.c.bf16 %v5205_v6, %v5205_v6 }
 0x681   :  { %5375 = vmatprep.mubr.bf16.mxu0 %v5207_v10 }
 0x682   :  { %5376 = vmatmul.mubr.bf16.vlgmr.msra.gmra.mxu0 %v5206_v12 }
 0x742   :  { %v6232_v37 = vpop.f32.mrf.mxu0 }
 0x744   :  { %v6233_v14 = vpop.f32.mrf.mxu0 }
 0x745   :  { %v6234_v15 = vadd.f32 %v6233_v14, %v6232_v37 }
 0x746   :  { %v6235_v44 = vpop.f32.mrf.mxu0 }
 0x747   :  { %v5378_v16 = vadd.f32 %v6234_v15, %v6181_v13 }
 0x748   :  { %v6236_v18 = vpop.f32.mrf.mxu0 }
 0x749   :  { %v5383_v19 = vmax.f32 %v5378_v16, 0.0 }
 0x74b   :  { %v5384_v21 = vpack.c.bf16 %v5383_v19, %v5383_v19 }
 0x74d   :  { %6284 = vmatmul.mubr.bf16.vlgmr.msra.gmra.mxu1 %v5384_v21 }
 0x80d   :  { %v5490_v0 = vpop.f32.mrf.mxu1 }
 0x80e   :  { %v5491_v23 = vadd.f32 %v6198_v22, %v5490_v0 }
 0x80f   :  { %v6285_v7 = vpop.f32.mrf.mxu1 }
 0x810   :  { %5496 = vst [vmem:[#allocation16] sm:$0xff] %v5491_v23 }
 0x811   :  { %v5493_v24 = vpop.f32.mrf.mxu1 }
 0x812   :  { %7110 = shalt.err (!%p7107_p2)
}
 0x813   :  { %5506 = dma.vmem_to_hbm [thread:$0]  %s5504_s27, 128, %s7426_s10, [#allocation4]   ;;  %v6286_v45 = vpop.f32.mrf.mxu1 }
 0x814   :  { %7129 = dma.done.wait [#allocation4], 128  }
 0x815   :  { %7130 = vsyncadd [#allocation4], 4294967168 }
 0x816   :  { %5510 = vsyncpa [#allocation3], 1 }
 0x817   :  { %5511 = vsyncpa [#allocation6], 1 }
 0x818   :  { %5512 = vsyncpa [#allocation9], 1 }
 0x819   :  { %5513 = vsyncpa [#allocation12], 1 }
 0x81a   :  { %5514 = vsyncpa [#allocation15], 1 }
 0x81b   :  { %5515 = vsyncpa [#allocation4], 1 }

</bundles_post_ra>
